<compile_context>
chip_gen: v5e
topology: v5e:2x2
jax: 0.10.0
libtpu: 0.0.40
codegen_flags: <defaults>
</compile_context>

<pallas_src>
import functools

import jax
import jax.numpy as jnp
import numpy as np
from jax.experimental import pallas as pl
from jax.experimental.pallas import tpu as pltpu


# -----------------------------------------------------------------------------
# Fused Pallas kernel (one batch image per grid step)
# -----------------------------------------------------------------------------
def _rcca_fused_kernel(x_ref, wA_ref, wqkv_ref, wB_ref, wY_ref, msk_ref,
                       aux_ref, gam_ref, o_ref, *,
                       H, W, inter, cqp, out_c, recurrence):
    # x_ref   : (H*W, Cin) f32      token rows of one batch image (row = h*W + w)
    # wA_ref  : (9, Cin, inter+out_c) bf16   conva | bottleneck-x per tap (BN scale folded)
    # wqkv_ref: (inter, 2*cqp+inter)  bf16   fused q/k/v 1x1 weights (q/k zero-padded)
    # wB_ref  : (9, inter, inter)     bf16   convb per tap (scale folded)
    # wY_ref  : (9, inter, out_c)     bf16   bottleneck-y per tap (scale folded)
    # msk_ref : (9, H*W, 1) f32      per-tap in-image masks
    # aux_ref : (8, 128) f32         rows = [shift_a, shift_b, shift_c, bias_qkv, 0...]
    # gam_ref : (1,) f32 in SMEM     CC_module.gamma
    # o_ref   : (H*W, out_c) f32
    HW = H * W
    aux = aux_ref[...]
    ha = aux[0:1, :inter]
    hb = aux[1:2, :inter]
    hc = aux[2:3, :out_c]
    bqkv = aux[3:4, :2 * cqp + inter]
    gamma = gam_ref[0]

    taps = [(dh, dw) for dh in (-1, 0, 1) for dw in (-1, 0, 1)]

    def conv3x3(rows, w_ref):
        """3x3 SAME conv as 9 accumulating MXU dots on token rows.
        rows: (HW, C) f32; w_ref: (9, C, N) bf16. Returns (HW, N) f32."""
        acc = None
        for t, (dh, dw) in enumerate(taps):
            delta = dh * W + dw
            if delta == 0:
                shifted = rows
            else:
                # shifted[r] = rows[r + delta]; wrap-around rows are masked below
                shifted = pltpu.roll(rows, (-delta) % HW, axis=0)
            contrib = jnp.dot(shifted.astype(jnp.bfloat16), w_ref[t],
                              preferred_element_type=jnp.float32)
            if delta != 0:
                contrib = contrib * msk_ref[t]          # zero padding contributions
            acc = contrib if acc is None else acc + contrib
        return acc

    # ---- conva + bottleneck x-branch: one fused N=(inter+out_c) pass ---------
    x_rows = x_ref[...]                                  # (HW, Cin) f32
    fused = conv3x3(x_rows, wA_ref)                      # (HW, inter+out_c)
    a = jnp.maximum(fused[:, :inter] + ha, 0.0)          # conva: +shift, ReLU
    z_x = fused[:, inter:]                               # bottleneck x-branch (scale folded)

    # ---- criss-cross attention (recurrence x), per image ---------------------
    row_i = jax.lax.broadcasted_iota(jnp.int32, (H, 1, H), 0)
    row_j = jax.lax.broadcasted_iota(jnp.int32, (H, 1, H), 2)
    diag = row_i == row_j
    wqkv = wqkv_ref[...]
    for _ in range(recurrence):
        qkv = jnp.dot(a.astype(jnp.bfloat16), wqkv,
                      preferred_element_type=jnp.float32) + bqkv     # (HW, 2cqp+inter)
        q3 = qkv[:, :cqp].reshape(H, W, cqp).astype(jnp.bfloat16)
        k3 = qkv[:, cqp:2 * cqp].reshape(H, W, cqp).astype(jnp.bfloat16)
        v3 = qkv[:, 2 * cqp:].reshape(H, W, inter).astype(jnp.bfloat16)
        # column-direction energy (same w, varying row j); finite self-mask
        e_h = jnp.einsum('hwc,jwc->hwj', q3, k3,
                         preferred_element_type=jnp.float32)
        e_h = jnp.where(diag, -1e30, e_h)
        # row-direction energy (same h, varying column j)
        e_w = jnp.einsum('hwc,hjc->hwj', q3, k3,
                         preferred_element_type=jnp.float32)
        # concat-free joint softmax over the H+W candidates
        m = jnp.maximum(e_h.max(-1, keepdims=True), e_w.max(-1, keepdims=True))
        p_h = jnp.exp(e_h - m)
        p_w = jnp.exp(e_w - m)
        inv = pl.reciprocal(p_h.sum(-1, keepdims=True) + p_w.sum(-1, keepdims=True),
                            approx=True)
        o_h = jnp.einsum('hwj,jwc->hwc', (p_h * inv).astype(jnp.bfloat16), v3,
                         preferred_element_type=jnp.float32)
        o_w = jnp.einsum('hwj,hjc->hwc', (p_w * inv).astype(jnp.bfloat16), v3,
                         preferred_element_type=jnp.float32)
        a = gamma * (o_h + o_w).reshape(HW, inter) + a

    # ---- convb, then bottleneck y-branch + shift (Dropout2d: identity, eval) --
    y = jnp.maximum(conv3x3(a, wB_ref) + hb, 0.0)        # (HW, inter)
    z = z_x + conv3x3(y, wY_ref) + hc                    # (HW, out_c)
    o_ref[...] = z


# -----------------------------------------------------------------------------
# Wrapper: weight packing / layout glue + single pallas_call
# -----------------------------------------------------------------------------
def rcca_forward(x_nchw, params, recurrence=1):
    B, Cin, H, W = x_nchw.shape
    HW = H * W
    inter = params['conva_w'].shape[-1]
    out_c = params['bott_w'].shape[-1]
    cca = params['cca']
    cq = cca['wq'].shape[1]
    cqp = max(8, cq)                 # zero-pad q/k channels to >= 8 lanes (exact)
    f32, bf16 = jnp.float32, jnp.bfloat16

    # token rows (B, HW, Cin): single NCHW -> NHWC transpose, no pad pass
    x_rows = jnp.transpose(x_nchw, (0, 2, 3, 1)).reshape(B, HW, Cin)

    # fold BN scale into weight columns; per-tap layout (9, Cin_or_inter, N)
    sa = params['conva_scale'][None, None, None, :]
    sb = params['convb_scale'][None, None, None, :]
    sc = params['bott_scale'][None, None, None, :]
    wA = jnp.concatenate([params['conva_w'] * sa,
                          params['bott_w'][:, :, :Cin, :] * sc],
                         axis=-1).reshape(9, Cin, inter + out_c).astype(bf16)
    wB = (params['convb_w'] * sb).reshape(9, inter, inter).astype(bf16)
    wY = (params['bott_w'][:, :, Cin:, :] * sc).reshape(9, inter, out_c).astype(bf16)

    # fused q/k/v projection weight (q/k zero-padded to cqp) + bias
    pad_q = ((0, 0), (0, cqp - cq))
    wqkv = jnp.concatenate([jnp.pad(cca['wq'], pad_q),
                            jnp.pad(cca['wk'], pad_q),
                            cca['wv']], axis=1).astype(bf16)       # (inter, 2cqp+inter)
    bqkv = jnp.concatenate([jnp.pad(cca['bq'], pad_q),
                            jnp.pad(cca['bk'], pad_q),
                            cca['bv']], axis=1)                    # (1, 2cqp+inter)

    # BN shifts + qkv bias packed into one (8, 128) aux block (single DMA)
    def row(v):
        v = jnp.reshape(v, (-1,)).astype(f32)
        return jnp.pad(v, (0, 128 - v.shape[0]))[None, :]
    aux = jnp.concatenate([row(params['conva_shift']), row(params['convb_shift']),
                           row(params['bott_shift']), row(bqkv),
                           jnp.zeros((4, 128), f32)], axis=0)      # (8, 128)

    # precomputed per-tap boundary masks (static host constants)
    hh, ww = np.meshgrid(np.arange(H), np.arange(W), indexing='ij')
    masks_np = np.zeros((9, HW, 1), np.float32)
    t = 0
    for dh in (-1, 0, 1):
        for dw in (-1, 0, 1):
            ok = (hh + dh >= 0) & (hh + dh < H) & (ww + dw >= 0) & (ww + dw < W)
            masks_np[t, :, 0] = ok.reshape(HW).astype(np.float32)
            t += 1
    masks = jnp.asarray(masks_np)

    gamma = jnp.reshape(cca['gamma'], (1,)).astype(f32)            # SMEM scalar

    kernel = functools.partial(_rcca_fused_kernel, H=H, W=W, inter=inter,
                               cqp=cqp, out_c=out_c, recurrence=recurrence)

    z = pl.pallas_call(
        kernel,
        out_shape=jax.ShapeDtypeStruct((B, HW, out_c), f32),
        grid_spec=pltpu.PrefetchScalarGridSpec(
            num_scalar_prefetch=0,
            grid=(B,),                                             # one image per step
            in_specs=[
                pl.BlockSpec((None, HW, Cin), lambda b: (b, 0, 0)),
                pl.BlockSpec((9, Cin, inter + out_c), lambda b: (0, 0, 0)),
                pl.BlockSpec((inter, 2 * cqp + inter), lambda b: (0, 0)),
                pl.BlockSpec((9, inter, inter), lambda b: (0, 0, 0)),
                pl.BlockSpec((9, inter, out_c), lambda b: (0, 0, 0)),
                pl.BlockSpec((9, HW, 1), lambda b: (0, 0, 0)),
                pl.BlockSpec((8, 128), lambda b: (0, 0)),
                pl.BlockSpec(memory_space=pltpu.MemorySpace.SMEM),
            ],
            out_specs=pl.BlockSpec((None, HW, out_c), lambda b: (b, 0, 0)),
        ),
        compiler_params=pltpu.CompilerParams(
            dimension_semantics=("parallel",),          # v7x: 2 TCs split the batch
            vmem_limit_bytes=16 * 1024 * 1024),
    )(x_rows, wA, wqkv, wB, wY, masks, aux, gamma)

    return jnp.transpose(z.reshape(B, H, W, out_c), (0, 3, 1, 2))  # back to NCHW


# -----------------------------------------------------------------------------
# Pure-JAX reference (for correctness check)
# -----------------------------------------------------------------------------
def _conv_bn_ref(x, w, scale, shift, relu):
    y = jax.lax.conv_general_dilated(
        x, w, (1, 1), 'SAME', dimension_numbers=('NHWC', 'HWIO', 'NHWC'))
    y = y * scale + shift
    return jnp.maximum(y, 0.0) if relu else y


def _cc_ref(x, p):
    B, H, W, C = x.shape
    q = jnp.einsum('bhwc,cd->bhwd', x, p['wq']) + p['bq'][0]
    k = jnp.einsum('bhwc,cd->bhwd', x, p['wk']) + p['bk'][0]
    v = jnp.einsum('bhwc,cd->bhwd', x, p['wv']) + p['bv'][0]
    e_h = jnp.einsum('bhwc,bjwc->bhwj', q, k)
    e_h = e_h + jnp.where(jnp.eye(H, dtype=bool), -jnp.inf, 0.0)[None, :, None, :]
    e_w = jnp.einsum('bhwc,bhjc->bhwj', q, k)
    att = jax.nn.softmax(jnp.concatenate([e_h, e_w], axis=-1), axis=-1)
    out_h = jnp.einsum('bhwj,bjwc->bhwc', att[..., :H], v)
    out_w = jnp.einsum('bhwj,bhjc->bhwc', att[..., H:], v)
    return p['gamma'][0, 0] * (out_h + out_w) + x


def rcca_reference(x_nchw, params, recurrence=1):
    x = jnp.transpose(x_nchw, (0, 2, 3, 1))
    out = _conv_bn_ref(x, params['conva_w'], params['conva_scale'],
                       params['conva_shift'], True)
    for _ in range(recurrence):
        out = _cc_ref(out, params['cca'])
    out = _conv_bn_ref(out, params['convb_w'], params['convb_scale'],
                       params['convb_shift'], True)
    out = jnp.concatenate([x, out], axis=-1)
    out = _conv_bn_ref(out, params['bott_w'], params['bott_scale'],
                       params['bott_shift'], False)
    return jnp.transpose(out, (0, 3, 1, 2))


# -----------------------------------------------------------------------------
# Deterministic parameter construction
# -----------------------------------------------------------------------------
def make_params(key, in_c, out_c, gamma=0.5):
    inter = in_c // 4
    cq = inter // 8
    ks = jax.random.split(key, 16)

    def conv_w(k, kh, kw, ci, co):
        fan_in = kh * kw * ci
        return (jax.random.normal(k, (kh, kw, ci, co), jnp.float32)
                / np.sqrt(fan_in)).astype(jnp.float32)

    def bn_affine(k, c):
        k1, k2, k3, k4 = jax.random.split(k, 4)
        g = jax.random.uniform(k1, (c,), jnp.float32, 0.5, 1.5)
        b = 0.1 * jax.random.normal(k2, (c,), jnp.float32)
        mean = 0.1 * jax.random.normal(k3, (c,), jnp.float32)
        var = jax.random.uniform(k4, (c,), jnp.float32, 0.5, 1.5)
        scale = g / jnp.sqrt(var + 1e-5)
        shift = b - mean * scale
        return scale, shift

    conva_scale, conva_shift = bn_affine(ks[1], inter)
    convb_scale, convb_shift = bn_affine(ks[3], inter)
    bott_scale, bott_shift = bn_affine(ks[5], out_c)

    cca = {
        'wq': conv_w(ks[6], 1, 1, inter, cq)[0, 0],
        'bq': 0.1 * jax.random.normal(ks[7], (1, cq), jnp.float32),
        'wk': conv_w(ks[8], 1, 1, inter, cq)[0, 0],
        'bk': 0.1 * jax.random.normal(ks[9], (1, cq), jnp.float32),
        'wv': conv_w(ks[10], 1, 1, inter, inter)[0, 0],
        'bv': 0.1 * jax.random.normal(ks[11], (1, inter), jnp.float32),
        'gamma': jnp.full((1, 1), gamma, jnp.float32),
    }

    return {
        'conva_w': conv_w(ks[0], 3, 3, in_c, inter),
        'conva_scale': conva_scale, 'conva_shift': conva_shift,
        'cca': cca,
        'convb_w': conv_w(ks[2], 3, 3, inter, inter),
        'convb_scale': convb_scale, 'convb_shift': convb_shift,
        'bott_w': conv_w(ks[4], 3, 3, in_c + inter, out_c),
        'bott_scale': bott_scale, 'bott_shift': bott_shift,
    }


# -----------------------------------------------------------------------------
if __name__ == "__main__":
    B, IN_C, OUT_C, H, W = 2, 64, 32, 8, 8                 # inter=16, cq=2
    key = jax.random.PRNGKey(0)
    kx, kp = jax.random.split(key)
    x = jax.random.normal(kx, (B, IN_C, H, W), jnp.float32)  # NCHW like PyTorch

    params = make_params(kp, IN_C, OUT_C, gamma=0.5)          # attention path exercised
    params0 = dict(params)                                     # PyTorch init regime
    params0['cca'] = dict(params['cca'])
    params0['cca']['gamma'] = jnp.zeros((1, 1), jnp.float32)

    fwd = jax.jit(lambda inp, p: rcca_forward(inp, p, 1))
    ref = jax.jit(lambda inp, p: rcca_reference(inp, p, 1))

    # gamma = 0.5 (attention branch active)
    out1 = jax.block_until_ready(fwd(x, params))
    np.testing.assert_allclose(np.asarray(out1), np.asarray(ref(x, params)),
                               rtol=3e-2, atol=3e-2)

    # gamma = 0.0 (PyTorch's zero-initialized gamma; attention reduces to identity)
    out0 = jax.block_until_ready(fwd(x, params0))
    np.testing.assert_allclose(np.asarray(out0), np.asarray(ref(x, params0)),
                               rtol=3e-2, atol=3e-2)

    print("KERNEL_OK")
</pallas_src>

<mosaic_0001>
module attributes {stable_mosaic.version = 11 : i64} {
  func.func @_rcca_fused_kernel(%arg0: i32, %arg1: memref<1x64x64xf32, #tpu.memory_space<vmem>>, %arg2: memref<9x64x48xbf16, #tpu.memory_space<vmem>>, %arg3: memref<16x32xbf16, #tpu.memory_space<vmem>>, %arg4: memref<9x16x16xbf16, #tpu.memory_space<vmem>>, %arg5: memref<9x16x32xbf16, #tpu.memory_space<vmem>>, %arg6: memref<9x64x1xf32, #tpu.memory_space<vmem>>, %arg7: memref<8x128xf32, #tpu.memory_space<vmem>>, %arg8: memref<1xf32, #tpu.memory_space<smem>>, %arg9: memref<1x64x32xf32, #tpu.memory_space<vmem>>) attributes {dimension_semantics = [#tpu.dimension_semantics<parallel>], iteration_bounds = array<i64: 2>, scalar_prefetch = 0 : i64, scratch_operands = 0 : i64, tpu.core_type = #tpu.core_type<tc>, window_params = [{transform_indices = @transform_0, window_bounds = array<i64: 1, 64, 64>}, {pipeline_mode = #tpu.pipeline_mode<synchronous>, transform_indices = @transform_1, window_bounds = array<i64: 9, 64, 48>}, {pipeline_mode = #tpu.pipeline_mode<synchronous>, transform_indices = @transform_2, window_bounds = array<i64: 16, 32>}, {pipeline_mode = #tpu.pipeline_mode<synchronous>, transform_indices = @transform_3, window_bounds = array<i64: 9, 16, 16>}, {pipeline_mode = #tpu.pipeline_mode<synchronous>, transform_indices = @transform_4, window_bounds = array<i64: 9, 16, 32>}, {pipeline_mode = #tpu.pipeline_mode<synchronous>, transform_indices = @transform_5, window_bounds = array<i64: 9, 64, 1>}, {pipeline_mode = #tpu.pipeline_mode<synchronous>, transform_indices = @transform_6, window_bounds = array<i64: 8, 128>}, {transform_indices = @transform_7, window_bounds = array<i64: 1>}, {transform_indices = @transform_8, window_bounds = array<i64: 1, 64, 32>}]} {
    %c0 = arith.constant 0 : index
    %c0_0 = arith.constant 0 : index
    %0 = vector.load %arg7[%c0, %c0_0] : memref<8x128xf32, #tpu.memory_space<vmem>>, vector<8x128xf32>
    %1 = vector.extract_strided_slice %0 {offsets = [0, 0], sizes = [1, 16], strides = [1, 1]} : vector<8x128xf32> to vector<1x16xf32>
    %2 = vector.extract_strided_slice %0 {offsets = [1, 0], sizes = [1, 16], strides = [1, 1]} : vector<8x128xf32> to vector<1x16xf32>
    %3 = vector.extract_strided_slice %0 {offsets = [2, 0], sizes = [1, 32], strides = [1, 1]} : vector<8x128xf32> to vector<1x32xf32>
    %4 = vector.extract_strided_slice %0 {offsets = [3, 0], sizes = [1, 32], strides = [1, 1]} : vector<8x128xf32> to vector<1x32xf32>
    %c0_1 = arith.constant 0 : index
    %5 = memref.load %arg8[%c0_1] : memref<1xf32, #tpu.memory_space<smem>>
    %c0_2 = arith.constant 0 : index
    %c0_3 = arith.constant 0 : index
    %c0_4 = arith.constant 0 : index
    %6 = vector.load %arg1[%c0_2, %c0_3, %c0_4] : memref<1x64x64xf32, #tpu.memory_space<vmem>>, vector<1x64x64xf32>
    %7 = vector.shape_cast %6 : vector<1x64x64xf32> to vector<64x64xf32>
    %c9_i32 = arith.constant 9 : i32
    %8 = tpu.dynamic_rotate %7 by %c9_i32 dim 0 : vector<64x64xf32>, i32 -> vector<64x64xf32>
    %9 = arith.truncf %8 : vector<64x64xf32> to vector<64x64xbf16>
    %c0_5 = arith.constant 0 : index
    %c0_6 = arith.constant 0 : index
    %c0_7 = arith.constant 0 : index
    %10 = vector.load %arg2[%c0_5, %c0_6, %c0_7] : memref<9x64x48xbf16, #tpu.memory_space<vmem>>, vector<1x64x48xbf16>
    %11 = vector.shape_cast %10 : vector<1x64x48xbf16> to vector<64x48xbf16>
    %cst = arith.constant dense<0.000000e+00> : vector<64x48xf32>
    %12 = tpu.matmul %9, %11, %cst {dimension_numbers = #tpu.dot_dimension_numbers<[1], [0], [0], [1], [0, 0, 1, 1], [], []>} : vector<64x64xbf16>, vector<64x48xbf16>, vector<64x48xf32> -> vector<64x48xf32>
    %c0_8 = arith.constant 0 : index
    %c0_9 = arith.constant 0 : index
    %c0_10 = arith.constant 0 : index
    %13 = vector.load %arg6[%c0_8, %c0_9, %c0_10] : memref<9x64x1xf32, #tpu.memory_space<vmem>>, vector<1x64x1xf32>
    %14 = vector.shape_cast %13 : vector<1x64x1xf32> to vector<64x1xf32>
    %15 = vector.broadcast %14 : vector<64x1xf32> to vector<64x48xf32>
    %16 = arith.mulf %12, %15 : vector<64x48xf32>
    %c8_i32 = arith.constant 8 : i32
    %17 = tpu.dynamic_rotate %7 by %c8_i32 dim 0 : vector<64x64xf32>, i32 -> vector<64x64xf32>
    %18 = arith.truncf %17 : vector<64x64xf32> to vector<64x64xbf16>
    %c1 = arith.constant 1 : index
    %c0_11 = arith.constant 0 : index
    %c0_12 = arith.constant 0 : index
    %19 = vector.load %arg2[%c1, %c0_11, %c0_12] : memref<9x64x48xbf16, #tpu.memory_space<vmem>>, vector<1x64x48xbf16>
    %20 = vector.shape_cast %19 : vector<1x64x48xbf16> to vector<64x48xbf16>
    %cst_13 = arith.constant dense<0.000000e+00> : vector<64x48xf32>
    %21 = tpu.matmul %18, %20, %cst_13 {dimension_numbers = #tpu.dot_dimension_numbers<[1], [0], [0], [1], [0, 0, 1, 1], [], []>} : vector<64x64xbf16>, vector<64x48xbf16>, vector<64x48xf32> -> vector<64x48xf32>
    %c1_14 = arith.constant 1 : index
    %c0_15 = arith.constant 0 : index
    %c0_16 = arith.constant 0 : index
    %22 = vector.load %arg6[%c1_14, %c0_15, %c0_16] : memref<9x64x1xf32, #tpu.memory_space<vmem>>, vector<1x64x1xf32>
    %23 = vector.shape_cast %22 : vector<1x64x1xf32> to vector<64x1xf32>
    %24 = vector.broadcast %23 : vector<64x1xf32> to vector<64x48xf32>
    %25 = arith.mulf %21, %24 : vector<64x48xf32>
    %26 = arith.addf %16, %25 : vector<64x48xf32>
    %c7_i32 = arith.constant 7 : i32
    %27 = tpu.dynamic_rotate %7 by %c7_i32 dim 0 : vector<64x64xf32>, i32 -> vector<64x64xf32>
    %28 = arith.truncf %27 : vector<64x64xf32> to vector<64x64xbf16>
    %c2 = arith.constant 2 : index
    %c0_17 = arith.constant 0 : index
    %c0_18 = arith.constant 0 : index
    %29 = vector.load %arg2[%c2, %c0_17, %c0_18] : memref<9x64x48xbf16, #tpu.memory_space<vmem>>, vector<1x64x48xbf16>
    %30 = vector.shape_cast %29 : vector<1x64x48xbf16> to vector<64x48xbf16>
    %cst_19 = arith.constant dense<0.000000e+00> : vector<64x48xf32>
    %31 = tpu.matmul %28, %30, %cst_19 {dimension_numbers = #tpu.dot_dimension_numbers<[1], [0], [0], [1], [0, 0, 1, 1], [], []>} : vector<64x64xbf16>, vector<64x48xbf16>, vector<64x48xf32> -> vector<64x48xf32>
    %c2_20 = arith.constant 2 : index
    %c0_21 = arith.constant 0 : index
    %c0_22 = arith.constant 0 : index
    %32 = vector.load %arg6[%c2_20, %c0_21, %c0_22] : memref<9x64x1xf32, #tpu.memory_space<vmem>>, vector<1x64x1xf32>
    %33 = vector.shape_cast %32 : vector<1x64x1xf32> to vector<64x1xf32>
    %34 = vector.broadcast %33 : vector<64x1xf32> to vector<64x48xf32>
    %35 = arith.mulf %31, %34 : vector<64x48xf32>
    %36 = arith.addf %26, %35 : vector<64x48xf32>
    %c1_i32 = arith.constant 1 : i32
    %37 = tpu.dynamic_rotate %7 by %c1_i32 dim 0 : vector<64x64xf32>, i32 -> vector<64x64xf32>
    %38 = arith.truncf %37 : vector<64x64xf32> to vector<64x64xbf16>
    %c3 = arith.constant 3 : index
    %c0_23 = arith.constant 0 : index
    %c0_24 = arith.constant 0 : index
    %39 = vector.load %arg2[%c3, %c0_23, %c0_24] : memref<9x64x48xbf16, #tpu.memory_space<vmem>>, vector<1x64x48xbf16>
    %40 = vector.shape_cast %39 : vector<1x64x48xbf16> to vector<64x48xbf16>
    %cst_25 = arith.constant dense<0.000000e+00> : vector<64x48xf32>
    %41 = tpu.matmul %38, %40, %cst_25 {dimension_numbers = #tpu.dot_dimension_numbers<[1], [0], [0], [1], [0, 0, 1, 1], [], []>} : vector<64x64xbf16>, vector<64x48xbf16>, vector<64x48xf32> -> vector<64x48xf32>
    %c3_26 = arith.constant 3 : index
    %c0_27 = arith.constant 0 : index
    %c0_28 = arith.constant 0 : index
    %42 = vector.load %arg6[%c3_26, %c0_27, %c0_28] : memref<9x64x1xf32, #tpu.memory_space<vmem>>, vector<1x64x1xf32>
    %43 = vector.shape_cast %42 : vector<1x64x1xf32> to vector<64x1xf32>
    %44 = vector.broadcast %43 : vector<64x1xf32> to vector<64x48xf32>
    %45 = arith.mulf %41, %44 : vector<64x48xf32>
    %46 = arith.addf %36, %45 : vector<64x48xf32>
    %47 = arith.truncf %7 : vector<64x64xf32> to vector<64x64xbf16>
    %c4 = arith.constant 4 : index
    %c0_29 = arith.constant 0 : index
    %c0_30 = arith.constant 0 : index
    %48 = vector.load %arg2[%c4, %c0_29, %c0_30] : memref<9x64x48xbf16, #tpu.memory_space<vmem>>, vector<1x64x48xbf16>
    %49 = vector.shape_cast %48 : vector<1x64x48xbf16> to vector<64x48xbf16>
    %cst_31 = arith.constant dense<0.000000e+00> : vector<64x48xf32>
    %50 = tpu.matmul %47, %49, %cst_31 {dimension_numbers = #tpu.dot_dimension_numbers<[1], [0], [0], [1], [0, 0, 1, 1], [], []>} : vector<64x64xbf16>, vector<64x48xbf16>, vector<64x48xf32> -> vector<64x48xf32>
    %51 = arith.addf %46, %50 : vector<64x48xf32>
    %c63_i32 = arith.constant 63 : i32
    %52 = tpu.dynamic_rotate %7 by %c63_i32 dim 0 : vector<64x64xf32>, i32 -> vector<64x64xf32>
    %53 = arith.truncf %52 : vector<64x64xf32> to vector<64x64xbf16>
    %c5 = arith.constant 5 : index
    %c0_32 = arith.constant 0 : index
    %c0_33 = arith.constant 0 : index
    %54 = vector.load %arg2[%c5, %c0_32, %c0_33] : memref<9x64x48xbf16, #tpu.memory_space<vmem>>, vector<1x64x48xbf16>
    %55 = vector.shape_cast %54 : vector<1x64x48xbf16> to vector<64x48xbf16>
    %cst_34 = arith.constant dense<0.000000e+00> : vector<64x48xf32>
    %56 = tpu.matmul %53, %55, %cst_34 {dimension_numbers = #tpu.dot_dimension_numbers<[1], [0], [0], [1], [0, 0, 1, 1], [], []>} : vector<64x64xbf16>, vector<64x48xbf16>, vector<64x48xf32> -> vector<64x48xf32>
    %c5_35 = arith.constant 5 : index
    %c0_36 = arith.constant 0 : index
    %c0_37 = arith.constant 0 : index
    %57 = vector.load %arg6[%c5_35, %c0_36, %c0_37] : memref<9x64x1xf32, #tpu.memory_space<vmem>>, vector<1x64x1xf32>
    %58 = vector.shape_cast %57 : vector<1x64x1xf32> to vector<64x1xf32>
    %59 = vector.broadcast %58 : vector<64x1xf32> to vector<64x48xf32>
    %60 = arith.mulf %56, %59 : vector<64x48xf32>
    %61 = arith.addf %51, %60 : vector<64x48xf32>
    %c57_i32 = arith.constant 57 : i32
    %62 = tpu.dynamic_rotate %7 by %c57_i32 dim 0 : vector<64x64xf32>, i32 -> vector<64x64xf32>
    %63 = arith.truncf %62 : vector<64x64xf32> to vector<64x64xbf16>
    %c6 = arith.constant 6 : index
    %c0_38 = arith.constant 0 : index
    %c0_39 = arith.constant 0 : index
    %64 = vector.load %arg2[%c6, %c0_38, %c0_39] : memref<9x64x48xbf16, #tpu.memory_space<vmem>>, vector<1x64x48xbf16>
    %65 = vector.shape_cast %64 : vector<1x64x48xbf16> to vector<64x48xbf16>
    %cst_40 = arith.constant dense<0.000000e+00> : vector<64x48xf32>
    %66 = tpu.matmul %63, %65, %cst_40 {dimension_numbers = #tpu.dot_dimension_numbers<[1], [0], [0], [1], [0, 0, 1, 1], [], []>} : vector<64x64xbf16>, vector<64x48xbf16>, vector<64x48xf32> -> vector<64x48xf32>
    %c6_41 = arith.constant 6 : index
    %c0_42 = arith.constant 0 : index
    %c0_43 = arith.constant 0 : index
    %67 = vector.load %arg6[%c6_41, %c0_42, %c0_43] : memref<9x64x1xf32, #tpu.memory_space<vmem>>, vector<1x64x1xf32>
    %68 = vector.shape_cast %67 : vector<1x64x1xf32> to vector<64x1xf32>
    %69 = vector.broadcast %68 : vector<64x1xf32> to vector<64x48xf32>
    %70 = arith.mulf %66, %69 : vector<64x48xf32>
    %71 = arith.addf %61, %70 : vector<64x48xf32>
    %c56_i32 = arith.constant 56 : i32
    %72 = tpu.dynamic_rotate %7 by %c56_i32 dim 0 : vector<64x64xf32>, i32 -> vector<64x64xf32>
    %73 = arith.truncf %72 : vector<64x64xf32> to vector<64x64xbf16>
    %c7 = arith.constant 7 : index
    %c0_44 = arith.constant 0 : index
    %c0_45 = arith.constant 0 : index
    %74 = vector.load %arg2[%c7, %c0_44, %c0_45] : memref<9x64x48xbf16, #tpu.memory_space<vmem>>, vector<1x64x48xbf16>
    %75 = vector.shape_cast %74 : vector<1x64x48xbf16> to vector<64x48xbf16>
    %cst_46 = arith.constant dense<0.000000e+00> : vector<64x48xf32>
    %76 = tpu.matmul %73, %75, %cst_46 {dimension_numbers = #tpu.dot_dimension_numbers<[1], [0], [0], [1], [0, 0, 1, 1], [], []>} : vector<64x64xbf16>, vector<64x48xbf16>, vector<64x48xf32> -> vector<64x48xf32>
    %c7_47 = arith.constant 7 : index
    %c0_48 = arith.constant 0 : index
    %c0_49 = arith.constant 0 : index
    %77 = vector.load %arg6[%c7_47, %c0_48, %c0_49] : memref<9x64x1xf32, #tpu.memory_space<vmem>>, vector<1x64x1xf32>
    %78 = vector.shape_cast %77 : vector<1x64x1xf32> to vector<64x1xf32>
    %79 = vector.broadcast %78 : vector<64x1xf32> to vector<64x48xf32>
    %80 = arith.mulf %76, %79 : vector<64x48xf32>
    %81 = arith.addf %71, %80 : vector<64x48xf32>
    %c55_i32 = arith.constant 55 : i32
    %82 = tpu.dynamic_rotate %7 by %c55_i32 dim 0 : vector<64x64xf32>, i32 -> vector<64x64xf32>
    %83 = arith.truncf %82 : vector<64x64xf32> to vector<64x64xbf16>
    %c8 = arith.constant 8 : index
    %c0_50 = arith.constant 0 : index
    %c0_51 = arith.constant 0 : index
    %84 = vector.load %arg2[%c8, %c0_50, %c0_51] : memref<9x64x48xbf16, #tpu.memory_space<vmem>>, vector<1x64x48xbf16>
    %85 = vector.shape_cast %84 : vector<1x64x48xbf16> to vector<64x48xbf16>
    %cst_52 = arith.constant dense<0.000000e+00> : vector<64x48xf32>
    %86 = tpu.matmul %83, %85, %cst_52 {dimension_numbers = #tpu.dot_dimension_numbers<[1], [0], [0], [1], [0, 0, 1, 1], [], []>} : vector<64x64xbf16>, vector<64x48xbf16>, vector<64x48xf32> -> vector<64x48xf32>
    %c8_53 = arith.constant 8 : index
    %c0_54 = arith.constant 0 : index
    %c0_55 = arith.constant 0 : index
    %87 = vector.load %arg6[%c8_53, %c0_54, %c0_55] : memref<9x64x1xf32, #tpu.memory_space<vmem>>, vector<1x64x1xf32>
    %88 = vector.shape_cast %87 : vector<1x64x1xf32> to vector<64x1xf32>
    %89 = vector.broadcast %88 : vector<64x1xf32> to vector<64x48xf32>
    %90 = arith.mulf %86, %89 : vector<64x48xf32>
    %91 = arith.addf %81, %90 : vector<64x48xf32>
    %92 = vector.extract_strided_slice %91 {offsets = [0, 0], sizes = [64, 16], strides = [1, 1]} : vector<64x48xf32> to vector<64x16xf32>
    %93 = vector.broadcast %1 : vector<1x16xf32> to vector<64x16xf32>
    %94 = arith.addf %92, %93 : vector<64x16xf32>
    %cst_56 = arith.constant 0.000000e+00 : f32
    %95 = vector.broadcast %cst_56 : f32 to vector<64x16xf32>
    %96 = arith.maximumf %94, %95 : vector<64x16xf32>
    %97 = vector.extract_strided_slice %91 {offsets = [0, 16], sizes = [64, 32], strides = [1, 1]} : vector<64x48xf32> to vector<64x32xf32>
    %98 = tpu.iota {dimensions = array<i32: 0>} : vector<8x1x8xi32>
    %99 = tpu.iota {dimensions = array<i32: 2>} : vector<8x1x8xi32>
    %100 = arith.cmpi eq, %98, %99 : vector<8x1x8xi32>
    %c0_57 = arith.constant 0 : index
    %c0_58 = arith.constant 0 : index
    %101 = vector.load %arg3[%c0_57, %c0_58] : memref<16x32xbf16, #tpu.memory_space<vmem>>, vector<16x32xbf16>
    %102 = arith.truncf %96 : vector<64x16xf32> to vector<64x16xbf16>
    %cst_59 = arith.constant dense<0.000000e+00> : vector<64x32xf32>
    %103 = tpu.matmul %102, %101, %cst_59 {dimension_numbers = #tpu.dot_dimension_numbers<[1], [0], [0], [1], [0, 0, 1, 1], [], []>} : vector<64x16xbf16>, vector<16x32xbf16>, vector<64x32xf32> -> vector<64x32xf32>
    %104 = vector.broadcast %4 : vector<1x32xf32> to vector<64x32xf32>
    %105 = arith.addf %103, %104 : vector<64x32xf32>
    %106 = vector.extract_strided_slice %105 {offsets = [0, 0], sizes = [64, 8], strides = [1, 1]} : vector<64x32xf32> to vector<64x8xf32>
    %107 = vector.shape_cast %106 : vector<64x8xf32> to vector<8x8x8xf32>
    %108 = arith.truncf %107 : vector<8x8x8xf32> to vector<8x8x8xbf16>
    %109 = vector.extract_strided_slice %105 {offsets = [0, 8], sizes = [64, 8], strides = [1, 1]} : vector<64x32xf32> to vector<64x8xf32>
    %110 = vector.shape_cast %109 : vector<64x8xf32> to vector<8x8x8xf32>
    %111 = arith.truncf %110 : vector<8x8x8xf32> to vector<8x8x8xbf16>
    %112 = vector.extract_strided_slice %105 {offsets = [0, 16], sizes = [64, 16], strides = [1, 1]} : vector<64x32xf32> to vector<64x16xf32>
    %113 = vector.shape_cast %112 : vector<64x16xf32> to vector<8x8x16xf32>
    %114 = arith.truncf %113 : vector<8x8x16xf32> to vector<8x8x16xbf16>
    "tpu.trace_start"() <{level = 10 : i32, message = "hwc,jwc->hwj"}> : () -> ()
    %cst_60 = arith.constant dense<0.000000e+00> : vector<8x8x8xf32>
    %115 = tpu.matmul %111, %108, %cst_60 {dimension_numbers = #tpu.dot_dimension_numbers<[2], [2], [0], [0], [0, 1, 0, 0, 1, 0], [1], [1]>} : vector<8x8x8xbf16>, vector<8x8x8xbf16>, vector<8x8x8xf32> -> vector<8x8x8xf32>
    %116 = tpu.transpose %115, [2, 0, 1] : vector<8x8x8xf32> -> vector<8x8x8xf32>
    %cst_61 = arith.constant -1.000000e+30 : f32
    "tpu.trace_stop"() : () -> ()
    %117 = vector.shape_cast %100 : vector<8x1x8xi1> to vector<8x1x8xi1>
    %118 = vector.broadcast %117 : vector<8x1x8xi1> to vector<8x8x8xi1>
    %119 = vector.broadcast %cst_61 : f32 to vector<8x8x8xf32>
    %120 = arith.select %118, %119, %116 : vector<8x8x8xi1>, vector<8x8x8xf32>
    "tpu.trace_start"() <{level = 10 : i32, message = "hwc,hjc->hwj"}> : () -> ()
    %cst_62 = arith.constant dense<0.000000e+00> : vector<8x8x8xf32>
    %121 = tpu.matmul %108, %111, %cst_62 {dimension_numbers = #tpu.dot_dimension_numbers<[2], [2], [1], [1], [0, 0, 0, 1, 1, 1], [0], [0]>} : vector<8x8x8xbf16>, vector<8x8x8xbf16>, vector<8x8x8xf32> -> vector<8x8x8xf32>
    "tpu.trace_stop"() : () -> ()
    %cst_63 = arith.constant dense<0xFF800000> : vector<8x8xf32>
    %122 = vector.multi_reduction <maximumf>, %120, %cst_63 [2] : vector<8x8x8xf32> to vector<8x8xf32>
    %123 = vector.shape_cast %122 : vector<8x8xf32> to vector<8x8x1xf32>
    %cst_64 = arith.constant dense<0xFF800000> : vector<8x8xf32>
    %124 = vector.multi_reduction <maximumf>, %121, %cst_64 [2] : vector<8x8x8xf32> to vector<8x8xf32>
    %125 = vector.shape_cast %124 : vector<8x8xf32> to vector<8x8x1xf32>
    %126 = arith.maximumf %123, %125 : vector<8x8x1xf32>
    %127 = vector.broadcast %126 : vector<8x8x1xf32> to vector<8x8x8xf32>
    %128 = arith.subf %120, %127 : vector<8x8x8xf32>
    %129 = math.exp %128 : vector<8x8x8xf32>
    %130 = vector.broadcast %126 : vector<8x8x1xf32> to vector<8x8x8xf32>
    %131 = arith.subf %121, %130 : vector<8x8x8xf32>
    %132 = math.exp %131 : vector<8x8x8xf32>
    %cst_65 = arith.constant dense<0.000000e+00> : vector<8x8xf32>
    %133 = vector.multi_reduction <add>, %129, %cst_65 [2] : vector<8x8x8xf32> to vector<8x8xf32>
    %134 = vector.shape_cast %133 : vector<8x8xf32> to vector<8x8x1xf32>
    %cst_66 = arith.constant dense<0.000000e+00> : vector<8x8xf32>
    %135 = vector.multi_reduction <add>, %132, %cst_66 [2] : vector<8x8x8xf32> to vector<8x8xf32>
    %136 = vector.shape_cast %135 : vector<8x8xf32> to vector<8x8x1xf32>
    %137 = arith.addf %134, %136 : vector<8x8x1xf32>
    %138 = tpu.reciprocal %137 {approx = true} : vector<8x8x1xf32> -> vector<8x8x1xf32>
    %139 = vector.broadcast %138 : vector<8x8x1xf32> to vector<8x8x8xf32>
    %140 = arith.mulf %129, %139 : vector<8x8x8xf32>
    %141 = arith.truncf %140 : vector<8x8x8xf32> to vector<8x8x8xbf16>
    "tpu.trace_start"() <{level = 10 : i32, message = "hwj,jwc->hwc"}> : () -> ()
    %cst_67 = arith.constant dense<0.000000e+00> : vector<8x16x8xf32>
    %142 = tpu.matmul %114, %141, %cst_67 {dimension_numbers = #tpu.dot_dimension_numbers<[0], [2], [2], [0], [0, 1, 0, 2, 1, 0], [1], [1]>} : vector<8x8x16xbf16>, vector<8x8x8xbf16>, vector<8x16x8xf32> -> vector<8x16x8xf32>
    %143 = tpu.transpose %142, [2, 0, 1] : vector<8x16x8xf32> -> vector<8x8x16xf32>
    "tpu.trace_stop"() : () -> ()
    %144 = vector.broadcast %138 : vector<8x8x1xf32> to vector<8x8x8xf32>
    %145 = arith.mulf %132, %144 : vector<8x8x8xf32>
    %146 = arith.truncf %145 : vector<8x8x8xf32> to vector<8x8x8xbf16>
    "tpu.trace_start"() <{level = 10 : i32, message = "hwj,hjc->hwc"}> : () -> ()
    %cst_68 = arith.constant dense<0.000000e+00> : vector<8x8x16xf32>
    %147 = tpu.matmul %146, %114, %cst_68 {dimension_numbers = #tpu.dot_dimension_numbers<[2], [1], [1], [2], [0, 0, 0, 1, 1, 2], [0], [0]>} : vector<8x8x8xbf16>, vector<8x8x16xbf16>, vector<8x8x16xf32> -> vector<8x8x16xf32>
    "tpu.trace_stop"() : () -> ()
    %148 = arith.addf %143, %147 : vector<8x8x16xf32>
    %149 = vector.shape_cast %148 : vector<8x8x16xf32> to vector<64x16xf32>
    %150 = vector.broadcast %5 : f32 to vector<64x16xf32>
    %151 = arith.mulf %150, %149 : vector<64x16xf32>
    %152 = arith.addf %151, %96 : vector<64x16xf32>
    %c9_i32_69 = arith.constant 9 : i32
    %153 = tpu.dynamic_rotate %152 by %c9_i32_69 dim 0 : vector<64x16xf32>, i32 -> vector<64x16xf32>
    %154 = arith.truncf %153 : vector<64x16xf32> to vector<64x16xbf16>
    %c0_70 = arith.constant 0 : index
    %c0_71 = arith.constant 0 : index
    %c0_72 = arith.constant 0 : index
    %155 = vector.load %arg4[%c0_70, %c0_71, %c0_72] : memref<9x16x16xbf16, #tpu.memory_space<vmem>>, vector<1x16x16xbf16>
    %156 = vector.shape_cast %155 : vector<1x16x16xbf16> to vector<16x16xbf16>
    %cst_73 = arith.constant dense<0.000000e+00> : vector<64x16xf32>
    %157 = tpu.matmul %154, %156, %cst_73 {dimension_numbers = #tpu.dot_dimension_numbers<[1], [0], [0], [1], [0, 0, 1, 1], [], []>} : vector<64x16xbf16>, vector<16x16xbf16>, vector<64x16xf32> -> vector<64x16xf32>
    %c0_74 = arith.constant 0 : index
    %c0_75 = arith.constant 0 : index
    %c0_76 = arith.constant 0 : index
    %158 = vector.load %arg6[%c0_74, %c0_75, %c0_76] : memref<9x64x1xf32, #tpu.memory_space<vmem>>, vector<1x64x1xf32>
    %159 = vector.shape_cast %158 : vector<1x64x1xf32> to vector<64x1xf32>
    %160 = vector.broadcast %159 : vector<64x1xf32> to vector<64x16xf32>
    %161 = arith.mulf %157, %160 : vector<64x16xf32>
    %c8_i32_77 = arith.constant 8 : i32
    %162 = tpu.dynamic_rotate %152 by %c8_i32_77 dim 0 : vector<64x16xf32>, i32 -> vector<64x16xf32>
    %163 = arith.truncf %162 : vector<64x16xf32> to vector<64x16xbf16>
    %c1_78 = arith.constant 1 : index
    %c0_79 = arith.constant 0 : index
    %c0_80 = arith.constant 0 : index
    %164 = vector.load %arg4[%c1_78, %c0_79, %c0_80] : memref<9x16x16xbf16, #tpu.memory_space<vmem>>, vector<1x16x16xbf16>
    %165 = vector.shape_cast %164 : vector<1x16x16xbf16> to vector<16x16xbf16>
    %cst_81 = arith.constant dense<0.000000e+00> : vector<64x16xf32>
    %166 = tpu.matmul %163, %165, %cst_81 {dimension_numbers = #tpu.dot_dimension_numbers<[1], [0], [0], [1], [0, 0, 1, 1], [], []>} : vector<64x16xbf16>, vector<16x16xbf16>, vector<64x16xf32> -> vector<64x16xf32>
    %c1_82 = arith.constant 1 : index
    %c0_83 = arith.constant 0 : index
    %c0_84 = arith.constant 0 : index
    %167 = vector.load %arg6[%c1_82, %c0_83, %c0_84] : memref<9x64x1xf32, #tpu.memory_space<vmem>>, vector<1x64x1xf32>
    %168 = vector.shape_cast %167 : vector<1x64x1xf32> to vector<64x1xf32>
    %169 = vector.broadcast %168 : vector<64x1xf32> to vector<64x16xf32>
    %170 = arith.mulf %166, %169 : vector<64x16xf32>
    %171 = arith.addf %161, %170 : vector<64x16xf32>
    %c7_i32_85 = arith.constant 7 : i32
    %172 = tpu.dynamic_rotate %152 by %c7_i32_85 dim 0 : vector<64x16xf32>, i32 -> vector<64x16xf32>
    %173 = arith.truncf %172 : vector<64x16xf32> to vector<64x16xbf16>
    %c2_86 = arith.constant 2 : index
    %c0_87 = arith.constant 0 : index
    %c0_88 = arith.constant 0 : index
    %174 = vector.load %arg4[%c2_86, %c0_87, %c0_88] : memref<9x16x16xbf16, #tpu.memory_space<vmem>>, vector<1x16x16xbf16>
    %175 = vector.shape_cast %174 : vector<1x16x16xbf16> to vector<16x16xbf16>
    %cst_89 = arith.constant dense<0.000000e+00> : vector<64x16xf32>
    %176 = tpu.matmul %173, %175, %cst_89 {dimension_numbers = #tpu.dot_dimension_numbers<[1], [0], [0], [1], [0, 0, 1, 1], [], []>} : vector<64x16xbf16>, vector<16x16xbf16>, vector<64x16xf32> -> vector<64x16xf32>
    %c2_90 = arith.constant 2 : index
    %c0_91 = arith.constant 0 : index
    %c0_92 = arith.constant 0 : index
    %177 = vector.load %arg6[%c2_90, %c0_91, %c0_92] : memref<9x64x1xf32, #tpu.memory_space<vmem>>, vector<1x64x1xf32>
    %178 = vector.shape_cast %177 : vector<1x64x1xf32> to vector<64x1xf32>
    %179 = vector.broadcast %178 : vector<64x1xf32> to vector<64x16xf32>
    %180 = arith.mulf %176, %179 : vector<64x16xf32>
    %181 = arith.addf %171, %180 : vector<64x16xf32>
    %c1_i32_93 = arith.constant 1 : i32
    %182 = tpu.dynamic_rotate %152 by %c1_i32_93 dim 0 : vector<64x16xf32>, i32 -> vector<64x16xf32>
    %183 = arith.truncf %182 : vector<64x16xf32> to vector<64x16xbf16>
    %c3_94 = arith.constant 3 : index
    %c0_95 = arith.constant 0 : index
    %c0_96 = arith.constant 0 : index
    %184 = vector.load %arg4[%c3_94, %c0_95, %c0_96] : memref<9x16x16xbf16, #tpu.memory_space<vmem>>, vector<1x16x16xbf16>
    %185 = vector.shape_cast %184 : vector<1x16x16xbf16> to vector<16x16xbf16>
    %cst_97 = arith.constant dense<0.000000e+00> : vector<64x16xf32>
    %186 = tpu.matmul %183, %185, %cst_97 {dimension_numbers = #tpu.dot_dimension_numbers<[1], [0], [0], [1], [0, 0, 1, 1], [], []>} : vector<64x16xbf16>, vector<16x16xbf16>, vector<64x16xf32> -> vector<64x16xf32>
    %c3_98 = arith.constant 3 : index
    %c0_99 = arith.constant 0 : index
    %c0_100 = arith.constant 0 : index
    %187 = vector.load %arg6[%c3_98, %c0_99, %c0_100] : memref<9x64x1xf32, #tpu.memory_space<vmem>>, vector<1x64x1xf32>
    %188 = vector.shape_cast %187 : vector<1x64x1xf32> to vector<64x1xf32>
    %189 = vector.broadcast %188 : vector<64x1xf32> to vector<64x16xf32>
    %190 = arith.mulf %186, %189 : vector<64x16xf32>
    %191 = arith.addf %181, %190 : vector<64x16xf32>
    %192 = arith.truncf %152 : vector<64x16xf32> to vector<64x16xbf16>
    %c4_101 = arith.constant 4 : index
    %c0_102 = arith.constant 0 : index
    %c0_103 = arith.constant 0 : index
    %193 = vector.load %arg4[%c4_101, %c0_102, %c0_103] : memref<9x16x16xbf16, #tpu.memory_space<vmem>>, vector<1x16x16xbf16>
    %194 = vector.shape_cast %193 : vector<1x16x16xbf16> to vector<16x16xbf16>
    %cst_104 = arith.constant dense<0.000000e+00> : vector<64x16xf32>
    %195 = tpu.matmul %192, %194, %cst_104 {dimension_numbers = #tpu.dot_dimension_numbers<[1], [0], [0], [1], [0, 0, 1, 1], [], []>} : vector<64x16xbf16>, vector<16x16xbf16>, vector<64x16xf32> -> vector<64x16xf32>
    %196 = arith.addf %191, %195 : vector<64x16xf32>
    %c63_i32_105 = arith.constant 63 : i32
    %197 = tpu.dynamic_rotate %152 by %c63_i32_105 dim 0 : vector<64x16xf32>, i32 -> vector<64x16xf32>
    %198 = arith.truncf %197 : vector<64x16xf32> to vector<64x16xbf16>
    %c5_106 = arith.constant 5 : index
    %c0_107 = arith.constant 0 : index
    %c0_108 = arith.constant 0 : index
    %199 = vector.load %arg4[%c5_106, %c0_107, %c0_108] : memref<9x16x16xbf16, #tpu.memory_space<vmem>>, vector<1x16x16xbf16>
    %200 = vector.shape_cast %199 : vector<1x16x16xbf16> to vector<16x16xbf16>
    %cst_109 = arith.constant dense<0.000000e+00> : vector<64x16xf32>
    %201 = tpu.matmul %198, %200, %cst_109 {dimension_numbers = #tpu.dot_dimension_numbers<[1], [0], [0], [1], [0, 0, 1, 1], [], []>} : vector<64x16xbf16>, vector<16x16xbf16>, vector<64x16xf32> -> vector<64x16xf32>
    %c5_110 = arith.constant 5 : index
    %c0_111 = arith.constant 0 : index
    %c0_112 = arith.constant 0 : index
    %202 = vector.load %arg6[%c5_110, %c0_111, %c0_112] : memref<9x64x1xf32, #tpu.memory_space<vmem>>, vector<1x64x1xf32>
    %203 = vector.shape_cast %202 : vector<1x64x1xf32> to vector<64x1xf32>
    %204 = vector.broadcast %203 : vector<64x1xf32> to vector<64x16xf32>
    %205 = arith.mulf %201, %204 : vector<64x16xf32>
    %206 = arith.addf %196, %205 : vector<64x16xf32>
    %c57_i32_113 = arith.constant 57 : i32
    %207 = tpu.dynamic_rotate %152 by %c57_i32_113 dim 0 : vector<64x16xf32>, i32 -> vector<64x16xf32>
    %208 = arith.truncf %207 : vector<64x16xf32> to vector<64x16xbf16>
    %c6_114 = arith.constant 6 : index
    %c0_115 = arith.constant 0 : index
    %c0_116 = arith.constant 0 : index
    %209 = vector.load %arg4[%c6_114, %c0_115, %c0_116] : memref<9x16x16xbf16, #tpu.memory_space<vmem>>, vector<1x16x16xbf16>
    %210 = vector.shape_cast %209 : vector<1x16x16xbf16> to vector<16x16xbf16>
    %cst_117 = arith.constant dense<0.000000e+00> : vector<64x16xf32>
    %211 = tpu.matmul %208, %210, %cst_117 {dimension_numbers = #tpu.dot_dimension_numbers<[1], [0], [0], [1], [0, 0, 1, 1], [], []>} : vector<64x16xbf16>, vector<16x16xbf16>, vector<64x16xf32> -> vector<64x16xf32>
    %c6_118 = arith.constant 6 : index
    %c0_119 = arith.constant 0 : index
    %c0_120 = arith.constant 0 : index
    %212 = vector.load %arg6[%c6_118, %c0_119, %c0_120] : memref<9x64x1xf32, #tpu.memory_space<vmem>>, vector<1x64x1xf32>
    %213 = vector.shape_cast %212 : vector<1x64x1xf32> to vector<64x1xf32>
    %214 = vector.broadcast %213 : vector<64x1xf32> to vector<64x16xf32>
    %215 = arith.mulf %211, %214 : vector<64x16xf32>
    %216 = arith.addf %206, %215 : vector<64x16xf32>
    %c56_i32_121 = arith.constant 56 : i32
    %217 = tpu.dynamic_rotate %152 by %c56_i32_121 dim 0 : vector<64x16xf32>, i32 -> vector<64x16xf32>
    %218 = arith.truncf %217 : vector<64x16xf32> to vector<64x16xbf16>
    %c7_122 = arith.constant 7 : index
    %c0_123 = arith.constant 0 : index
    %c0_124 = arith.constant 0 : index
    %219 = vector.load %arg4[%c7_122, %c0_123, %c0_124] : memref<9x16x16xbf16, #tpu.memory_space<vmem>>, vector<1x16x16xbf16>
    %220 = vector.shape_cast %219 : vector<1x16x16xbf16> to vector<16x16xbf16>
    %cst_125 = arith.constant dense<0.000000e+00> : vector<64x16xf32>
    %221 = tpu.matmul %218, %220, %cst_125 {dimension_numbers = #tpu.dot_dimension_numbers<[1], [0], [0], [1], [0, 0, 1, 1], [], []>} : vector<64x16xbf16>, vector<16x16xbf16>, vector<64x16xf32> -> vector<64x16xf32>
    %c7_126 = arith.constant 7 : index
    %c0_127 = arith.constant 0 : index
    %c0_128 = arith.constant 0 : index
    %222 = vector.load %arg6[%c7_126, %c0_127, %c0_128] : memref<9x64x1xf32, #tpu.memory_space<vmem>>, vector<1x64x1xf32>
    %223 = vector.shape_cast %222 : vector<1x64x1xf32> to vector<64x1xf32>
    %224 = vector.broadcast %223 : vector<64x1xf32> to vector<64x16xf32>
    %225 = arith.mulf %221, %224 : vector<64x16xf32>
    %226 = arith.addf %216, %225 : vector<64x16xf32>
    %c55_i32_129 = arith.constant 55 : i32
    %227 = tpu.dynamic_rotate %152 by %c55_i32_129 dim 0 : vector<64x16xf32>, i32 -> vector<64x16xf32>
    %228 = arith.truncf %227 : vector<64x16xf32> to vector<64x16xbf16>
    %c8_130 = arith.constant 8 : index
    %c0_131 = arith.constant 0 : index
    %c0_132 = arith.constant 0 : index
    %229 = vector.load %arg4[%c8_130, %c0_131, %c0_132] : memref<9x16x16xbf16, #tpu.memory_space<vmem>>, vector<1x16x16xbf16>
    %230 = vector.shape_cast %229 : vector<1x16x16xbf16> to vector<16x16xbf16>
    %cst_133 = arith.constant dense<0.000000e+00> : vector<64x16xf32>
    %231 = tpu.matmul %228, %230, %cst_133 {dimension_numbers = #tpu.dot_dimension_numbers<[1], [0], [0], [1], [0, 0, 1, 1], [], []>} : vector<64x16xbf16>, vector<16x16xbf16>, vector<64x16xf32> -> vector<64x16xf32>
    %c8_134 = arith.constant 8 : index
    %c0_135 = arith.constant 0 : index
    %c0_136 = arith.constant 0 : index
    %232 = vector.load %arg6[%c8_134, %c0_135, %c0_136] : memref<9x64x1xf32, #tpu.memory_space<vmem>>, vector<1x64x1xf32>
    %233 = vector.shape_cast %232 : vector<1x64x1xf32> to vector<64x1xf32>
    %234 = vector.broadcast %233 : vector<64x1xf32> to vector<64x16xf32>
    %235 = arith.mulf %231, %234 : vector<64x16xf32>
    %236 = arith.addf %226, %235 : vector<64x16xf32>
    %237 = vector.broadcast %2 : vector<1x16xf32> to vector<64x16xf32>
    %238 = arith.addf %236, %237 : vector<64x16xf32>
    %cst_137 = arith.constant 0.000000e+00 : f32
    %239 = vector.broadcast %cst_137 : f32 to vector<64x16xf32>
    %240 = arith.maximumf %238, %239 : vector<64x16xf32>
    %c9_i32_138 = arith.constant 9 : i32
    %241 = tpu.dynamic_rotate %240 by %c9_i32_138 dim 0 : vector<64x16xf32>, i32 -> vector<64x16xf32>
    %242 = arith.truncf %241 : vector<64x16xf32> to vector<64x16xbf16>
    %c0_139 = arith.constant 0 : index
    %c0_140 = arith.constant 0 : index
    %c0_141 = arith.constant 0 : index
    %243 = vector.load %arg5[%c0_139, %c0_140, %c0_141] : memref<9x16x32xbf16, #tpu.memory_space<vmem>>, vector<1x16x32xbf16>
    %244 = vector.shape_cast %243 : vector<1x16x32xbf16> to vector<16x32xbf16>
    %cst_142 = arith.constant dense<0.000000e+00> : vector<64x32xf32>
    %245 = tpu.matmul %242, %244, %cst_142 {dimension_numbers = #tpu.dot_dimension_numbers<[1], [0], [0], [1], [0, 0, 1, 1], [], []>} : vector<64x16xbf16>, vector<16x32xbf16>, vector<64x32xf32> -> vector<64x32xf32>
    %c0_143 = arith.constant 0 : index
    %c0_144 = arith.constant 0 : index
    %c0_145 = arith.constant 0 : index
    %246 = vector.load %arg6[%c0_143, %c0_144, %c0_145] : memref<9x64x1xf32, #tpu.memory_space<vmem>>, vector<1x64x1xf32>
    %247 = vector.shape_cast %246 : vector<1x64x1xf32> to vector<64x1xf32>
    %248 = vector.broadcast %247 : vector<64x1xf32> to vector<64x32xf32>
    %249 = arith.mulf %245, %248 : vector<64x32xf32>
    %c8_i32_146 = arith.constant 8 : i32
    %250 = tpu.dynamic_rotate %240 by %c8_i32_146 dim 0 : vector<64x16xf32>, i32 -> vector<64x16xf32>
    %251 = arith.truncf %250 : vector<64x16xf32> to vector<64x16xbf16>
    %c1_147 = arith.constant 1 : index
    %c0_148 = arith.constant 0 : index
    %c0_149 = arith.constant 0 : index
    %252 = vector.load %arg5[%c1_147, %c0_148, %c0_149] : memref<9x16x32xbf16, #tpu.memory_space<vmem>>, vector<1x16x32xbf16>
    %253 = vector.shape_cast %252 : vector<1x16x32xbf16> to vector<16x32xbf16>
    %cst_150 = arith.constant dense<0.000000e+00> : vector<64x32xf32>
    %254 = tpu.matmul %251, %253, %cst_150 {dimension_numbers = #tpu.dot_dimension_numbers<[1], [0], [0], [1], [0, 0, 1, 1], [], []>} : vector<64x16xbf16>, vector<16x32xbf16>, vector<64x32xf32> -> vector<64x32xf32>
    %c1_151 = arith.constant 1 : index
    %c0_152 = arith.constant 0 : index
    %c0_153 = arith.constant 0 : index
    %255 = vector.load %arg6[%c1_151, %c0_152, %c0_153] : memref<9x64x1xf32, #tpu.memory_space<vmem>>, vector<1x64x1xf32>
    %256 = vector.shape_cast %255 : vector<1x64x1xf32> to vector<64x1xf32>
    %257 = vector.broadcast %256 : vector<64x1xf32> to vector<64x32xf32>
    %258 = arith.mulf %254, %257 : vector<64x32xf32>
    %259 = arith.addf %249, %258 : vector<64x32xf32>
    %c7_i32_154 = arith.constant 7 : i32
    %260 = tpu.dynamic_rotate %240 by %c7_i32_154 dim 0 : vector<64x16xf32>, i32 -> vector<64x16xf32>
    %261 = arith.truncf %260 : vector<64x16xf32> to vector<64x16xbf16>
    %c2_155 = arith.constant 2 : index
    %c0_156 = arith.constant 0 : index
    %c0_157 = arith.constant 0 : index
    %262 = vector.load %arg5[%c2_155, %c0_156, %c0_157] : memref<9x16x32xbf16, #tpu.memory_space<vmem>>, vector<1x16x32xbf16>
    %263 = vector.shape_cast %262 : vector<1x16x32xbf16> to vector<16x32xbf16>
    %cst_158 = arith.constant dense<0.000000e+00> : vector<64x32xf32>
    %264 = tpu.matmul %261, %263, %cst_158 {dimension_numbers = #tpu.dot_dimension_numbers<[1], [0], [0], [1], [0, 0, 1, 1], [], []>} : vector<64x16xbf16>, vector<16x32xbf16>, vector<64x32xf32> -> vector<64x32xf32>
    %c2_159 = arith.constant 2 : index
    %c0_160 = arith.constant 0 : index
    %c0_161 = arith.constant 0 : index
    %265 = vector.load %arg6[%c2_159, %c0_160, %c0_161] : memref<9x64x1xf32, #tpu.memory_space<vmem>>, vector<1x64x1xf32>
    %266 = vector.shape_cast %265 : vector<1x64x1xf32> to vector<64x1xf32>
    %267 = vector.broadcast %266 : vector<64x1xf32> to vector<64x32xf32>
    %268 = arith.mulf %264, %267 : vector<64x32xf32>
    %269 = arith.addf %259, %268 : vector<64x32xf32>
    %c1_i32_162 = arith.constant 1 : i32
    %270 = tpu.dynamic_rotate %240 by %c1_i32_162 dim 0 : vector<64x16xf32>, i32 -> vector<64x16xf32>
    %271 = arith.truncf %270 : vector<64x16xf32> to vector<64x16xbf16>
    %c3_163 = arith.constant 3 : index
    %c0_164 = arith.constant 0 : index
    %c0_165 = arith.constant 0 : index
    %272 = vector.load %arg5[%c3_163, %c0_164, %c0_165] : memref<9x16x32xbf16, #tpu.memory_space<vmem>>, vector<1x16x32xbf16>
    %273 = vector.shape_cast %272 : vector<1x16x32xbf16> to vector<16x32xbf16>
    %cst_166 = arith.constant dense<0.000000e+00> : vector<64x32xf32>
    %274 = tpu.matmul %271, %273, %cst_166 {dimension_numbers = #tpu.dot_dimension_numbers<[1], [0], [0], [1], [0, 0, 1, 1], [], []>} : vector<64x16xbf16>, vector<16x32xbf16>, vector<64x32xf32> -> vector<64x32xf32>
    %c3_167 = arith.constant 3 : index
    %c0_168 = arith.constant 0 : index
    %c0_169 = arith.constant 0 : index
    %275 = vector.load %arg6[%c3_167, %c0_168, %c0_169] : memref<9x64x1xf32, #tpu.memory_space<vmem>>, vector<1x64x1xf32>
    %276 = vector.shape_cast %275 : vector<1x64x1xf32> to vector<64x1xf32>
    %277 = vector.broadcast %276 : vector<64x1xf32> to vector<64x32xf32>
    %278 = arith.mulf %274, %277 : vector<64x32xf32>
    %279 = arith.addf %269, %278 : vector<64x32xf32>
    %280 = arith.truncf %240 : vector<64x16xf32> to vector<64x16xbf16>
    %c4_170 = arith.constant 4 : index
    %c0_171 = arith.constant 0 : index
    %c0_172 = arith.constant 0 : index
    %281 = vector.load %arg5[%c4_170, %c0_171, %c0_172] : memref<9x16x32xbf16, #tpu.memory_space<vmem>>, vector<1x16x32xbf16>
    %282 = vector.shape_cast %281 : vector<1x16x32xbf16> to vector<16x32xbf16>
    %cst_173 = arith.constant dense<0.000000e+00> : vector<64x32xf32>
    %283 = tpu.matmul %280, %282, %cst_173 {dimension_numbers = #tpu.dot_dimension_numbers<[1], [0], [0], [1], [0, 0, 1, 1], [], []>} : vector<64x16xbf16>, vector<16x32xbf16>, vector<64x32xf32> -> vector<64x32xf32>
    %284 = arith.addf %279, %283 : vector<64x32xf32>
    %c63_i32_174 = arith.constant 63 : i32
    %285 = tpu.dynamic_rotate %240 by %c63_i32_174 dim 0 : vector<64x16xf32>, i32 -> vector<64x16xf32>
    %286 = arith.truncf %285 : vector<64x16xf32> to vector<64x16xbf16>
    %c5_175 = arith.constant 5 : index
    %c0_176 = arith.constant 0 : index
    %c0_177 = arith.constant 0 : index
    %287 = vector.load %arg5[%c5_175, %c0_176, %c0_177] : memref<9x16x32xbf16, #tpu.memory_space<vmem>>, vector<1x16x32xbf16>
    %288 = vector.shape_cast %287 : vector<1x16x32xbf16> to vector<16x32xbf16>
    %cst_178 = arith.constant dense<0.000000e+00> : vector<64x32xf32>
    %289 = tpu.matmul %286, %288, %cst_178 {dimension_numbers = #tpu.dot_dimension_numbers<[1], [0], [0], [1], [0, 0, 1, 1], [], []>} : vector<64x16xbf16>, vector<16x32xbf16>, vector<64x32xf32> -> vector<64x32xf32>
    %c5_179 = arith.constant 5 : index
    %c0_180 = arith.constant 0 : index
    %c0_181 = arith.constant 0 : index
    %290 = vector.load %arg6[%c5_179, %c0_180, %c0_181] : memref<9x64x1xf32, #tpu.memory_space<vmem>>, vector<1x64x1xf32>
    %291 = vector.shape_cast %290 : vector<1x64x1xf32> to vector<64x1xf32>
    %292 = vector.broadcast %291 : vector<64x1xf32> to vector<64x32xf32>
    %293 = arith.mulf %289, %292 : vector<64x32xf32>
    %294 = arith.addf %284, %293 : vector<64x32xf32>
    %c57_i32_182 = arith.constant 57 : i32
    %295 = tpu.dynamic_rotate %240 by %c57_i32_182 dim 0 : vector<64x16xf32>, i32 -> vector<64x16xf32>
    %296 = arith.truncf %295 : vector<64x16xf32> to vector<64x16xbf16>
    %c6_183 = arith.constant 6 : index
    %c0_184 = arith.constant 0 : index
    %c0_185 = arith.constant 0 : index
    %297 = vector.load %arg5[%c6_183, %c0_184, %c0_185] : memref<9x16x32xbf16, #tpu.memory_space<vmem>>, vector<1x16x32xbf16>
    %298 = vector.shape_cast %297 : vector<1x16x32xbf16> to vector<16x32xbf16>
    %cst_186 = arith.constant dense<0.000000e+00> : vector<64x32xf32>
    %299 = tpu.matmul %296, %298, %cst_186 {dimension_numbers = #tpu.dot_dimension_numbers<[1], [0], [0], [1], [0, 0, 1, 1], [], []>} : vector<64x16xbf16>, vector<16x32xbf16>, vector<64x32xf32> -> vector<64x32xf32>
    %c6_187 = arith.constant 6 : index
    %c0_188 = arith.constant 0 : index
    %c0_189 = arith.constant 0 : index
    %300 = vector.load %arg6[%c6_187, %c0_188, %c0_189] : memref<9x64x1xf32, #tpu.memory_space<vmem>>, vector<1x64x1xf32>
    %301 = vector.shape_cast %300 : vector<1x64x1xf32> to vector<64x1xf32>
    %302 = vector.broadcast %301 : vector<64x1xf32> to vector<64x32xf32>
    %303 = arith.mulf %299, %302 : vector<64x32xf32>
    %304 = arith.addf %294, %303 : vector<64x32xf32>
    %c56_i32_190 = arith.constant 56 : i32
    %305 = tpu.dynamic_rotate %240 by %c56_i32_190 dim 0 : vector<64x16xf32>, i32 -> vector<64x16xf32>
    %306 = arith.truncf %305 : vector<64x16xf32> to vector<64x16xbf16>
    %c7_191 = arith.constant 7 : index
    %c0_192 = arith.constant 0 : index
    %c0_193 = arith.constant 0 : index
    %307 = vector.load %arg5[%c7_191, %c0_192, %c0_193] : memref<9x16x32xbf16, #tpu.memory_space<vmem>>, vector<1x16x32xbf16>
    %308 = vector.shape_cast %307 : vector<1x16x32xbf16> to vector<16x32xbf16>
    %cst_194 = arith.constant dense<0.000000e+00> : vector<64x32xf32>
    %309 = tpu.matmul %306, %308, %cst_194 {dimension_numbers = #tpu.dot_dimension_numbers<[1], [0], [0], [1], [0, 0, 1, 1], [], []>} : vector<64x16xbf16>, vector<16x32xbf16>, vector<64x32xf32> -> vector<64x32xf32>
    %c7_195 = arith.constant 7 : index
    %c0_196 = arith.constant 0 : index
    %c0_197 = arith.constant 0 : index
    %310 = vector.load %arg6[%c7_195, %c0_196, %c0_197] : memref<9x64x1xf32, #tpu.memory_space<vmem>>, vector<1x64x1xf32>
    %311 = vector.shape_cast %310 : vector<1x64x1xf32> to vector<64x1xf32>
    %312 = vector.broadcast %311 : vector<64x1xf32> to vector<64x32xf32>
    %313 = arith.mulf %309, %312 : vector<64x32xf32>
    %314 = arith.addf %304, %313 : vector<64x32xf32>
    %c55_i32_198 = arith.constant 55 : i32
    %315 = tpu.dynamic_rotate %240 by %c55_i32_198 dim 0 : vector<64x16xf32>, i32 -> vector<64x16xf32>
    %316 = arith.truncf %315 : vector<64x16xf32> to vector<64x16xbf16>
    %c8_199 = arith.constant 8 : index
    %c0_200 = arith.constant 0 : index
    %c0_201 = arith.constant 0 : index
    %317 = vector.load %arg5[%c8_199, %c0_200, %c0_201] : memref<9x16x32xbf16, #tpu.memory_space<vmem>>, vector<1x16x32xbf16>
    %318 = vector.shape_cast %317 : vector<1x16x32xbf16> to vector<16x32xbf16>
    %cst_202 = arith.constant dense<0.000000e+00> : vector<64x32xf32>
    %319 = tpu.matmul %316, %318, %cst_202 {dimension_numbers = #tpu.dot_dimension_numbers<[1], [0], [0], [1], [0, 0, 1, 1], [], []>} : vector<64x16xbf16>, vector<16x32xbf16>, vector<64x32xf32> -> vector<64x32xf32>
    %c8_203 = arith.constant 8 : index
    %c0_204 = arith.constant 0 : index
    %c0_205 = arith.constant 0 : index
    %320 = vector.load %arg6[%c8_203, %c0_204, %c0_205] : memref<9x64x1xf32, #tpu.memory_space<vmem>>, vector<1x64x1xf32>
    %321 = vector.shape_cast %320 : vector<1x64x1xf32> to vector<64x1xf32>
    %322 = vector.broadcast %321 : vector<64x1xf32> to vector<64x32xf32>
    %323 = arith.mulf %319, %322 : vector<64x32xf32>
    %324 = arith.addf %314, %323 : vector<64x32xf32>
    %325 = arith.addf %97, %324 : vector<64x32xf32>
    %326 = vector.broadcast %3 : vector<1x32xf32> to vector<64x32xf32>
    %327 = arith.addf %325, %326 : vector<64x32xf32>
    %c0_206 = arith.constant 0 : index
    %c0_207 = arith.constant 0 : index
    %c0_208 = arith.constant 0 : index
    %328 = vector.load %arg9[%c0_206, %c0_207, %c0_208] : memref<1x64x32xf32, #tpu.memory_space<vmem>>, vector<1x64x32xf32>
    %329 = vector.shape_cast %328 : vector<1x64x32xf32> to vector<64x32xf32>
    %330 = vector.shape_cast %327 : vector<64x32xf32> to vector<1x64x32xf32>
    tpu.vector_store %arg9[%c0_206, %c0_207, %c0_208], %330 {strides = array<i32>} : memref<1x64x32xf32, #tpu.memory_space<vmem>>, vector<1x64x32xf32>,
    return
  }
  func.func @transform_0(%arg0: i32) -> (i32, i32, i32) {
    %c0_i32 = arith.constant 0 : i32
    %c0_i32_0 = arith.constant 0 : i32
    %c0_i32_1 = arith.constant 0 : i32
    return %arg0, %c0_i32, %c0_i32_0 : i32, i32, i32
  }
  func.func @transform_1(%arg0: i32) -> (i32, i32, i32) {
    %c0_i32 = arith.constant 0 : i32
    %c0_i32_0 = arith.constant 0 : i32
    %c0_i32_1 = arith.constant 0 : i32
    %c0_i32_2 = arith.constant 0 : i32
    return %c0_i32, %c0_i32_0, %c0_i32_1 : i32, i32, i32
  }
  func.func @transform_2(%arg0: i32) -> (i32, i32) {
    %c0_i32 = arith.constant 0 : i32
    %c0_i32_0 = arith.constant 0 : i32
    %c0_i32_1 = arith.constant 0 : i32
    return %c0_i32, %c0_i32_0 : i32, i32
  }
  func.func @transform_3(%arg0: i32) -> (i32, i32, i32) {
    %c0_i32 = arith.constant 0 : i32
    %c0_i32_0 = arith.constant 0 : i32
    %c0_i32_1 = arith.constant 0 : i32
    %c0_i32_2 = arith.constant 0 : i32
    return %c0_i32, %c0_i32_0, %c0_i32_1 : i32, i32, i32
  }
  func.func @transform_4(%arg0: i32) -> (i32, i32, i32) {
    %c0_i32 = arith.constant 0 : i32
    %c0_i32_0 = arith.constant 0 : i32
    %c0_i32_1 = arith.constant 0 : i32
    %c0_i32_2 = arith.constant 0 : i32
    return %c0_i32, %c0_i32_0, %c0_i32_1 : i32, i32, i32
  }
  func.func @transform_5(%arg0: i32) -> (i32, i32, i32) {
    %c0_i32 = arith.constant 0 : i32
    %c0_i32_0 = arith.constant 0 : i32
    %c0_i32_1 = arith.constant 0 : i32
    %c0_i32_2 = arith.constant 0 : i32
    return %c0_i32, %c0_i32_0, %c0_i32_1 : i32, i32, i32
  }
  func.func @transform_6(%arg0: i32) -> (i32, i32) {
    %c0_i32 = arith.constant 0 : i32
    %c0_i32_0 = arith.constant 0 : i32
    %c0_i32_1 = arith.constant 0 : i32
    return %c0_i32, %c0_i32_0 : i32, i32
  }
  func.func @transform_7(%arg0: i32) -> i32 {
    %c0_i32 = arith.constant 0 : i32
    %c0_i32_0 = arith.constant 0 : i32
    return %c0_i32 : i32
  }
  func.func @transform_8(%arg0: i32) -> (i32, i32, i32) {
    %c0_i32 = arith.constant 0 : i32
    %c0_i32_0 = arith.constant 0 : i32
    %c0_i32_1 = arith.constant 0 : i32
    return %arg0, %c0_i32, %c0_i32_0 : i32, i32, i32
  }
}

</mosaic_0001>

<bundles_post_ra>
// kernel: _lambda_.1
= control target key start
LH: loop header
LB: loop body
LE: loop exit
PB: predicated region body
PF: predicated region fallthrough
CT: control target
= control target key end

     0   :  { %s10459_s0 = inlined_call_operand.vmem [shape: f32[2,64,64], index: 0, kind: input, shape index: {}]   ;;  %s10460_s1 = inlined_call_operand.vmem [shape: bf16[9,64,48], index: 1, kind: input, shape index: {}]   ;;  %s10461_s2 = inlined_call_operand.vmem [shape: bf16[16,32], index: 2, kind: input, shape index: {}]   ;;  %s10462_s3 = inlined_call_operand.vmem [shape: bf16[9,16,16], index: 3, kind: input, shape index: {}]   ;;  %s10463_s4 = inlined_call_operand.vmem [shape: bf16[9,16,32], index: 4, kind: input, shape index: {}]   ;;  %s10464_s5 = inlined_call_operand.vmem [shape: f32[9,64,1], index: 5, kind: input, shape index: {}]   ;;  %s10465_s6 = inlined_call_operand.vmem [shape: f32[8,128], index: 6, kind: input, shape index: {}]   ;;  %s10466_s7 = inlined_call_operand.<no memory space> [shape: f32[1], index: 7, kind: input, shape index: {}]   ;;  %s10467_s8 = inlined_call_operand.hbm [shape: f32[2,64,32], index: 8, kind: output, shape index: {}]  }
   0x1   :  { %13 = sst [smem:[#allocation2]] %s10466_s7 }
   0x2   :  { %14 = vsyncpa [#allocation4], 0 }
   0x3   :  { %16 = vsyncpa [#allocation4 + $0x1], 0  ;;  %s7620_s29 = smov 0   ;;  %s7622_s30 = smov 0  }
   0x4   :  { %s7624_s9 = smov 0   ;;  %s7626_s10 = smov 0  }
   0x5 LB: > { %s7641_s7 = sadd.s32 4294967295, %s7562_s10   ;;  %s6667_s11 = sadd.s32 4294967294, %s7562_s10   ;;  %s7562_s10 = sphi %s7626_s10, %s10746_s10   ;;  %s7558_s9 = sphi %s7624_s9, %s10745_s9   ;;  %s7554_s30 = sphi %s7622_s30, %s10744_s30   ;;  %s7550_s29 = sphi %s7620_s29, %s10743_s29  }
   0x6   : > { %s7645_s12 = sadd.s32 1, %s7562_s10   ;;  %s202_s13 = sadd.s32 1, %s7558_s9 }
   0x7   : > { %s199_s14 = ssub.s32 %s7562_s10, %s7645_s12  ;;  %p212_p0 = scmp.ne.s32.totalorder %s7558_s9, %s7554_s30 }
   0x8   : > { %p200_p1 = scmp.eq.s32.totalorder %s199_s14, 0  ;;  %p213_p2 = scmp.eq.s32.totalorder %s7641_s7, 1 }
   0x9   : > { %p218_p3 = scmp.ne.s32.totalorder %s7554_s30, %s7550_s29  ;;  %p219_p4 = scmp.eq.s32.totalorder %s6667_s11, 1 }
   0xa   : > { %s7656_s15 = scalar_select %p200_p1, %s7558_s9, %s202_s13  }
   0xb   : > { %p7658_p5 = por %p213_p2, %p212_p0  ;;  %p7662_p6 = por %p219_p4, %p218_p3 }
   0xc   : > { %p6670_p7 = scmp.ge.s32.totalorder %s7562_s10, 1  ;;  %p266_p8 = scmp.lt.s32.totalorder %s7562_s10, 3 }
   0xe   : > { %p267_p9 = pnand %p6670_p7, %p266_p8 }
  0x10   : > { %270 = sbr.rel (%p267_p9) target bundleno = 3394 (0xd42), region = 52 }
  0x15   : > { %v6758_v0 = vld [vmem:[%s10464_s5 + $0x80] sm:$0xff]  ;;  %p300_p10 = scmp.lt.s32.totalorder %s7641_s7, 1  ;;  %v10468_v3 = vlaneseq  ;;  %v7564_v4 = vmov 0   ;;  %v7255_v5 = vld [vmem:[%s10460_s1 + $0x18] sm:$0xff]  ;;  %v7254_v7 = vld [vmem:[%s10460_s1 + $0x10] sm:$0xff]  ;;  %vm371_vm1 = vcmask 523264  }
  0x16   : > { %v6722_v1 = vld [vmem:[%s10464_s5 + $0x40] sm:$0xff]  ;;  %7366 = vset.pattern.permute.xlu2 %v7564_v4  ;;  %7365 = vset.pattern.permute.xlu1 %v7564_v4  ;;  %v7259_v6 = vld [vmem:[%s10460_s1 + $0x38] sm:$0xff]  ;;  %v7258_v9 = vld [vmem:[%s10460_s1 + $0x30] sm:$0xff]  ;;  %vm1565_vm3 = vcmask 130048   ;;  %s7565_s19 = smov 120   ;;  %s7566_s20 = smov 112  }
  0x17   : > { %v413_v2 = vld [vmem:[%s10464_s5] sm:$0xff]  ;;  %7364 = vset.pattern.permute.xlu0 %v7564_v4  ;;  %718 = vperm.xlu2 %7366, %v6758_v0   ;;  %s301_s28 = scalar_select %p300_p10, %s7641_s7, 1  ;;  %v7689_v8 = vshrl.u32 %v10468_v3, 7  ;;  %v6759_v10 = vld [vmem:[%s10464_s5 + $0x88] sm:$0xff]  ;;  %v7263_v33 = vld [vmem:[%s10460_s1 + $0x58] sm:$0xff]  ;;  %vm2152_vm4 = vcmask 64512  }
  0x18   : > { %558 = vperm.xlu1 %7365, %v6722_v1   ;;  %423 = vperm.xlu0 %7364, %v413_v2   ;;  %v6723_v17 = vld [vmem:[%s10464_s5 + $0x48] sm:$0xff]  ;;  %v7252_v27 = vld [vmem:[%s10460_s1] sm:$0xff]  ;;  %v7267_v41 = vld [vmem:[%s10460_s1 + $0x78] sm:$0xff]  ;;  %vm1648_vm5 = vcmask 1047556   ;;  %vm2156_vm6 = vcmask 1043456   ;;  %s9362_s27 = sld [smem:[#allocation2]] }
  0x19   : > { %388 = vmatpush.bf16.msra.mxu0 %v7255_v5  ;;  %7308 = vmatpush.bf16.msra.mxu2 %v7255_v5  ;;  %s7251_s14 = sshll.u32 %s301_s28, 6  ;;  %10545 = vst [vmem:[#allocation6_spill] sm:$0xff] %v7689_v8  ;;  %v414_v18 = vld [vmem:[%s10464_s5 + $0x8] sm:$0xff]  ;;  %vm326_vm0 = vcmp.lt.s32.totalorder %v7689_v8, 1  ;;  %v7256_v29 = vld [vmem:[%s10460_s1 + $0x20] sm:$0xff]  ;;  %v7271_v42 = vld [vmem:[%s10460_s1 + $0x98] sm:$0xff] }
  0x1a   : > { %522 = vmatpush.bf16.msra.mxu1 %v7259_v6  ;;  %7312 = vmatpush.bf16.msra.mxu3 %v7259_v6  ;;  %s7700_s24 = scalar_lea.vmem %s10459_s0, %s7251_s14  ;;  %v7253_v19 = vld [vmem:[%s10460_s1 + $0x8] sm:$0xff]  ;;  %v6858_v34 = vld [vmem:[%s10464_s5 + $0x140] sm:$0xff]  ;;  %v7275_v43 = vld [vmem:[%s10460_s1 + $0xb8] sm:$0xff]  ;;  %vm620_vm2 = vcmp.lt.s32.totalorder %v7689_v8, 7  ;;  %s7569_s18 = smov 16   ;;  %vm6580_vm15 = vcmask 261120  }
  0x1b   : > { %v7703_v11 = vld [vmem:[%s7700_s24] sm:$0xff]  ;;  %v7706_v12 = vld [vmem:[%s7700_s24 + $0x30] sm:$0xff]  ;;  %v7709_v13 = vld [vmem:[%s7700_s24 + $0x38] sm:$0xff] }
  0x1c   : > { %v7712_v14 = vld [vmem:[%s7700_s24 + $0x10] sm:$0xff]  ;;  %v7715_v15 = vld [vmem:[%s7700_s24 + $0x18] sm:$0xff]  ;;  %v7718_v16 = vld [vmem:[%s7700_s24 + $0x20] sm:$0xff]  ;;  %v322_v20 = vrot.slane %v7706_v12, 7  ;;  %v323_v21 = vrot.slane %v7709_v13, 7  ;;  %v316_v23 = vrot.slane %v7703_v11, 7  ;;  %v7791_v39 = vpack.c.bf16 %v7703_v11, %v7709_v13 }
  0x1d   : > { %389 = vmatpush.bf16.msra.mxu0 %v7254_v7  ;;  %7309 = vmatpush.bf16.msra.mxu2 %v7254_v7  ;;  %v7257_v22 = vld [vmem:[%s10460_s1 + $0x28] sm:$0xff]  ;;  %v318_v24 = vrot.slane %v7712_v14, 7  ;;  %v319_v25 = vrot.slane %v7715_v15, 7  ;;  %v320_v26 = vrot.slane %v7718_v16, 7  ;;  %v6794_v36 = vld [vmem:[%s10464_s5 + $0xc0] sm:$0xff]  ;;  %v7795_v40 = vpack.c.bf16 %v7718_v16, %v7715_v15  ;;  %v7262_v44 = vld [vmem:[%s10460_s1 + $0x50] sm:$0xff] }
  0x1e   : > { %523 = vmatpush.bf16.msra.mxu1 %v7258_v9  ;;  %7313 = vmatpush.bf16.msra.mxu3 %v7258_v9  ;;  %v7746_v28 = vsel %vm326_vm0, %v322_v20, %v323_v21  ;;  %v7755_v30 = vsel %vm326_vm0, %v323_v21, %v316_v23  ;;  %v6795_v35 = vld [vmem:[%s10464_s5 + $0xc8] sm:$0xff]  ;;  %v7266_v47 = vld [vmem:[%s10460_s1 + $0x70] sm:$0xff]  ;;  %v6894_v49 = vld [vmem:[%s10464_s5 + $0x180] sm:$0xff]  ;;  %v612_v21 = vrot.slane %v7703_v11, 1 }
  0x1f   : > { %723 = vperm.xlu2 %7366, %v6759_v10   ;;  %v7761_v31 = vsel %vm326_vm0, %v319_v25, %v320_v26  ;;  %v7767_v32 = vsel %vm326_vm0, %v318_v24, %v319_v25  ;;  %v7783_v37 = vpack.c.bf16 %v7755_v30, %v7746_v28  ;;  %v7818_v45 = vld [vmem:[%s7700_s24 + $0x8] sm:$0xff]  ;;  %v7270_v51 = vld [vmem:[%s10460_s1 + $0x90] sm:$0xff]  ;;  %v7260_v63 = vld [vmem:[%s10460_s1 + $0x40] sm:$0xff] }
  0x20   : > { %563 = vperm.xlu1 %7365, %v6723_v17   ;;  %428 = vperm.xlu0 %7364, %v414_v18   ;;  %v7787_v38 = vpack.c.bf16 %v7761_v31, %v7767_v32  ;;  %v7821_v46 = vld [vmem:[%s7700_s24 + $0x28] sm:$0xff]  ;;  %v7274_v52 = vld [vmem:[%s10460_s1 + $0xb0] sm:$0xff]  ;;  %v317_v53 = vrot.slane %v7818_v45, 7  ;;  %v7264_v0 = vld [vmem:[%s10460_s1 + $0x60] sm:$0xff]  ;;  %v7901_v7 = vpack.c.bf16 %v7712_v14, %v7818_v45 }
  0x21   : > { %390 = vmatpush.bf16.msra.mxu0 %v7253_v19  ;;  %7310 = vmatpush.bf16.msra.mxu2 %v7253_v19  ;;  %v6895_v48 = vld [vmem:[%s10464_s5 + $0x188] sm:$0xff]  ;;  %v321_v54 = vrot.slane %v7821_v46, 7  ;;  %v6966_v1 = vld [vmem:[%s10464_s5 + $0x200] sm:$0xff]  ;;  %v7905_v9 = vpack.c.bf16 %v7706_v12, %v7821_v46  ;;  %v416_v18 = vld [vmem:[%s10464_s5 + $0x18] sm:$0xff] }
  0x22   : > { %524 = vmatpush.bf16.msra.mxu1 %v7257_v22  ;;  %7314 = vmatpush.bf16.msra.mxu3 %v7257_v22  ;;  %v6859_v50 = vld [vmem:[%s10464_s5 + $0x148] sm:$0xff]  ;;  %v7859_v59 = vsel %vm326_vm0, %v317_v53, %v318_v24  ;;  %v333_v60 = vsel %vm326_vm0, %v316_v23, %v317_v53  ;;  %v6930_v4 = vld [vmem:[%s10464_s5 + $0x1c0] sm:$0xff]  ;;  %v415_v19 = vld [vmem:[%s10464_s5 + $0x10] sm:$0xff]  ;;  %v613_v22 = vrot.slane %v7818_v45, 1  ;;  %v619_v23 = vrot.slane %v7709_v13, 1 }
  0x23   : > { %v7261_v55 = vld [vmem:[%s10460_s1 + $0x48] sm:$0xff]  ;;  %v7869_v61 = vsel %vm326_vm0, %v321_v54, %v322_v20  ;;  %v7875_v62 = vsel %vm326_vm0, %v320_v26, %v321_v54  ;;  %v7893_v5 = vpack.c.bf16 %v7859_v59, %v333_v60  ;;  %v7268_v10 = vld [vmem:[%s10460_s1 + $0x80] sm:$0xff]  ;;  %v614_v24 = vrot.slane %v7712_v14, 1 }
  0x24   : > { %v7265_v56 = vld [vmem:[%s10460_s1 + $0x68] sm:$0xff]  ;;  %v7897_v6 = vpack.c.bf16 %v7869_v61, %v7875_v62  ;;  %v7272_v17 = vld [vmem:[%s10460_s1 + $0xa0] sm:$0xff]  ;;  %v627_v25 = vsel %vm620_vm2, %v612_v21, %v613_v22  ;;  %v7941_v26 = vsel %vm620_vm2, %v619_v23, %v612_v21  ;;  %v916_v53 = vpack.c.bf16 %v7715_v15, %v7712_v14  ;;  %v7279_v14 = vld [vmem:[%s10460_s1 + $0xd8] sm:$0xff] }
  0x25   : > { %391 = vmatpush.bf16.msra.mxu0 %v7252_v27  ;;  %7311 = vmatpush.bf16.msra.mxu2 %v7252_v27  ;;  %v7269_v57 = vld [vmem:[%s10460_s1 + $0x88] sm:$0xff]  ;;  %v626_v27 = vsel %vm620_vm2, %v613_v22, %v614_v24  ;;  %v773_v54 = vpack.c.bf16 %v7767_v32, %v7859_v59  ;;  %v7287_v32 = vld [vmem:[%s10460_s1 + $0x118] sm:$0xff]  ;;  %v7276_v21 = vld [vmem:[%s10460_s1 + $0xc0] sm:$0xff] }
  0x26   : > { %525 = vmatpush.bf16.msra.mxu1 %v7256_v29  ;;  %7315 = vmatpush.bf16.msra.mxu3 %v7256_v29  ;;  %v7273_v58 = vld [vmem:[%s10460_s1 + $0xa8] sm:$0xff]  ;;  %v6760_v29 = vld [vmem:[%s10464_s5 + $0x90] sm:$0xff]  ;;  %v6933_v59 = vld [vmem:[%s10464_s5 + $0x1d8] sm:$0xff] }
  0x27   : > { %1090 = vperm.xlu2 %7366, %v6858_v34   ;;  %v6931_v2 = vld [vmem:[%s10464_s5 + $0x1c8] sm:$0xff]  ;;  %v6724_v34 = vld [vmem:[%s10464_s5 + $0x50] sm:$0xff]  ;;  %v417_v22 = vld [vmem:[%s10464_s5 + $0x20] sm:$0xff] }
  0x28   : > { %866 = vperm.xlu1 %7365, %v6795_v35   ;;  %861 = vperm.xlu0 %7364, %v6794_v36   ;;  %v6967_v20 = vld [vmem:[%s10464_s5 + $0x208] sm:$0xff]  ;;  %v7955_v35 = vpack.c.bf16 %v627_v25, %v7941_v26  ;;  %v915_v36 = vpack.c.bf16 %v7818_v45, %v7703_v11  ;;  %v6796_v11 = vld [vmem:[%s10464_s5 + $0xd0] sm:$0xff]  ;;  %v616_v45 = vrot.slane %v7718_v16, 1 }
  0x29   : > { %682 = vmatpush.bf16.msrb.mxu2 %v7263_v33  ;;  %6690 = vmatmul.msk.bf16.vlgmr.msra.gmra.mxu0 %vm371_vm1, %v7783_v37  ;;  %v6725_v33 = vld [vmem:[%s10464_s5 + $0x58] sm:$0xff] }
  0x2a   : > { %6692 = vmatmul.msk.bf16.vlgmr.msra.gmra.mxu2 %vm371_vm1, %v7787_v38  ;;  %6718 = vmatmul.msk.bf16.vlgmr.msra.gmra.mxu1 %vm371_vm1, %v7791_v39 }
  0x2b   : > { %6720 = vmatmul.msk.bf16.vlgmr.msra.gmra.mxu3 %vm371_vm1, %v7795_v40  ;;  %968 = vmatpush.bf16.msrb.mxu0 %v7271_v42  ;;  %v1001_v42 = vpack.c.bf16 %v626_v27, %v627_v25  ;;  %v6968_v25 = vld [vmem:[%s10464_s5 + $0x210] sm:$0xff] }
  0x2c   : > { %825 = vmatpush.bf16.msrb.mxu3 %v7267_v41  ;;  %1054 = vmatpush.bf16.msrb.mxu1 %v7275_v43  ;;  %v772_v41 = vpack.c.bf16 %v333_v60, %v7755_v30  ;;  %v6797_v43 = vld [vmem:[%s10464_s5 + $0xd8] sm:$0xff]  ;;  %v6932_v60 = vld [vmem:[%s10464_s5 + $0x1d0] sm:$0xff] }
  0x2d   : > { %683 = vmatpush.bf16.msrb.mxu2 %v7262_v44  ;;  %v6761_v30 = vld [vmem:[%s10464_s5 + $0x98] sm:$0xff]  ;;  %v615_v44 = vrot.slane %v7715_v15, 1 }
  0x2e   : > { %v7283_v15 = vld [vmem:[%s10460_s1 + $0xf8] sm:$0xff] }
  0x2f   : > { %1222 = vperm.xlu2 %7366, %v6895_v48   ;;  %969 = vmatpush.bf16.msrb.mxu0 %v7270_v51  ;;  %v624_v48 = vsel %vm620_vm2, %v615_v44, %v616_v45  ;;  %v6860_v51 = vld [vmem:[%s10464_s5 + $0x150] sm:$0xff] }
  0x30   : > { %826 = vmatpush.bf16.msrb.mxu3 %v7266_v47  ;;  %1217 = vperm.xlu1 %7365, %v6894_v49   ;;  %v625_v47 = vsel %vm620_vm2, %v614_v24, %v615_v44  ;;  %v6896_v49 = vld [vmem:[%s10464_s5 + $0x190] sm:$0xff]  ;;  %v6969_v24 = vld [vmem:[%s10464_s5 + $0x218] sm:$0xff] }
  0x31   : > { %1095 = vperm.xlu0 %7364, %v6859_v50   ;;  %1055 = vmatpush.bf16.msrb.mxu1 %v7274_v52  ;;  %v6861_v50 = vld [vmem:[%s10464_s5 + $0x158] sm:$0xff]  ;;  %v7989_v52 = vpack.c.bf16 %v625_v47, %v626_v27 }
  0x32   : > { %684 = vmatpush.bf16.msrb.mxu2 %v7261_v55  ;;  %v1002_v55 = vpack.c.bf16 %v624_v48, %v625_v47  ;;  %v6862_v47 = vld [vmem:[%s10464_s5 + $0x160] sm:$0xff] }
  0x33   : > { %970 = vmatpush.bf16.msrb.mxu0 %v7269_v57  ;;  %v918_v57 = vpack.c.bf16 %v7709_v13, %v7706_v12 }
  0x34   : > { %827 = vmatpush.bf16.msrb.mxu3 %v7265_v56  ;;  %v775_v56 = vpack.c.bf16 %v7746_v28, %v7869_v61  ;;  %v6934_v28 = vld [vmem:[%s10464_s5 + $0x1e0] sm:$0xff]  ;;  %v6899_v61 = vld [vmem:[%s10464_s5 + $0x1a8] sm:$0xff] }
  0x35   : > { %1056 = vmatpush.bf16.msrb.mxu1 %v7273_v58  ;;  %v7278_v58 = vld [vmem:[%s10460_s1 + $0xd0] sm:$0xff] }
  0x36   : > { %685 = vmatpush.bf16.msrb.mxu2 %v7260_v63  ;;  %v6897_v63 = vld [vmem:[%s10464_s5 + $0x198] sm:$0xff] }
  0x37   : > { %1471 = vperm.xlu2 %7366, %v6966_v1   ;;  %971 = vmatpush.bf16.msrb.mxu0 %v7268_v10  ;;  %v7286_v1 = vld [vmem:[%s10460_s1 + $0x110] sm:$0xff]  ;;  %v7277_v10 = vld [vmem:[%s10460_s1 + $0xc8] sm:$0xff] }
  0x38   : > { %828 = vmatpush.bf16.msrb.mxu3 %v7264_v0  ;;  %1349 = vperm.xlu1 %7365, %v6931_v2   ;;  %v7282_v0 = vld [vmem:[%s10460_s1 + $0xf0] sm:$0xff]  ;;  %v617_v2 = vrot.slane %v7821_v46, 1 }
  0x39   : > { %1344 = vperm.xlu0 %7364, %v6930_v4   ;;  %6691 = vmatmul.msk.bf16.gmra.mxu0 %vm371_vm1, %v7893_v5  ;;  %v618_v4 = vrot.slane %v7706_v12, 1  ;;  %v6799_v12 = vld [vmem:[%s10464_s5 + $0xe8] sm:$0xff] }
  0x3a   : > { %6693 = vmatmul.msk.bf16.gmra.mxu2 %vm371_vm1, %v7897_v6  ;;  %6719 = vmatmul.msk.bf16.gmra.mxu1 %vm371_vm1, %v7901_v7 }
  0x3b   : > { %6721 = vmatmul.msk.bf16.gmra.mxu3 %vm371_vm1, %v7905_v9  ;;  %1057 = vmatpush.bf16.msrb.mxu1 %v7272_v17  ;;  %v7281_v17 = vld [vmem:[%s10460_s1 + $0xe8] sm:$0xff] }
  0x3c   : > { %1181 = vmatpush.bf16.msra.mxu2 %v7279_v14  ;;  %1308 = vmatpush.bf16.msra.mxu3 %v7283_v15  ;;  %v419_v14 = vld [vmem:[%s10464_s5 + $0x30] sm:$0xff] }
  0x3d   : > { %1435 = vmatpush.bf16.msra.mxu0 %v7287_v32 }
  0x3f   : > { %438 = vperm.xlu2 %7366, %v416_v18   ;;  %v7285_v18 = vld [vmem:[%s10460_s1 + $0x108] sm:$0xff] }
  0x40   : > { %433 = vperm.xlu1 %7365, %v415_v19   ;;  %1182 = vmatpush.bf16.msra.mxu2 %v7278_v58  ;;  %v623_v19 = vsel %vm620_vm2, %v616_v45, %v617_v2  ;;  %v6765_v58 = vld [vmem:[%s10464_s5 + $0xb8] sm:$0xff] }
  0x41   : > { %1476 = vperm.xlu0 %7364, %v6967_v20   ;;  %1309 = vmatpush.bf16.msra.mxu3 %v7282_v0  ;;  %v622_v20 = vsel %vm620_vm2, %v617_v2, %v618_v4  ;;  %v8058_v27 = vpack.c.bf16 %v623_v19, %v624_v48  ;;  %v6898_v48 = vld [vmem:[%s10464_s5 + $0x1a0] sm:$0xff]  ;;  %v6864_v0 = vld [vmem:[%s10464_s5 + $0x170] sm:$0xff] }
  0x42   : > { %1436 = vmatpush.bf16.msra.mxu0 %v7286_v1  ;;  %v6801_v1 = vld [vmem:[%s10464_s5 + $0xf8] sm:$0xff]  ;;  %v6800_v2 = vld [vmem:[%s10464_s5 + $0xf0] sm:$0xff] }
  0x44   : > { %1183 = vmatpush.bf16.msra.mxu2 %v7277_v10 }
  0x45   : > { %1310 = vmatpush.bf16.msra.mxu3 %v7281_v17 }
  0x46   : > { %1437 = vmatpush.bf16.msra.mxu0 %v7285_v18 }
  0x47   : > { %728 = vperm.xlu2 %7366, %v6760_v29   ;;  %v917_v29 = vpack.c.bf16 %v7821_v46, %v7718_v16  ;;  %v6727_v16 = vld [vmem:[%s10464_s5 + $0x68] sm:$0xff] }
  0x48   : > { %573 = vperm.xlu1 %7365, %v6725_v33   ;;  %v774_v33 = vpack.c.bf16 %v7875_v62, %v7761_v31  ;;  %1184 = vmatpush.bf16.msra.mxu2 %v7276_v21  ;;  %v6726_v31 = vld [vmem:[%s10464_s5 + $0x60] sm:$0xff]  ;;  %v418_v46 = vld [vmem:[%s10464_s5 + $0x28] sm:$0xff]  ;;  %v6901_v21 = vld [vmem:[%s10464_s5 + $0x1b8] sm:$0xff] }
  0x49   : > { %568 = vperm.xlu0 %7364, %v6724_v34   ;;  %6826 = vmatmul.msk.bf16.vlgmr.msrb.gmra.mxu0 %vm371_vm1, %v915_v36  ;;  %v1003_v34 = vpack.c.bf16 %v622_v20, %v623_v19  ;;  %v7280_v36 = vld [vmem:[%s10460_s1 + $0xe0] sm:$0xff] }
  0x4a   : > { %6754 = vmatmul.msk.bf16.vlgmr.msrb.gmra.mxu2 %vm371_vm1, %v7955_v35  ;;  %6854 = vmatmul.msk.bf16.vlgmr.msrb.gmra.mxu1 %vm371_vm1, %v1001_v42  ;;  %v621_v42 = vsel %vm620_vm2, %v618_v4, %v619_v23 }
  0x4b   : > { %6790 = vmatmul.msk.bf16.vlgmr.msrb.gmra.mxu3 %vm371_vm1, %v772_v41  ;;  %v7284_v41 = vld [vmem:[%s10460_s1 + $0x100] sm:$0xff]  ;;  %v8099_v44 = vpack.c.bf16 %v621_v42, %v622_v20  ;;  %v1004_v45 = vpack.c.bf16 %v7941_v26, %v621_v42  ;;  %v6863_v26 = vld [vmem:[%s10464_s5 + $0x168] sm:$0xff] }
  0x4c   : > { %1311 = vmatpush.bf16.msra.mxu3 %v7280_v36  ;;  %1438 = vmatpush.bf16.msra.mxu0 %v7284_v41  ;;  %v6972_v36 = vld [vmem:[%s10464_s5 + $0x230] sm:$0xff] }
  0x4f   : > { %876 = vperm.xlu2 %7366, %v6797_v43   ;;  %v6798_v43 = vld [vmem:[%s10464_s5 + $0xe0] sm:$0xff] }
  0x50   : > { %871 = vperm.xlu1 %7365, %v6796_v11   ;;  %v6763_v11 = vld [vmem:[%s10464_s5 + $0xa8] sm:$0xff] }
  0x51   : > { %733 = vperm.xlu0 %7364, %v6761_v30   ;;  %v6762_v30 = vld [vmem:[%s10464_s5 + $0xa0] sm:$0xff] }
  0x57   : > { %1227 = vperm.xlu2 %7366, %v6896_v49  }
  0x58   : > { %1105 = vperm.xlu1 %7365, %v6861_v50  }
  0x59   : > { %1100 = vperm.xlu0 %7364, %v6860_v51   ;;  %6827 = vmatmul.msk.bf16.gmra.mxu0 %vm371_vm1, %v916_v53  ;;  %v6971_v53 = vld [vmem:[%s10464_s5 + $0x228] sm:$0xff] }
  0x5a   : > { %6755 = vmatmul.msk.bf16.gmra.mxu2 %vm371_vm1, %v7989_v52  ;;  %6855 = vmatmul.msk.bf16.gmra.mxu1 %vm371_vm1, %v1002_v55  ;;  %v6728_v55 = vld [vmem:[%s10464_s5 + $0x70] sm:$0xff] }
  0x5b   : > { %6791 = vmatmul.msk.bf16.gmra.mxu3 %vm371_vm1, %v773_v54 }
  0x5f   : > { %1359 = vperm.xlu2 %7366, %v6933_v59   ;;  %v6764_v59 = vld [vmem:[%s10464_s5 + $0xb0] sm:$0xff] }
  0x60   : > { %1354 = vperm.xlu1 %7365, %v6932_v60  }
  0x61   : > { %1232 = vperm.xlu0 %7364, %v6897_v63  }
  0x67   : > { %443 = vperm.xlu2 %7366, %v417_v22  }
  0x68   : > { %1486 = vperm.xlu1 %7365, %v6969_v24  }
  0x69   : > { %1481 = vperm.xlu0 %7364, %v6968_v25   ;;  %6828 = vmatmul.msk.bf16.gmra.mxu0 %vm371_vm1, %v917_v29 }
  0x6a   : > { %6756 = vmatmul.msk.bf16.gmra.mxu2 %vm371_vm1, %v8058_v27  ;;  %6856 = vmatmul.msk.bf16.gmra.mxu1 %vm371_vm1, %v1003_v34 }
  0x6b   : > { %6792 = vmatmul.msk.bf16.gmra.mxu3 %vm371_vm1, %v774_v33 }
  0x6f   : > { %583 = vperm.xlu2 %7366, %v6727_v16   ;;  %v6937_v16 = vld [vmem:[%s10464_s5 + $0x1f8] sm:$0xff] }
  0x70   : > { %578 = vperm.xlu1 %7365, %v6726_v31   ;;  %v6936_v31 = vld [vmem:[%s10464_s5 + $0x1f0] sm:$0xff] }
  0x71   : > { %448 = vperm.xlu0 %7364, %v418_v46   ;;  %v8084_v62 = vpop.permute.xlu2 %718 }
  0x77   : > { %881 = vperm.xlu2 %7366, %v6798_v43  }
  0x78   : > { %743 = vperm.xlu1 %7365, %v6763_v11  }
  0x79   : > { %738 = vperm.xlu0 %7364, %v6762_v30   ;;  %6829 = vmatmul.msk.bf16.gmra.mxu0 %vm371_vm1, %v918_v57  ;;  %v8108_v23 = vpop.permute.xlu2 %723  ;;  %v420_v57 = vld [vmem:[%s10464_s5 + $0x38] sm:$0xff] }
  0x7a   : > { %6757 = vmatmul.msk.bf16.gmra.mxu2 %vm371_vm1, %v8099_v44  ;;  %6857 = vmatmul.msk.bf16.gmra.mxu1 %vm371_vm1, %v1004_v45 }
  0x7b   : > { %6793 = vmatmul.msk.bf16.gmra.mxu3 %vm371_vm1, %v775_v56 }
  0x7f   : > { %1115 = vperm.xlu2 %7366, %v6863_v26  }
  0x80   : > { %1110 = vperm.xlu1 %7365, %v6862_v47   ;;  %v6973_v47 = vld [vmem:[%s10464_s5 + $0x238] sm:$0xff] }
  0x81   : > { %886 = vperm.xlu0 %7364, %v6799_v12   ;;  %v8124_v13 = vpop.permute.xlu2 %1090 }
  0x87   : > { %1364 = vperm.xlu2 %7366, %v6934_v28  }
  0x88   : > { %1242 = vperm.xlu1 %7365, %v6899_v61  }
  0x89   : > { %1237 = vperm.xlu0 %7364, %v6898_v48   ;;  %6962 = vmatmul.msk.bf16.vlgmr.msra.gmra.mxu0 %vm371_vm1, %v7989_v52  ;;  %v8145_v51 = vpop.permute.xlu2 %1222  ;;  %v6935_v52 = vld [vmem:[%s10464_s5 + $0x1e8] sm:$0xff] }
  0x8a   : > { %6890 = vmatmul.msk.bf16.vlgmr.msra.gmra.mxu2 %vm371_vm1, %v7893_v5  ;;  %v8141_v49 = vpop.permute.xlu1 %558  ;;  %v8143_v50 = vpop.permute.xlu0 %423  ;;  %v6970_v5 = vld [vmem:[%s10464_s5 + $0x220] sm:$0xff] }
  0x8b   : > { %6926 = vmatmul.msk.bf16.vlgmr.msra.gmra.mxu3 %vm371_vm1, %v7901_v7 }
  0x8f   : > { %1496 = vperm.xlu2 %7366, %v6971_v53  }
  0x90   : > { %1491 = vperm.xlu1 %7365, %v6970_v5  }
  0x91   : > { %1369 = vperm.xlu0 %7364, %v6935_v52   ;;  %v8163_v56 = vpop.permute.xlu2 %1471 }
  0x92   : > { %v8156_v7 = vpop.permute.xlu1 %563  ;;  %v8158_v54 = vpop.permute.xlu0 %428 }
  0x97   : > { %588 = vperm.xlu2 %7366, %v6728_v55  }
  0x98   : > { %458 = vperm.xlu1 %7365, %v420_v57  }
  0x99   : > { %453 = vperm.xlu0 %7364, %v419_v14   ;;  %6963 = vmatmul.msk.bf16.gmra.mxu0 %vm371_vm1, %v8058_v27  ;;  %v8190_v60 = vpop.permute.xlu2 %438 }
  0x9a   : > { %6891 = vmatmul.msk.bf16.gmra.mxu2 %vm371_vm1, %v7787_v38  ;;  %v8177_v15 = vpop.permute.xlu1 %866  ;;  %v8179_v32 = vpop.permute.xlu0 %861  ;;  %v6729_v38 = vld [vmem:[%s10464_s5 + $0x78] sm:$0xff] }
  0x9b   : > { %6927 = vmatmul.msk.bf16.gmra.mxu3 %vm371_vm1, %v7795_v40 }
  0x9f   : > { %753 = vperm.xlu2 %7366, %v6765_v58  }
  0xa0   : > { %748 = vperm.xlu1 %7365, %v6764_v59  }
  0xa1   : > { %593 = vperm.xlu0 %7364, %v6729_v38   ;;  %v8205_v17 = vpop.permute.xlu2 %728 }
  0xa2   : > { %v8192_v40 = vpop.permute.xlu1 %1217 }
  0xa3   : > { %v8194_v63 = vpop.permute.xlu0 %1095 }
  0xa6   : > { %v393_v4 = vpop.f32.mrf.mxu0 }
  0xa7   : > { %v527_v10 = vpop.f32.mrf.mxu1  ;;  %1120 = vperm.xlu2 %7366, %v6864_v0   ;;  %v461_v5 = vmul.f32 %v8143_v50, %v393_v4 }
  0xa8   : > { %896 = vperm.xlu1 %7365, %v6801_v1   ;;  %v596_v52 = vmul.f32 %v8141_v49, %v527_v10 }
  0xa9   : > { %891 = vperm.xlu0 %7364, %v6800_v2   ;;  %6964 = vmatmul.msk.bf16.gmra.mxu0 %vm371_vm1, %v8099_v44  ;;  %v8232_v33 = vpop.permute.xlu2 %876 }
  0xaa   : > { %6892 = vmatmul.msk.bf16.gmra.mxu2 %vm371_vm1, %v7897_v6  ;;  %v8213_v18 = vpop.permute.xlu1 %1349  ;;  %v6900_v6 = vld [vmem:[%s10464_s5 + $0x1b0] sm:$0xff]  ;;  %v604_v58 = vadd.f32 %v596_v52, %v461_v5 }
  0xab   : > { %6928 = vmatmul.msk.bf16.gmra.mxu3 %vm371_vm1, %v7905_v9  ;;  %v8215_v19 = vpop.permute.xlu0 %1344  ;;  %v6865_v9 = vld [vmem:[%s10464_s5 + $0x178] sm:$0xff] }
  0xad   : > { %v8217_v20 = vpop.f32.mrf.mxu2 }
  0xae   : > { %v8222_v22 = vpop.f32.mrf.mxu3  ;;  %v395_v24 = vpop.f32.mrf.mxu0 }
  0xaf   : > { %v529_v25 = vpop.f32.mrf.mxu1  ;;  %1252 = vperm.xlu2 %7366, %v6901_v21  }
  0xb0   : > { %1247 = vperm.xlu1 %7365, %v6900_v6   ;;  %v462_v6 = vmul.f32 %v8158_v54, %v395_v24  ;;  %v597_v50 = vmul.f32 %v8156_v7, %v529_v25 }
  0xb1   : > { %1125 = vperm.xlu0 %7364, %v6865_v9   ;;  %v8255_v45 = vpop.permute.xlu2 %1227 }
  0xb2   : > { %v434_v27 = vpop.permute.xlu1 %433 }
  0xb3   : > { %v8230_v29 = vpop.permute.xlu0 %1476 }
  0xb5   : > { %v8234_v34 = vpop.f32.mrf.mxu2 }
  0xb6   : > { %v8239_v41 = vpop.f32.mrf.mxu3  ;;  %v398_v46 = vpop.f32.mrf.mxu0 }
  0xb7   : > { %v463_v42 = vmul.f32 %v434_v27, %v398_v46  ;;  %1501 = vperm.xlu2 %7366, %v6972_v36   ;;  %v532_v43 = vpop.f32.mrf.mxu1  ;;  %v605_v36 = vadd.f32 %v597_v50, %v462_v6 }
  0xb8   : > { %1379 = vperm.xlu1 %7365, %v6937_v16  }
  0xb9   : > { %1374 = vperm.xlu0 %7364, %v6936_v31   ;;  %6965 = vmatmul.msk.bf16.gmra.mxu0 %vm371_vm1, %v7955_v35  ;;  %v8266_v53 = vpop.permute.xlu2 %1359 }
  0xba   : > { %6893 = vmatmul.msk.bf16.gmra.mxu2 %vm371_vm1, %v7783_v37  ;;  %v574_v11 = vpop.permute.xlu1 %573 }
  0xbb   : > { %6929 = vmatmul.msk.bf16.gmra.mxu3 %vm371_vm1, %v7791_v39  ;;  %v569_v30 = vpop.permute.xlu0 %568 }
  0xbc   : > { %v598_v24 = vmul.f32 %v569_v30, %v532_v43 }
  0xbd   : > { %v8253_v44 = vpop.f32.mrf.mxu2 }
  0xbe   : > { %v8257_v26 = vpop.f32.mrf.mxu3  ;;  %v400_v12 = vpop.f32.mrf.mxu0 }
  0xbf   : > { %v534_v35 = vpop.f32.mrf.mxu1  ;;  %v464_v30 = vmul.f32 %v8190_v60, %v400_v12 }
  0xc0   : > { %v599_v6 = vmul.f32 %v574_v11, %v534_v35 }
  0xc1   : > { %1506 = vperm.xlu0 %7364, %v6973_v47   ;;  %v444_v49 = vpop.permute.xlu2 %443 }
  0xc2   : > { %v872_v37 = vpop.permute.xlu1 %871 }
  0xc3   : > { %v734_v28 = vpop.permute.xlu0 %733 }
  0xc5   : > { %v8262_v61 = vpop.f32.mrf.mxu2 }
  0xc6   : > { %v8264_v39 = vpop.f32.mrf.mxu3  ;;  %v973_v48 = vpop.f32.mrf.mxu0 }
  0xc7   : > { %v8275_v0 = vpop.f32.mrf.mxu1 }
  0xc9   : > { %v8292_v52 = vpop.permute.xlu2 %583 }
  0xca   : > { %v8270_v55 = vpop.permute.xlu1 %1105 }
  0xcb   : > { %v8272_v57 = vpop.permute.xlu0 %1100 }
  0xcd   : > { %v687_v14 = vpop.f32.mrf.mxu2 }
  0xce   : > { %v756_v59 = vmul.f32 %v8084_v62, %v687_v14  ;;  %v830_v38 = vpop.f32.mrf.mxu3  ;;  %v975_v1 = vpop.f32.mrf.mxu0 }
  0xcf   : > { %v899_v21 = vmul.f32 %v8179_v32, %v830_v38  ;;  %v1061_v54 = vpop.f32.mrf.mxu1 }
  0xd0   : > { %v764_v2 = vadd.f32 %v756_v59, %v604_v58  ;;  %v606_v59 = vadd.f32 %v598_v24, %v463_v42 }
  0xd2   : > { %v907_v4 = vadd.f32 %v899_v21, %v764_v2  ;;  %v8280_v10 = vpop.permute.xlu1 %1354 }
  0xd3   : > { %v8282_v9 = vpop.permute.xlu0 %1232 }
  0xd4   : > { %v8284_v27 = vadd.f32 %v973_v48, %v907_v4  ;;  %v1129_v48 = vmul.f32 %v8194_v63, %v1061_v54  ;;  %v465_v63 = vmul.f32 %v444_v49, %v8217_v20 }
  0xd5   : > { %v689_v62 = vpop.f32.mrf.mxu2 }
  0xd6   : > { %v757_v16 = vmul.f32 %v8108_v23, %v689_v62  ;;  %v832_v31 = vpop.f32.mrf.mxu3  ;;  %v978_v46 = vpop.f32.mrf.mxu0 }
  0xd7   : > { %v900_v32 = vmul.f32 %v8177_v15, %v832_v31  ;;  %v1064_v8 = vpop.f32.mrf.mxu1 }
  0xd8   : > { %v765_v47 = vadd.f32 %v757_v16, %v605_v36  ;;  %v607_v36 = vadd.f32 %v599_v6, %v464_v30  ;;  %v882_v16 = vpop.permute.xlu2 %881 }
  0xda   : > { %v908_v7 = vadd.f32 %v900_v32, %v765_v47  ;;  %v8288_v25 = vpop.permute.xlu1 %1486 }
  0xdb   : > { %v8290_v5 = vpop.permute.xlu0 %1481 }
  0xdc   : > { %v994_v14 = vadd.f32 %v975_v1, %v908_v7 }
  0xdd   : > { %v692_v58 = vpop.f32.mrf.mxu2 }
  0xde   : > { %v758_v23 = vmul.f32 %v8205_v17, %v692_v58  ;;  %v835_v38 = vpop.f32.mrf.mxu3  ;;  %v8296_v2 = vadd.f32 %v1129_v48, %v994_v14  ;;  %v8298_v21 = vpop.f32.mrf.mxu0 }
  0xdf   : > { %v901_v15 = vmul.f32 %v872_v37, %v835_v38 }
  0xe0   : > { %v766_v43 = vadd.f32 %v758_v23, %v606_v59 }
  0xe2   : > { %v909_v50 = vadd.f32 %v901_v15, %v766_v43  ;;  %v579_v4 = vpop.permute.xlu1 %578 }
  0xe3   : > { %v8301_v62 = vpop.permute.xlu0 %448  ;;  %v600_v17 = vmul.f32 %v579_v4, %v8222_v22  ;;  %v7288_v4 = vld [vmem:[%s10461_s2] sm:$0xff] }
  0xe4   : > { %v8304_v1 = vadd.f32 %v978_v46, %v909_v50  ;;  %v8315_v46 = vpop.permute.xlu2 %1115  ;;  %1585 = vmatpush.bf16.msra.mxu1 %v7288_v4 }
  0xe5   : > { %v694_v42 = vpop.f32.mrf.mxu2  ;;  %v608_v37 = vadd.f32 %v600_v17, %v465_v63 }
  0xe6   : > { %v759_v31 = vmul.f32 %v734_v28, %v694_v42  ;;  %v8307_v47 = vpop.f32.mrf.mxu3  ;;  %v983_v32 = vpop.f32.mrf.mxu0 }
  0xe8   : > { %v8309_v60 = vadd.f32 %v759_v31, %v607_v36 }
  0xea   : > { %v8311_v11 = vpop.permute.xlu1 %743 }
  0xeb   : > { %v739_v12 = vpop.permute.xlu0 %738 }
  0xec   : > { %v8329_v38 = vpop.permute.xlu2 %1364 }
  0xed   : > { %v697_v35 = vpop.f32.mrf.mxu2 }
  0xee   : > { %v760_v54 = vmul.f32 %v739_v12, %v697_v35  ;;  %v840_v20 = vpop.f32.mrf.mxu3  ;;  %v8313_v49 = vpop.f32.mrf.mxu0  ;;  %v1128_v12 = vmul.f32 %v8124_v13, %v8275_v0 }
  0xef   : > { %v903_v24 = vmul.f32 %v882_v16, %v840_v20 }
  0xf0   : > { %v768_v22 = vadd.f32 %v760_v54, %v608_v37  ;;  %v1136_v54 = vadd.f32 %v1128_v12, %v8284_v27 }
  0xf2   : > { %v911_v7 = vadd.f32 %v903_v24, %v768_v22  ;;  %v8317_v48 = vpop.permute.xlu1 %1110 }
  0xf3   : > { %v8319_v28 = vpop.permute.xlu0 %886 }
  0xf4   : > { %v8321_v14 = vadd.f32 %v983_v32, %v911_v7  ;;  %v8344_v42 = vpop.permute.xlu2 %1496 }
  0xf5   : > { %v8323_v58 = vpop.f32.mrf.mxu2  ;;  %10548 = vst [vmem:[#allocation9_spill] sm:$0xff] %v8344_v42 }
  0xf6   : > { %v8325_v59 = vpop.f32.mrf.mxu3  ;;  %v8327_v23 = vpop.f32.mrf.mxu0 }
  0xfa   : > { %v8331_v15 = vpop.permute.xlu1 %1242 }
  0xfb   : > { %v8333_v43 = vpop.permute.xlu0 %1237 }
  0xfc   : > { %v589_v24 = vpop.permute.xlu2 %588 }
  0xfd   : > { %v702_v30 = vpop.f32.mrf.mxu2 }
  0xfe   : > { %v845_v6 = vpop.f32.mrf.mxu3  ;;  %v8335_v50 = vpop.f32.mrf.mxu0 }
  0xff   : > { %10546 = vst [vmem:[#allocation7_spill] sm:$0xff] %v8335_v50  ;;  %v602_v50 = vmul.f32 %v589_v24, %v8257_v26 }
 0x102   : > { %v8340_v63 = vpop.permute.xlu1 %1491 }
 0x103   : > { %v8342_v17 = vpop.permute.xlu0 %1369 }
 0x104   : > { %10547 = vst [vmem:[#allocation8_spill] sm:$0xff] %v8342_v17 }
 0x105   : > { %v8346_v36 = vpop.f32.mrf.mxu2 }
 0x106   : > { %10549 = vst [vmem:[#allocation10_spill] sm:$0xff] %v8346_v36  ;;  %v8348_v16 = vpop.f32.mrf.mxu3  ;;  %v1440_v37 = vpop.f32.mrf.mxu0 }
 0x107   : > { %10550 = vst [vmem:[#allocation11_spill] sm:$0xff] %v8348_v16 }
 0x10a   : > { %v8350_v31 = vpop.permute.xlu1 %458 }
 0x10b   : > { %v454_v32 = vpop.permute.xlu0 %453 }
 0x10c   : > { %v467_v4 = vmul.f32 %v454_v32, %v8253_v44  ;;  %v1509_v44 = vmul.f32 %v8163_v56, %v1440_v37  ;;  %v1066_v56 = vpop.f32.mrf.mxu1 }
 0x10d   : > { %v1186_v35 = vpop.f32.mrf.mxu2 }
 0x10e   : > { %v1255_v20 = vmul.f32 %v8192_v40, %v1186_v35  ;;  %v1313_v22 = vpop.f32.mrf.mxu3  ;;  %v1442_v7 = vpop.f32.mrf.mxu0  ;;  %v610_v13 = vadd.f32 %v602_v50, %v467_v4  ;;  %v8364_v40 = vld [vmem:[%s10465_s6] sm:$0xff] }
 0x10f   : > { %v1382_v16 = vmul.f32 %v8215_v19, %v1313_v22  ;;  %v1510_v50 = vmul.f32 %v8230_v29, %v1442_v7 }
 0x110   : > { %v1263_v3 = vadd.f32 %v1255_v20, %v1136_v54  ;;  %v8371_v54 = vperm.slane %v8364_v40, 0 }
 0x112   : > { %v749_v36 = vpop.permute.xlu1 %748  ;;  %v1390_v0 = vadd.f32 %v1382_v16, %v1263_v3  ;;  %v1130_v16 = vmul.f32 %v8272_v57, %v1064_v8 }
 0x113   : > { %v8359_v42 = vpop.permute.xlu0 %593  ;;  %v762_v17 = vmul.f32 %v749_v36, %v702_v30 }
 0x114   : > { %v8368_v19 = vadd.f32 %v1509_v44, %v1390_v0  ;;  %v1131_v0 = vmul.f32 %v8270_v55, %v1066_v56 }
 0x115   : > { %v1188_v27 = vpop.f32.mrf.mxu2  ;;  %v770_v32 = vadd.f32 %v762_v17, %v610_v13 }
 0x116   : > { %v1256_v12 = vmul.f32 %v8145_v51, %v1188_v27  ;;  %v1315_v26 = vpop.f32.mrf.mxu3  ;;  %v1445_v35 = vpop.f32.mrf.mxu0  ;;  %10551 = vst [vmem:[#allocation12_spill] sm:$0xff] %v8368_v19  ;;  %v902_v51 = vmul.f32 %v8232_v33, %v8307_v47  ;;  %v8381_v37 = vadd.f32 %v8371_v54, %v8368_v19  ;;  %v466_v27 = vmul.f32 %v8301_v62, %v8234_v34 }
 0x117   : > { %v1383_v30 = vmul.f32 %v8213_v18, %v1315_v26  ;;  %v1511_v26 = vmul.f32 %v8290_v5, %v1445_v35  ;;  %v904_v5 = vmul.f32 %v8319_v28, %v8325_v59 }
 0x118   : > { %v1264_v3 = vadd.f32 %v1256_v12, %v8296_v2  ;;  %v1138_v2 = vadd.f32 %v1130_v16, %v8304_v1  ;;  %v910_v29 = vadd.f32 %v902_v51, %v8309_v60  ;;  %v10477_v7 = vmax.f32 %v8381_v37, 0.0 }
 0x119   : > { %v761_v12 = vmul.f32 %v8311_v11, %v8323_v58 }
 0x11a   : > { %v1391_v36 = vadd.f32 %v1383_v30, %v1264_v3  ;;  %v996_v60 = vadd.f32 %v8298_v21, %v910_v29  ;;  %v754_v30 = vpop.permute.xlu2 %753 }
 0x11b   : > { %v892_v17 = vpop.permute.xlu0 %891 }
 0x11c   : > { %v8383_v20 = vadd.f32 %v1510_v50, %v1391_v36  ;;  %v905_v22 = vmul.f32 %v892_v17, %v845_v6  ;;  %v1139_v3 = vadd.f32 %v1131_v0, %v996_v60 }
 0x11d   : > { %v1191_v18 = vpop.f32.mrf.mxu2 }
 0x11e   : > { %10552 = vst [vmem:[#allocation13_spill] sm:$0xff] %v8383_v20  ;;  %v8389_v8 = vadd.f32 %v8371_v54, %v8383_v20  ;;  %v913_v57 = vadd.f32 %v905_v22, %v770_v32  ;;  %v1257_v24 = vmul.f32 %v8255_v45, %v1191_v18  ;;  %v1318_v33 = vpop.f32.mrf.mxu3  ;;  %v1447_v47 = vpop.f32.mrf.mxu0 }
 0x11f   : > { %v1384_v45 = vmul.f32 %v8280_v10, %v1318_v33  ;;  %v1069_v32 = vpop.f32.mrf.mxu1  ;;  %v1512_v56 = vmul.f32 %v8288_v25, %v1447_v47 }
 0x120   : > { %v10478_v4 = vmax.f32 %v8389_v8, 0.0  ;;  %v8395_v6 = vadd.f32 %v8327_v23, %v913_v57  ;;  %v1265_v1 = vadd.f32 %v1257_v24, %v1138_v2  ;;  %v601_v23 = vmul.f32 %v8292_v52, %v8239_v41  ;;  %v897_v57 = vpop.permute.xlu1 %896 }
 0x121   : > { %v1132_v41 = vmul.f32 %v8317_v48, %v1069_v32  ;;  %v10558_v32 = vld [vmem:[#allocation8_spill] sm:$0xff] }
 0x122   : > { %v1554_v13 = vpack.c.bf16 %v10478_v4, %v10477_v7  ;;  %v1392_v44 = vadd.f32 %v1384_v45, %v1265_v1  ;;  %v609_v50 = vadd.f32 %v601_v23, %v466_v27  ;;  %v1121_v18 = vpop.permute.xlu2 %1120 }
 0x123   : > { %v1140_v17 = vadd.f32 %v1132_v41, %v8321_v14  ;;  %v1126_v1 = vpop.permute.xlu0 %1125 }
 0x124   : > { %6978 = vmatmul.msk.bf16.vlgmr.msra.gmra.mxu1 %vm1565_vm3, %v1554_v13  ;;  %v8413_v34 = vadd.f32 %v1511_v26, %v1392_v44  ;;  %v769_v52 = vadd.f32 %v761_v12, %v609_v50  ;;  %v603_v13 = vmul.f32 %v8359_v42, %v8264_v39  ;;  %v468_v44 = vmul.f32 %v8350_v31, %v8262_v61  ;;  %v10559_v26 = vld [vmem:[#allocation9_spill] sm:$0xff]  ;;  %v10561_v50 = vld [vmem:[#allocation11_spill] sm:$0xff] }
 0x125   : > { %v1193_v21 = vpop.f32.mrf.mxu2 }
 0x126   : > { %v1258_v10 = vmul.f32 %v8282_v9, %v1193_v21  ;;  %v1320_v55 = vpop.f32.mrf.mxu3  ;;  %10553 = vst [vmem:[#allocation14_spill] sm:$0xff] %v8413_v34  ;;  %v1450_v16 = vpop.f32.mrf.mxu0  ;;  %v8424_v9 = vadd.f32 %v8371_v54, %v8413_v34  ;;  %v611_v12 = vadd.f32 %v603_v13, %v468_v44 }
 0x127   : > { %v1385_v36 = vmul.f32 %v8266_v53, %v1320_v55  ;;  %v912_v53 = vadd.f32 %v904_v5, %v769_v52  ;;  %v1071_v22 = vpop.f32.mrf.mxu1 }
 0x128   : > { %v1266_v62 = vadd.f32 %v1258_v10, %v1139_v3  ;;  %10555 = vst [vmem:[#allocation16_spill] sm:$0xff] %v8424_v9  ;;  %v10474_v28 = vmax.f32 %v8424_v9, 0.0  ;;  %v1133_v33 = vmul.f32 %v8315_v46, %v1071_v22 }
 0x129   : > { %v998_v29 = vadd.f32 %v8313_v49, %v912_v53  ;;  %v1513_v49 = vmul.f32 %v8340_v63, %v1450_v16  ;;  %v10560_v63 = vld [vmem:[#allocation10_spill] sm:$0xff] }
 0x12a   : > { %v1393_v11 = vadd.f32 %v1385_v36, %v1266_v62  ;;  %v1253_v42 = vpop.permute.xlu2 %1252  ;;  %v763_v55 = vmul.f32 %v754_v30, %v10560_v63  ;;  %v1248_v62 = vpop.permute.xlu1 %1247 }
 0x12b   : > { %v1141_v45 = vadd.f32 %v1133_v33, %v998_v29 }
 0x12c   : > { %v8420_v58 = vadd.f32 %v1512_v56, %v1393_v11  ;;  %v771_v41 = vadd.f32 %v763_v55, %v611_v12 }
 0x12d   : > { %v1196_v35 = vpop.f32.mrf.mxu2 }
 0x12e   : > { %10554 = vst [vmem:[#allocation15_spill] sm:$0xff] %v8420_v58  ;;  %v1259_v51 = vmul.f32 %v8333_v43, %v1196_v35  ;;  %v1323_v48 = vpop.f32.mrf.mxu3  ;;  %v8430_v25 = vadd.f32 %v8371_v54, %v8420_v58  ;;  %v1452_v24 = vpop.f32.mrf.mxu0 }
 0x12f   : > { %v1386_v14 = vmul.f32 %v8329_v38, %v1323_v48  ;;  %v1074_v27 = vpop.f32.mrf.mxu1  ;;  %v1514_v3 = vmul.f32 %v10559_v26, %v1452_v24  ;;  %v1375_v35 = vpop.permute.xlu0 %1374 }
 0x130   : > { %10556 = vst [vmem:[#allocation17_spill] sm:$0xff] %v8430_v25  ;;  %v1267_v2 = vadd.f32 %v1259_v51, %v1140_v17  ;;  %v10472_v59 = vmax.f32 %v8430_v25, 0.0  ;;  %v1134_v39 = vmul.f32 %v1121_v18, %v1074_v27  ;;  %v10565_v18 = vld [vmem:[#allocation7_spill] sm:$0xff] }
 0x132   : > { %v1555_v43 = vpack.c.bf16 %v10472_v59, %v10474_v28  ;;  %v1394_v47 = vadd.f32 %v1386_v14, %v1267_v2  ;;  %v1142_v52 = vadd.f32 %v1134_v39, %v8395_v6  ;;  %v1502_v14 = vpop.permute.xlu2 %1501  ;;  %v1380_v13 = vpop.permute.xlu1 %1379 }
 0x134   : > { %6979 = vmatmul.msk.bf16.gmra.mxu1 %vm1565_vm3, %v1555_v43  ;;  %v8448_v23 = vadd.f32 %v1513_v49, %v1394_v47 }
 0x135   : > { %v1198_v60 = vpop.f32.mrf.mxu2 }
 0x136   : > { %v1260_v38 = vmul.f32 %v8331_v15, %v1198_v60  ;;  %v1325_v0 = vpop.f32.mrf.mxu3  ;;  %10557 = vst [vmem:[#allocation18_spill] sm:$0xff] %v8448_v23  ;;  %v906_v15 = vmul.f32 %v897_v57, %v10561_v50  ;;  %v8458_v61 = vadd.f32 %v8371_v54, %v8448_v23  ;;  %v1455_v31 = vpop.f32.mrf.mxu0 }
 0x137   : > { %v1387_v21 = vmul.f32 %v10558_v32, %v1325_v0  ;;  %v1076_v30 = vpop.f32.mrf.mxu1  ;;  %v1515_v33 = vmul.f32 %v1502_v14, %v1455_v31  ;;  %v1507_v0 = vpop.permute.xlu0 %1506 }
 0x138   : > { %v1268_v46 = vadd.f32 %v1260_v38, %v1141_v45  ;;  %10563 = vst [vmem:[#allocation9_spill] sm:$0xff] %v8458_v61  ;;  %v914_v17 = vadd.f32 %v906_v15, %v771_v41  ;;  %v10473_v51 = vmax.f32 %v8458_v61, 0.0  ;;  %v1135_v22 = vmul.f32 %v1126_v1, %v1076_v30 }
 0x13a   : > { %v1395_v10 = vadd.f32 %v1387_v21, %v1268_v46  ;;  %v1000_v29 = vadd.f32 %v10565_v18, %v914_v17 }
 0x13c   : > { %v8454_v36 = vadd.f32 %v1514_v3, %v1395_v10  ;;  %v1143_v24 = vadd.f32 %v1135_v22, %v1000_v29  ;;  %v1558_v10 = vperm.slane %v8364_v40, 3 }
 0x13d   : > { %v1201_v16 = vpop.f32.mrf.mxu2 }
 0x13e   : > { %10562 = vst [vmem:[#allocation8_spill] sm:$0xff] %v8454_v36  ;;  %v1261_v56 = vmul.f32 %v1248_v62, %v1201_v16  ;;  %v1328_v11 = vpop.f32.mrf.mxu3  ;;  %v8463_v5 = vadd.f32 %v8371_v54, %v8454_v36  ;;  %v1457_v49 = vpop.f32.mrf.mxu0 }
 0x13f   : > { %v1388_v2 = vmul.f32 %v1375_v35, %v1328_v11  ;;  %v1516_v27 = vmul.f32 %v1507_v0, %v1457_v49 }
 0x140   : > { %10564 = vst [vmem:[#allocation10_spill] sm:$0xff] %v8463_v5  ;;  %v1269_v53 = vadd.f32 %v1261_v56, %v1142_v52  ;;  %v10471_v48 = vmax.f32 %v8463_v5, 0.0 }
 0x142   : > { %v1556_v6 = vpack.c.bf16 %v10471_v48, %v10473_v51  ;;  %v1396_v57 = vadd.f32 %v1388_v2, %v1269_v53 }
 0x144   : > { %6980 = vmatmul.msk.bf16.gmra.mxu1 %vm1565_vm3, %v1556_v6  ;;  %v8473_v1 = vadd.f32 %v1515_v33, %v1396_v57 }
 0x145   : > { %v1203_v43 = vpop.f32.mrf.mxu2 }
 0x146   : > { %v1262_v47 = vmul.f32 %v1253_v42, %v1203_v43  ;;  %v1330_v60 = vpop.f32.mrf.mxu3  ;;  %10566 = vst [vmem:[#allocation11_spill] sm:$0xff] %v8473_v1  ;;  %v8479_v32 = vadd.f32 %v8371_v54, %v8473_v1 }
 0x147   : > { %v1389_v38 = vmul.f32 %v1380_v13, %v1330_v60 }
 0x148   : > { %v1270_v45 = vadd.f32 %v1262_v47, %v1143_v24  ;;  %10568 = vst [vmem:[#allocation19_spill] sm:$0xff] %v8479_v32  ;;  %v10476_v12 = vmax.f32 %v8479_v32, 0.0 }
 0x14a   : > { %v1397_v44 = vadd.f32 %v1389_v38, %v1270_v45 }
 0x14c   : > { %v8475_v46 = vadd.f32 %v1516_v27, %v1397_v44 }
 0x14e   : > { %10567 = vst [vmem:[#allocation7_spill] sm:$0xff] %v8475_v46  ;;  %v8483_v21 = vadd.f32 %v8371_v54, %v8475_v46 }
 0x150   : > { %10569 = vst [vmem:[#allocation20_spill] sm:$0xff] %v8483_v21  ;;  %v10475_v26 = vmax.f32 %v8483_v21, 0.0 }
 0x152   : > { %v1557_v3 = vpack.c.bf16 %v10475_v26, %v10476_v12 }
 0x154   : > { %6981 = vmatmul.msk.bf16.gmra.mxu1 %vm1565_vm3, %v1557_v3 }
 0x1a1   : > { %v1587_v39 = vpop.f32.mrf.mxu1 }
 0x1a2   : > { %v1588_v42 = vadd.f32 %v1587_v39, %v1558_v10 }
 0x1a4   : > { %v8493_v63 = vpack.c.bf16 %v1588_v42, %v1588_v42 }
 0x1a6   : > { %1623 = vrot.lane.b32.xlu1 %v8493_v63, %s7565_s19  ;;  %v2699_v54 = vunpack.c.l.b16 %v8493_v63 }
 0x1a8   : > { %v2700_v55 = vpack.c.b16 %v2699_v54, %v2699_v54 }
 0x1a9   : > { %v1589_v50 = vpop.f32.mrf.mxu1 }
 0x1aa   : > { %v1590_v15 = vadd.f32 %v1589_v50, %v1558_v10  ;;  %3067 = vrot.lane.b32.xlu0 %v2700_v55, %s7566_s20 }
 0x1ac   : > { %v8499_v62 = vpack.c.bf16 %v1590_v15, %v1590_v15 }
 0x1ae   : > { %1625 = vrot.lane.b32.xlu2 %v8499_v62, %s7565_s19  ;;  %2701 = vrot.lane.b32.xlu1 %v2700_v55, %s7565_s19  ;;  %v2722_v40 = vunpack.c.l.b16 %v8499_v62 }
 0x1b0   : > { %v2723_v52 = vpack.c.b16 %v2722_v40, %v2722_v40 }
 0x1b1   : > { %v1592_v31 = vpop.f32.mrf.mxu1 }
 0x1b2   : > { %v1593_v16 = vadd.f32 %v1592_v31, %v1558_v10 }
 0x1b4   : > { %v8505_v41 = vpack.c.bf16 %v1593_v16, %v1593_v16 }
 0x1b6   : > { %2724 = vrot.lane.b32.xlu1 %v2723_v52, %s7565_s19  ;;  %1627 = vrot.lane.b32.xlu2 %v8505_v41, %s7565_s19  ;;  %v2745_v56 = vunpack.c.l.b16 %v8505_v41 }
 0x1b8   : > { %v2746_v17 = vpack.c.b16 %v2745_v56, %v2745_v56 }
 0x1b9   : > { %v1594_v11 = vpop.f32.mrf.mxu1 }
 0x1ba   : > { %v1595_v30 = vadd.f32 %v1594_v11, %v1558_v10 }
 0x1bc   : > { %v8511_v35 = vpack.c.bf16 %v1595_v30, %v1595_v30 }
 0x1be   : > { %3069 = vrot.lane.b32.xlu1 %v2723_v52, %s7566_s20  ;;  %2747 = vrot.lane.b32.xlu2 %v2746_v17, %s7565_s19  ;;  %v2768_v53 = vunpack.c.l.b16 %v8511_v35 }
 0x1c0   : > { %v2769_v22 = vpack.c.b16 %v2768_v53, %v2768_v53 }
 0x1c1   : > { %v1597_v2 = vpop.f32.mrf.mxu1 }
 0x1c2   : > { %v1598_v6 = vadd.f32 %v1597_v2, %v1558_v10  ;;  %2770 = vrot.lane.b32.xlu0 %v2769_v22, %s7565_s19 }
 0x1c4   : > { %v1611_v18 = vpack.c.bf16 %v1598_v6, %v1598_v6 }
 0x1c6   : > { %1629 = vrot.lane.b32.xlu1 %v8511_v35, %s7565_s19  ;;  %v2791_v29 = vunpack.c.l.b16 %v1611_v18 }
 0x1c8   : > { %v2792_v57 = vpack.c.b16 %v2791_v29, %v2791_v29 }
 0x1c9   : > { %v1599_v14 = vpop.f32.mrf.mxu1 }
 0x1ca   : > { %v1600_v43 = vadd.f32 %v1599_v14, %v1558_v10  ;;  %2793 = vrot.lane.b32.xlu2 %v2792_v57, %s7565_s19 }
 0x1cc   : > { %v1612_v24 = vpack.c.bf16 %v1600_v43, %v1600_v43 }
 0x1ce   : > { %1631 = vrot.lane.b32.xlu1 %v1611_v18, %s7565_s19  ;;  %1633 = vrot.lane.b32.xlu0 %v1612_v24, %s7565_s19  ;;  %v2814_v33 = vunpack.c.l.b16 %v1612_v24 }
 0x1d0   : > { %v2815_v47 = vpack.c.b16 %v2814_v33, %v2814_v33 }
 0x1d1   : > { %v1602_v60 = vpop.f32.mrf.mxu1 }
 0x1d2   : > { %v1603_v13 = vadd.f32 %v1602_v60, %v1558_v10  ;;  %3077 = vrot.lane.b32.xlu2 %v2815_v47, %s7566_s20 }
 0x1d4   : > { %v8523_v49 = vpack.c.bf16 %v1603_v13, %v1603_v13 }
 0x1d6   : > { %3075 = vrot.lane.b32.xlu1 %v2792_v57, %s7566_s20  ;;  %2816 = vrot.lane.b32.xlu0 %v2815_v47, %s7565_s19  ;;  %v2837_v45 = vunpack.c.l.b16 %v8523_v49 }
 0x1d8   : > { %v2838_v38 = vpack.c.b16 %v2837_v45, %v2837_v45 }
 0x1d9   : > { %v1604_v0 = vpop.f32.mrf.mxu1 }
 0x1da   : > { %v1605_v27 = vadd.f32 %v1604_v0, %v1558_v10  ;;  %2839 = vrot.lane.b32.xlu2 %v2838_v38, %s7565_s19 }
 0x1dc   : > { %v8529_v44 = vpack.c.bf16 %v1605_v27, %v1605_v27 }
 0x1de   : > { %1637 = vrot.lane.b32.xlu1 %v8529_v44, %s7565_s19  ;;  %1635 = vrot.lane.b32.xlu0 %v8523_v49, %s7565_s19  ;;  %v2860_v3 = vunpack.c.l.b16 %v8529_v44 }
 0x1e0   : > { %v2861_v39 = vpack.c.b16 %v2860_v3, %v2860_v3 }
 0x1e2   : > { %3079 = vrot.lane.b32.xlu2 %v2838_v38, %s7566_s20 }
 0x1e6   : > { %2862 = vrot.lane.b32.xlu1 %v2861_v39, %s7565_s19  ;;  %3081 = vrot.lane.b32.xlu0 %v2861_v39, %s7566_s20  ;;  %s297_s19 = sand.u32 1, %s7554_s30  }
 0x1e7   : > { %s6671_s24 = sshll.u32 %s297_s19, 6  ;;  %s6590_s28 = scalar_lea.sflag [#allocation4], %s297_s19 }
 0x1e8   : > { %s299_s21 = scalar_lea.vmem [#allocation3], %s6671_s24 }
 0x1e9   : > { %s6602_s26 = sshll.u32 %s299_s21, 4  ;;  %s6603_s26 = int_to_ptr.vmem [resolvable:$true] %s6602_s26 }
 0x1ea   : > { %3073 = vrot.lane.b32.xlu2 %v2769_v22, %s7566_s20 }
 0x1ee   : > { %3071 = vrot.lane.b32.xlu1 %v2746_v17, %s7566_s20 }
 0x208   : > { %v8541_v10 = vpop.permute.xlu2 %1625  ;;  %7367 = vxpose.binary.xlu0.c.b16.start.end [1/2] (short) (narrow) %v8529_v44, %v8523_v49, 16 }
 0x210   : > { %7373 = vxpose.binary.xlu2.c.b16.start.end [1/2] (short) (narrow) %v8499_v62, %v8493_v63, 16  ;;  %v8547_v42 = vpop.permute.xlu2 %1627 }
 0x218   : > { %v8549_v54 = vpop.permute.xlu1 %1623  ;;  %v8551_v55 = vpop.permute.xlu2 %2747 }
 0x21c   : > { %v8560_v56 = vpop.permute.xlu0 %3067 }
 0x220   : > { %v2702_v50 = vpop.permute.xlu1 %2701  ;;  %7376 = vxpose.binary.xlu2.c.b16.start.end [1/2] (short) (narrow) %v8511_v35, %v8505_v41, 16 }
 0x221   : > { %v2707_v15 = vsel %vm2152_vm4, %v2702_v50, 0 }
 0x222   : > { %2716 = vmatpush.bf16.xpose.msrb.mxu0 %v2707_v15 }
 0x223   : > { %7370 = vxpose.binary.xlu1.c.b16.start.end [1/2] (short) (narrow) %v1612_v24, %v1611_v18, 16 }
 0x224   : > { %v2794_v40 = vpop.permute.xlu2 %2793 }
 0x225   : > { %v2799_v31 = vsel %vm2152_vm4, %v2794_v40, 0  ;;  %v7567_v40 = vmov 1983009808  }
 0x228   : > { %v2725_v16 = vpop.permute.xlu1 %2724 }
 0x229   : > { %v2730_v52 = vsel %vm2152_vm4, %v2725_v16, 0  ;;  %6990 = vmatmul.msk.bf16.vlgmr.msrb.gmra.mxu0 %vm2152_vm4, %v8493_v63 }
 0x22a   : > { %2808 = vmatpush.bf16.xpose.msra.mxu0 %v2799_v31  ;;  %2739 = vmatpush.bf16.xpose.msrb.mxu1 %v2730_v52  ;;  %v1651_v31 = vunpack.c.l.s4 %v7567_v40 }
 0x22c   : > { %v8571_v22 = vpop.permute.xlu2 %3077 }
 0x230   : > { %v8573_v63 = vpop.permute.xlu1 %3069 }
 0x231   : > { %6991 = vmatmul.msk.bf16.vlgmr.msrb.gmra.mxu1 %vm2152_vm4, %v8499_v62 }
 0x234   : > { %v8564_v11 = vpop.permute.xlu0 %2770  ;;  %v8575_v2 = vpop.permute.xlu2 %2839 }
 0x238   : > { %v8577_v6 = vpop.permute.xlu1 %1629 }
 0x239   : > { %6994 = vmatmul.msk.bf16.vlgmr.msra.gmra.mxu0 %vm2152_vm4, %v1611_v18 }
 0x23c   : > { %v8579_v62 = vpop.permute.xlu2 %3079 }
 0x240   : > { %v8567_v30 = vpop.permute.xlu0 %1633  ;;  %v8581_v29 = vpop.permute.xlu1 %1631 }
 0x244   : > { %v8585_v57 = vpop.permute.xlu2 %3073 }
 0x248   : > { %v2817_v17 = vpop.permute.xlu0 %2816  ;;  %v8587_v14 = vpop.permute.xlu1 %3075 }
 0x249   : > { %v2822_v53 = vsel %vm2152_vm4, %v2817_v17, 0  ;;  %v8604_v17 = vunpack.c.0.s8 %v1651_v31 }
 0x24a   : > { %2831 = vmatpush.bf16.xpose.msra.mxu1 %v2822_v53 }
 0x250   : > { %v8591_v33 = vpop.permute.xlu0 %1635  ;;  %v8593_v60 = vpop.permute.xlu1 %1637 }
 0x251   : > { %6995 = vmatmul.msk.bf16.vlgmr.msra.gmra.mxu1 %vm2152_vm4, %v1612_v24 }
 0x258   : > { %v8597_v38 = vpop.permute.xlu0 %3081  ;;  %v8599_v27 = vpop.permute.xlu1 %2862 }
 0x260   : > { %v8601_v16 = vpop.permute.xlu1 %3071 }
 0x2a6   : > { %v8583_v18 = vpop.f32.mrf.mxu0 }
 0x2ae   : > { %v2720_v43 = vpop.f32.mrf.mxu0  ;;  %v8589_v24 = vpop.f32.mrf.mxu1 }
 0x2b1   : > { %v7374_v47 = vpop.trf.xlu2 }
 0x2b4   : > { %v7368_v39 = vpop.trf.xlu0 }
 0x2b5   : > { %v1862_v15 = vrot.slane %v7368_v39, 4  ;;  %v7568_v39 = vmov 1934713408  }
 0x2b6   : > { %v2743_v13 = vpop.f32.mrf.mxu1  ;;  %v8595_v45 = vpop.f32.mrf.mxu0  ;;  %v1665_v26 = vunpack.c.l.s4 %v7568_v39 }
 0x2b9   : > { %v7375_v0 = vpop.trf.xlu2 }
 0x2bc   : > { %v7369_v53 = vpop.trf.xlu0 }
 0x2bd   : > { %v1890_v48 = vrot.slane %v7369_v53, 4 }
 0x2be   : > { %v2812_v3 = vpop.f32.mrf.mxu0 }
 0x2c1   : > { %v7377_v50 = vpop.trf.xlu2 }
 0x2c2   : > { %v1863_v52 = vsel %vm1648_vm5, %v1862_v15, %v7377_v50 }
 0x2c3   : > { %v1867_v43 = vperm.slane %v1863_v52, %v8604_v17  ;;  %v8614_v52 = vunpack.c.0.s8 %v1665_v26 }
 0x2c5   : > { %v1868_v28 = vrot.slane %v1867_v43, 4 }
 0x2c9   : > { %v7378_v3 = vpop.trf.xlu2 }
 0x2ca   : > { %v1891_v12 = vsel %vm1648_vm5, %v1890_v48, %v7378_v3 }
 0x2cb   : > { %v1895_v31 = vperm.slane %v1891_v12, %v8604_v17 }
 0x2cd   : > { %v1896_v1 = vrot.slane %v1895_v31, 4 }
 0x2ce   : > { %v8607_v13 = vpop.f32.mrf.mxu1 }
 0x2cf   : > { %v7371_v59 = vpop.trf.xlu1 }
 0x2d0   : > { %v1856_v51 = vrot.slane %v7371_v59, 4 }
 0x2d2   : > { %v1857_v40 = vsel %vm1648_vm5, %v1856_v51, %v7374_v47 }
 0x2d3   : > { %v1861_v50 = vperm.slane %v1857_v40, %v8604_v17 }
 0x2d5   : > { %v1869_v15 = vsel %vm1648_vm5, %v1868_v28, %v1861_v50  ;;  %v1870_v7 = vrot.slane %v1861_v50, 4 }
 0x2d6   : > { %v2835_v53 = vpop.f32.mrf.mxu1  ;;  %v1875_v59 = vperm.slane %v1869_v15, %v8614_v52 }
 0x2d7   : > { %v7372_v4 = vpop.trf.xlu1  ;;  %v1871_v39 = vsel %vm1648_vm5, %v1867_v43, %v1870_v7 }
 0x2d8   : > { %v1884_v46 = vrot.slane %v7372_v4, 4  ;;  %v1880_v47 = vrot.slane %v1875_v59, 4  ;;  %v1879_v28 = vperm.slane %v1871_v39, %v8614_v52  ;;  %v1916_v50 = vshrl.u32 %v1875_v59, 16 }
 0x2da   : > { %v1885_v51 = vsel %vm1648_vm5, %v1884_v46, %v7375_v0  ;;  %v1881_v7 = vsel %vm1648_vm5, 0, %v1880_v47  ;;  %v1932_v46 = vshrl.u32 %v1879_v28, 16 }
 0x2db   : > { %v1889_v48 = vperm.slane %v1885_v51, %v8604_v17  ;;  %v1924_v23 = vshrl.u32 %v1881_v7, 16 }
 0x2dd   : > { %v1898_v3 = vrot.slane %v1889_v48, 4  ;;  %v1897_v12 = vsel %vm1648_vm5, %v1896_v1, %v1889_v48 }
 0x2de   : > { %v1903_v26 = vperm.slane %v1897_v12, %v8614_v52 }
 0x2df   : > { %v1899_v40 = vsel %vm1648_vm5, %v1895_v31, %v1898_v3 }
 0x2e0   : > { %v1907_v4 = vperm.slane %v1899_v40, %v8614_v52  ;;  %v1917_v15 = vshrl.u32 %v1903_v26, 16  ;;  %v1908_v43 = vrot.slane %v1903_v26, 4  ;;  %v1914_v0 = vpack.i.b16 %v1903_v26, %v1875_v59 }
 0x2e1   : > { %v1882_v40 = vrot.slane %v1879_v28, 4 }
 0x2e2   : > { %v1918_v53 = vpack.i.b16 %v1917_v15, %v1916_v50  ;;  %v1933_v51 = vshrl.u32 %v1907_v4, 16  ;;  %v1909_v39 = vsel %vm1648_vm5, 0, %v1908_v43  ;;  %v1930_v1 = vpack.i.b16 %v1907_v4, %v1879_v28 }
 0x2e3   : > { %v1925_v36 = vshrl.u32 %v1909_v39, 16  ;;  %v1922_v12 = vpack.i.b16 %v1909_v39, %v1881_v7  ;;  %v1910_v3 = vrot.slane %v1907_v4, 4  ;;  %v1883_v58 = vsel %vm1648_vm5, 0, %v1882_v40 }
 0x2e4   : > { %7382 = vxpose.binary.xlu0.c.b16.start.end [1/2] (short) (narrow) %v1918_v53, %v1914_v0, 16  ;;  %v1934_v48 = vpack.i.b16 %v1933_v51, %v1932_v46  ;;  %v1940_v26 = vshrl.u32 %v1883_v58, 16  ;;  %v2919_v28 = vsel %vm2152_vm4, %v8595_v45, -inf  ;;  %v1682_v46 = vrot.slane %v8593_v60, 4 }
 0x2e5   : > { %v1926_v31 = vpack.i.b16 %v1925_v36, %v1924_v23  ;;  %v1911_v47 = vsel %vm1648_vm5, 0, %v1910_v3  ;;  %v2907_v23 = vsel %vm2152_vm4, %v8583_v18, -inf  ;;  %v2910_v36 = vsel %vm2152_vm4, %v8589_v24, -inf }
 0x2e6   : > { %7379 = vxpose.binary.xlu2.c.b16.start.end [1/2] (short) (narrow) %v1934_v48, %v1930_v1, 16  ;;  %v1941_v59 = vshrl.u32 %v1911_v47, 16  ;;  %v1938_v50 = vpack.i.b16 %v1911_v47, %v1883_v58  ;;  %v2922_v58 = vsel %vm2152_vm4, %v8607_v13, -inf  ;;  %v1654_v0 = vrot.slane %v8591_v33, 4 }
 0x2e7   : > { %7391 = vxpose.binary.xlu1.c.b16.start.end [1/2] (short) (narrow) %v1926_v31, %v1922_v12, 16  ;;  %v1683_v31 = vsel %vm1648_vm5, %v1682_v46, %v8577_v6  ;;  %v1647_v60 = vrot.slane %v8581_v29, 4  ;;  %v1676_v33 = vrot.slane %v8567_v30, 4 }
 0x2e8   : > { %v1942_v15 = vpack.i.b16 %v1941_v59, %v1940_v26  ;;  %v1655_v3 = vsel %vm1648_vm5, %v1654_v0, %v8547_v42  ;;  %v8657_v26 = vperm.slane %v1683_v31, %v8604_v17 }
 0x2e9   : > { %v1677_v29 = vsel %vm1648_vm5, %v1676_v33, %v8541_v10 }
 0x2ea   : > { %v8676_v0 = vperm.slane %v1677_v29, %v8604_v17 }
 0x2f4   : > { %7385 = vxpose.binary.xlu0.c.b16.start.end [1/2] (short) (narrow) %v1942_v15, %v1938_v50, 16  ;;  %v8660_v50 = vperm.slane %v1655_v3, %v8604_v17 }
 0x2f6   : > { %7394 = vxpose.binary.xlu2.c.b16.start.end [1/2] (short) (narrow) %v8585_v57, %v8601_v16, 16 }
 0x2f7   : > { %7400 = vxpose.binary.xlu1.c.b16.start.end [1/2] (short) (narrow) %v8597_v38, %v8579_v62, 16 }
 0x304   : > { %7388 = vxpose.binary.xlu0.c.b16.start.end [1/2] (short) (narrow) %v8573_v63, %v8560_v56, 16 }
 0x314   : > { %7397 = vxpose.binary.xlu0.c.b16.start.end [1/2] (short) (narrow) %v8571_v22, %v8587_v14, 16 }
 0x357   : > { %2908 = vmax.xlane.f32.xlu1 %v2907_v23  ;;  %v1649_v23 = vsel %vm1648_vm5, %v1647_v60, %v8549_v54 }
 0x358   : > { %v8673_v46 = vperm.slane %v1649_v23, %v8604_v17 }
 0x35f   : > { %2923 = vmax.xlane.f32.xlu1 %v2922_v58 }
 0x367   : > { %2911 = vmax.xlane.f32.xlu2 %v2910_v36 }
 0x385   : > { %2920 = vmax.xlane.f32.xlu0 %v2919_v28 }
 0x387   : > { %v7380_v7 = vpop.trf.xlu2 }
 0x388   : > { %v2072_v39 = vrot.slane %v7380_v7, 4  ;;  %v1660_v7 = vrot.slane %v8660_v50, 4 }
 0x38f   : > { %v7381_v53 = vpop.trf.xlu2 }
 0x390   : > { %v7383_v4 = vpop.trf.xlu0  ;;  %v2100_v48 = vrot.slane %v7381_v53, 4 }
 0x391   : > { %v2073_v40 = vsel %vm1648_vm5, %v2072_v39, %v7383_v4  ;;  %v1688_v4 = vrot.slane %v8657_v26, 4 }
 0x392   : > { %v2077_v42 = vperm.slane %v2073_v40, %v8604_v17 }
 0x393   : > { %v7392_v51 = vpop.trf.xlu1 }
 0x394   : > { %v2086_v53 = vrot.slane %v2077_v42, 4 }
 0x398   : > { %v7384_v43 = vpop.trf.xlu0 }
 0x399   : > { %v2101_v6 = vsel %vm1648_vm5, %v2100_v48, %v7384_v43  ;;  %v1661_v48 = vsel %vm1648_vm5, %v1660_v7, %v8673_v46 }
 0x39a   : > { %v2105_v30 = vperm.slane %v2101_v6, %v8604_v17  ;;  %v1667_v60 = vperm.slane %v1661_v48, %v8614_v52 }
 0x39b   : > { %v7393_v28 = vpop.trf.xlu1 }
 0x3a0   : > { %v7386_v1 = vpop.trf.xlu0 }
 0x3a1   : > { %v2078_v12 = vrot.slane %v7386_v1, 4  ;;  %v1689_v1 = vsel %vm1648_vm5, %v1688_v4, %v8676_v0 }
 0x3a3   : > { %v2079_v47 = vsel %vm1648_vm5, %v2078_v12, %v7392_v51  ;;  %v2114_v51 = vrot.slane %v2105_v30, 4 }
 0x3a4   : > { %v2083_v59 = vperm.slane %v2079_v47, %v8604_v17  ;;  %v1695_v47 = vperm.slane %v1689_v1, %v8614_v52 }
 0x3a6   : > { %v2084_v15 = vrot.slane %v2083_v59, 4  ;;  %v2087_v12 = vsel %vm1648_vm5, %v2083_v59, %v2086_v53  ;;  %v1708_v4 = vshrl.u32 %v1695_v47, 16 }
 0x3a8   : > { %v2085_v58 = vsel %vm1648_vm5, %v2084_v15, %v2077_v42  ;;  %v7387_v36 = vpop.trf.xlu0  ;;  %v2095_v42 = vperm.slane %v2087_v12, %v8614_v52  ;;  %v1706_v12 = vpack.i.b16 %v1695_v47, %v1667_v60 }
 0x3a9   : > { %v2106_v43 = vrot.slane %v7387_v36, 4  ;;  %v2091_v10 = vperm.slane %v2085_v58, %v8614_v52 }
 0x3aa   : > { %v2143_v53 = vshrl.u32 %v2095_v42, 16 }
 0x3ab   : > { %v2107_v54 = vsel %vm1648_vm5, %v2106_v43, %v7393_v28  ;;  %v2096_v40 = vrot.slane %v2091_v10, 4  ;;  %v2131_v23 = vshrl.u32 %v2091_v10, 16  ;;  %v1707_v28 = vshrl.u32 %v1667_v60, 16 }
 0x3ac   : > { %v2111_v39 = vperm.slane %v2107_v54, %v8604_v17 }
 0x3ad   : > { %v2097_v59 = vsel %vm1648_vm5, 0, %v2096_v40 }
 0x3ae   : > { %v2112_v31 = vrot.slane %v2111_v39, 4  ;;  %v2115_v3 = vsel %vm1648_vm5, %v2111_v39, %v2114_v51  ;;  %v2137_v1 = vshrl.u32 %v2097_v59, 16 }
 0x3af   : > { %v2123_v6 = vperm.slane %v2115_v3, %v8614_v52 }
 0x3b0   : > { %v2113_v33 = vsel %vm1648_vm5, %v2112_v31, %v2105_v30 }
 0x3b1   : > { %v2119_v15 = vperm.slane %v2113_v33, %v8614_v52  ;;  %v2144_v7 = vshrl.u32 %v2123_v6, 16  ;;  %v2142_v39 = vpack.i.b16 %v2123_v6, %v2095_v42  ;;  %v1709_v33 = vpack.i.b16 %v1708_v4, %v1707_v28 }
 0x3b3   : > { %v2130_v29 = vpack.i.b16 %v2119_v15, %v2091_v10  ;;  %v2132_v58 = vshrl.u32 %v2119_v15, 16  ;;  %v2124_v36 = vrot.slane %v2119_v15, 4  ;;  %v2145_v40 = vpack.i.b16 %v2144_v7, %v2143_v53 }
 0x3b4   : > { %v2234_v15 = vsel %vm2156_vm6, %v2142_v39, 0 }
 0x3b5   : > { %v2158_v43 = vsel %vm2156_vm6, %v2130_v29, 0  ;;  %v2133_v54 = vpack.i.b16 %v2132_v58, %v2131_v23  ;;  %v2125_v30 = vsel %vm1648_vm5, 0, %v2124_v36  ;;  %v2253_v29 = vsel %vm2156_vm6, %v2145_v40, 0 }
 0x3b6   : > { %2167 = vmatpush.bf16.msrb.mxu2 %v2158_v43  ;;  %v2136_v51 = vpack.i.b16 %v2125_v30, %v2097_v59  ;;  %v2138_v48 = vshrl.u32 %v2125_v30, 16  ;;  %v2126_v58 = vrot.slane %v2123_v6, 4  ;;  %v1672_v59 = vrot.slane %v1667_v60, 4 }
 0x3b7   : > { %v2177_v10 = vsel %vm2156_vm6, %v2133_v54, 0  ;;  %v1700_v36 = vrot.slane %v1695_v47, 4  ;;  %v2098_v43 = vrot.slane %v2095_v42, 4  ;;  %v1662_v42 = vrot.slane %v8673_v46, 4 }
 0x3b8   : > { %2186 = vmatpush.bf16.msrb.mxu3 %v2177_v10  ;;  %v2196_v31 = vsel %vm2156_vm6, %v2136_v51, 0  ;;  %v2139_v3 = vpack.i.b16 %v2138_v48, %v2137_v1  ;;  %v2127_v7 = vsel %vm1648_vm5, 0, %v2126_v58  ;;  %v1673_v28 = vsel %vm1648_vm5, 0, %v1672_v59 }
 0x3b9   : > { %6982 = vmatmul.msk.bf16.vlgmr.msrb.gmra.mxu2 %vm2152_vm4, %v1706_v12  ;;  %v1701_v4 = vsel %vm1648_vm5, 0, %v1700_v36  ;;  %v2099_v54 = vsel %vm1648_vm5, 0, %v2098_v43  ;;  %v2150_v30 = vshrl.u32 %v2127_v7, 16  ;;  %v1713_v51 = vshrl.u32 %v1673_v28, 16 }
 0x3ba   : > { %2205 = vmatpush.bf16.msra.mxu2 %v2196_v31  ;;  %v2215_v23 = vsel %vm2156_vm6, %v2139_v3, 0  ;;  %v2148_v53 = vpack.i.b16 %v2127_v7, %v2099_v54  ;;  %v1714_v39 = vshrl.u32 %v1701_v4, 16  ;;  %v2149_v1 = vshrl.u32 %v2099_v54, 16 }
 0x3bb   : > { %6983 = vmatmul.msk.bf16.vlgmr.msrb.gmra.mxu3 %vm2152_vm4, %v1709_v33  ;;  %v1712_v48 = vpack.i.b16 %v1701_v4, %v1673_v28  ;;  %v1690_v12 = vrot.slane %v8676_v0, 4  ;;  %v1663_v3 = vsel %vm1648_vm5, %v8660_v50, %v1662_v42  ;;  %v2753_v58 = vsel %vm2152_vm4, %v8551_v55, 0 }
 0x3bc   : > { %2224 = vmatpush.bf16.msra.mxu3 %v2215_v23  ;;  %v2151_v10 = vpack.i.b16 %v2150_v30, %v2149_v1  ;;  %v2272_v47 = vsel %vm2156_vm6, %v2148_v53, 0  ;;  %v1715_v60 = vpack.i.b16 %v1714_v39, %v1713_v51  ;;  %v1671_v33 = vperm.slane %v1663_v3, %v8614_v52 }
 0x3bd   : > { %v1691_v31 = vsel %vm1648_vm5, %v8657_v26, %v1690_v12  ;;  %v2776_v26 = vsel %vm2152_vm4, %v8564_v11, 0  ;;  %v2845_v55 = vsel %vm2152_vm4, %v8575_v2, 0  ;;  %v2868_v11 = vsel %vm2152_vm4, %v8599_v27, 0 }
 0x3be   : > { %2243 = vmatpush.bf16.msrb.mxu2 %v2234_v15  ;;  %v2291_v6 = vsel %vm2156_vm6, %v2151_v10, 0  ;;  %v1699_v40 = vperm.slane %v1691_v31, %v8614_v52  ;;  %v1719_v23 = vshrl.u32 %v1671_v33, 16  ;;  %v1674_v0 = vrot.slane %v1671_v33, 4 }
 0x3c0   : > { %2262 = vmatpush.bf16.msrb.mxu3 %v2253_v29  ;;  %v1720_v15 = vshrl.u32 %v1699_v40, 16  ;;  %v1718_v29 = vpack.i.b16 %v1699_v40, %v1671_v33  ;;  %v1702_v50 = vrot.slane %v1699_v40, 4  ;;  %v1675_v59 = vsel %vm1648_vm5, 0, %v1674_v0 }
 0x3c1   : > { %v1725_v43 = vshrl.u32 %v1675_v59, 16 }
 0x3c2   : > { %v1721_v46 = vpack.i.b16 %v1720_v15, %v1719_v23  ;;  %v1703_v36 = vsel %vm1648_vm5, 0, %v1702_v50  ;;  %v8759_v50 = vpop.trf.xlu1 }
 0x3c3   : > { %v1726_v7 = vshrl.u32 %v1703_v36, 16  ;;  %v1724_v28 = vpack.i.b16 %v1703_v36, %v1675_v59  ;;  %v8763_v59 = vpop.trf.xlu2 }
 0x3c5   : > { %v1727_v4 = vpack.i.b16 %v1726_v7, %v1725_v43 }
 0x3c9   : > { %6984 = vmatmul.msk.bf16.vlgmr.msra.gmra.mxu2 %vm2152_vm4, %v1712_v48 }
 0x3ca   : > { %2281 = vmatpush.bf16.msra.mxu2 %v2272_v47  ;;  %v8767_v43 = vpop.trf.xlu1 }
 0x3cb   : > { %6985 = vmatmul.msk.bf16.vlgmr.msra.gmra.mxu3 %vm2152_vm4, %v1715_v60 }
 0x3cc   : > { %2300 = vmatpush.bf16.msra.mxu3 %v2291_v6 }
 0x3d9   : > { %6986 = vmatmul.msk.bf16.vlgmr.msrb.gmra.mxu2 %vm2152_vm4, %v1718_v29 }
 0x3da   : > { %2762 = vmatpush.bf16.xpose.msrb.mxu2 %v2753_v58  ;;  %v8753_v58 = vpop.trf.xlu0 }
 0x3db   : > { %6987 = vmatmul.msk.bf16.vlgmr.msrb.gmra.mxu3 %vm2152_vm4, %v1721_v46 }
 0x3dc   : > { %2785 = vmatpush.bf16.xpose.msrb.mxu3 %v2776_v26 }
 0x3e2   : > { %v8757_v26 = vpop.trf.xlu0 }
 0x3e9   : > { %6988 = vmatmul.msk.bf16.vlgmr.msra.gmra.mxu2 %vm2152_vm4, %v1724_v28  ;;  %v8771_v28 = vpop.trf.xlu2 }
 0x3ea   : > { %2854 = vmatpush.bf16.xpose.msra.mxu2 %v2845_v55  ;;  %v8761_v0 = vpop.trf.xlu0  ;;  %v8773_v55 = vpop.xlane.xlu1 %2908 }
 0x3eb   : > { %6989 = vmatmul.msk.bf16.vlgmr.msra.gmra.mxu3 %vm2152_vm4, %v1727_v4 }
 0x3ec   : > { %2877 = vmatpush.bf16.xpose.msra.mxu3 %v2868_v11 }
 0x3f1   : > { %v8777_v11 = vpop.xlane.xlu2 %2911 }
 0x3f2   : > { %v8769_v7 = vpop.trf.xlu0 }
 0x3f9   : > { %6992 = vmatmul.msk.bf16.vlgmr.msrb.gmra.mxu2 %vm2152_vm4, %v8505_v41 }
 0x3fa   : > { %v8775_v4 = vpop.xlane.xlu0 %2920 }
 0x3fb   : > { %6993 = vmatmul.msk.bf16.vlgmr.msrb.gmra.mxu3 %vm2152_vm4, %v8511_v35 }
 0x409   : > { %6996 = vmatmul.msk.bf16.vlgmr.msra.gmra.mxu2 %vm2152_vm4, %v8523_v49 }
 0x40b   : > { %6997 = vmatmul.msk.bf16.vlgmr.msra.gmra.mxu3 %vm2152_vm4, %v8529_v44 }
 0x43c   : > { %v2169_v2 = vpop.f32.mrf.mxu2 }
 0x43d   : > { %2306 = vxpose.xlu0.b32.start.end [1/1] (short) (narrow) %v2169_v2, 8  ;;  %v8779_v2 = vpop.xlane.xlu1 %2923 }
 0x43e   : > { %v2188_v54 = vpop.f32.mrf.mxu3 }
 0x43f   : > { %2338 = vxpose.xlu1.b32.start.end [1/1] (short) (narrow) %v2188_v54, 8 }
 0x444   : > { %v2171_v27 = vpop.f32.mrf.mxu2 }
 0x446   : > { %v2190_v30 = vpop.f32.mrf.mxu3 }
 0x44c   : > { %v2207_v53 = vpop.f32.mrf.mxu2 }
 0x44d   : > { %2370 = vxpose.xlu2.b32.start.end [1/1] (short) (narrow) %v2207_v53, 8 }
 0x44e   : > { %v2226_v51 = vpop.f32.mrf.mxu3 }
 0x44f   : > { %2402 = vxpose.xlu0.b32.start.end [1/1] (short) (narrow) %v2226_v51, 8 }
 0x454   : > { %v2209_v41 = vpop.f32.mrf.mxu2 }
 0x456   : > { %v2228_v39 = vpop.f32.mrf.mxu3 }
 0x45c   : > { %v2245_v1 = vpop.f32.mrf.mxu2 }
 0x45d   : > { %2434 = vxpose.xlu2.b32.start.end [1/1] (short) (narrow) %v2245_v1, 8 }
 0x45e   : > { %v2264_v35 = vpop.f32.mrf.mxu3 }
 0x464   : > { %v2247_v48 = vpop.f32.mrf.mxu2 }
 0x465   : > { %2466 = vxpose.xlu2.b32.start.end [1/1] (short) (narrow) %v2264_v35, 8 }
 0x466   : > { %v2266_v49 = vpop.f32.mrf.mxu3 }
 0x46c   : > { %v2283_v10 = vpop.f32.mrf.mxu2 }
 0x46d   : > { %2498 = vxpose.xlu0.b32.start.end [1/1] (short) (narrow) %v2283_v10, 8 }
 0x46e   : > { %v2302_v44 = vpop.f32.mrf.mxu3 }
 0x474   : > { %v2285_v47 = vpop.f32.mrf.mxu2 }
 0x475   : > { %2530 = vxpose.xlu0.b32.start.end [1/1] (short) (narrow) %v2302_v44, 8 }
 0x476   : > { %v2304_v60 = vpop.f32.mrf.mxu3 }
 0x47c   : > { %v8741_v6 = vpop.f32.mrf.mxu2 }
 0x47d   : > { %v2913_v23 = vsel %vm2152_vm4, %v8741_v6, -inf }
 0x47e   : > { %v8743_v42 = vpop.f32.mrf.mxu3 }
 0x47f   : > { %v2916_v46 = vsel %vm2152_vm4, %v8743_v42, -inf }
 0x484   : > { %v2766_v12 = vpop.f32.mrf.mxu2 }
 0x486   : > { %v2789_v31 = vpop.f32.mrf.mxu3 }
 0x48c   : > { %v8745_v3 = vpop.f32.mrf.mxu2 }
 0x48d   : > { %v2925_v36 = vsel %vm2152_vm4, %v8745_v3, -inf }
 0x48e   : > { %v8747_v40 = vpop.f32.mrf.mxu3 }
 0x48f   : > { %v2928_v29 = vsel %vm2152_vm4, %v8747_v40, -inf }
 0x494   : > { %v2858_v33 = vpop.f32.mrf.mxu2 }
 0x496   : > { %v2881_v15 = vpop.f32.mrf.mxu3 }
 0x49f   : > { %2914 = vmax.xlane.f32.xlu1 %v2913_v23 }
 0x4a7   : > { %2929 = vmax.xlane.f32.xlu1 %v2928_v29 }
 0x4d6   : > { %2917 = vmax.xlane.f32.xlu2 %v2916_v46 }
 0x4e1   : > { %v2322_v54 = vpop.trf.xlu0 }
 0x4e2   : > { %v2565_v53 = vrot.slane %v2322_v54, 4 }
 0x4e3   : > { %v2354_v30 = vpop.trf.xlu1 }
 0x4e4   : > { %v2577_v51 = vrot.slane %v2354_v30, 4 }
 0x4e6   : > { %2926 = vmax.xlane.f32.xlu0 %v2925_v36  ;;  %v2386_v27 = vpop.trf.xlu2 }
 0x4e7   : > { %v2562_v41 = vrot.slane %v2386_v27, 4  ;;  %v2566_v35 = vsel %vm1648_vm5, %v2386_v27, %v2565_v53 }
 0x4e8   : > { %v2574_v10 = vperm.slane %v2566_v35, %v8604_v17 }
 0x4e9   : > { %v2564_v49 = vsel %vm1648_vm5, %v2562_v41, %v2322_v54 }
 0x4ea   : > { %v2570_v60 = vperm.slane %v2564_v49, %v8604_v17  ;;  %v2625_v31 = vrot.slane %v2574_v10, 4 }
 0x4ec   : > { %v2613_v36 = vrot.slane %v2570_v60, 4 }
 0x4f3   : > { %v2418_v39 = vpop.trf.xlu0 }
 0x4f4   : > { %v2578_v48 = vsel %vm1648_vm5, %v2418_v39, %v2577_v51  ;;  %v2575_v44 = vrot.slane %v2418_v39, 4 }
 0x4f5   : > { %v2586_v47 = vperm.slane %v2578_v48, %v8604_v17 }
 0x4f6   : > { %v2450_v1 = vpop.trf.xlu2  ;;  %v2576_v15 = vsel %vm1648_vm5, %v2575_v44, %v2354_v30 }
 0x4f7   : > { %v2589_v12 = vrot.slane %v2450_v1, 4  ;;  %v2623_v29 = vrot.slane %v2586_v47, 4  ;;  %v2582_v54 = vperm.slane %v2576_v15, %v8604_v17  ;;  %v2626_v53 = vsel %vm1648_vm5, %v2586_v47, %v2625_v31 }
 0x4f8   : > { %v2634_v30 = vperm.slane %v2626_v53, %v8614_v52  ;;  %v10570_v15 = vlaneseq }
 0x4f9   : > { %v2624_v35 = vsel %vm1648_vm5, %v2623_v29, %v2574_v10  ;;  %v2614_v48 = vsel %vm1648_vm5, %v2582_v54, %v2613_v36  ;;  %v2611_v49 = vrot.slane %v2582_v54, 4 }
 0x4fa   : > { %v8799_v47 = vand.u32 127, %v10570_v15  ;;  %v2622_v10 = vperm.slane %v2614_v48, %v8614_v52  ;;  %v2673_v36 = vrot.slane %v2634_v30, 4 }
 0x4fc   : > { %vm1551_vm7 = vcmp.eq.s32.totalorder %v8799_v47, 7  ;;  %vm1549_vm8 = vcmp.eq.s32.totalorder %v8799_v47, 5  ;;  %vm1548_vm9 = vcmp.eq.s32.totalorder %v8799_v47, 4  ;;  %vm1547_vm10 = vcmp.eq.s32.totalorder %v8799_v47, 3 }
 0x4fd   : > { %vm1550_vm11 = vcmp.eq.s32.totalorder %v8799_v47, 6  ;;  %vm1545_vm12 = vcmp.eq.s32.totalorder %v8799_v47, 1  ;;  %vm1546_vm13 = vcmp.eq.s32.totalorder %v8799_v47, 2  ;;  %vm1544_vm14 = vcmp.eq.s32.totalorder %v8799_v47, 0 }
 0x4fe   : > { %v2482_v46 = vpop.trf.xlu2 }
 0x4ff   : > { %v2601_v41 = vrot.slane %v2482_v46, 4 }
 0x511   : > { %v2514_v33 = vpop.trf.xlu0 }
 0x512   : > { %v2587_v23 = vrot.slane %v2514_v33, 4  ;;  %v2590_v27 = vsel %vm1648_vm5, %v2514_v33, %v2589_v12 }
 0x513   : > { %v2598_v39 = vperm.slane %v2590_v27, %v8604_v17 }
 0x514   : > { %v2588_v51 = vsel %vm1648_vm5, %v2587_v23, %v2450_v1  ;;  %v2630_v1 = vperm.slane %v2624_v35, %v8614_v52  ;;  %v2612_v35 = vsel %vm1648_vm5, %v2611_v49, %v2570_v60 }
 0x515   : > { %v2594_v44 = vperm.slane %v2588_v51, %v8604_v17  ;;  %v2649_v31 = vrot.slane %v2598_v39, 4 }
 0x517   : > { %v2637_v27 = vrot.slane %v2594_v44, 4 }
 0x519   : > { %v2546_v20 = vpop.trf.xlu0 }
 0x51a   : > { %v2599_v12 = vrot.slane %v2546_v20, 4  ;;  %v2602_v33 = vsel %vm1648_vm5, %v2546_v20, %v2601_v41  ;;  %v2669_v41 = vrot.slane %v2630_v1, 4 }
 0x51b   : > { %v2610_v23 = vperm.slane %v2602_v33, %v8604_v17 }
 0x51c   : > { %v2600_v29 = vsel %vm1648_vm5, %v2599_v12, %v2482_v46  ;;  %v2665_v46 = vrot.slane %v2622_v10, 4 }
 0x51d   : > { %v2606_v54 = vperm.slane %v2600_v29, %v8604_v17  ;;  %v2647_v53 = vrot.slane %v2610_v23, 4  ;;  %v2650_v51 = vsel %vm1648_vm5, %v2610_v23, %v2649_v31 }
 0x51e   : > { %v2658_v20 = vperm.slane %v2650_v51, %v8614_v52  ;;  %v2618_v51 = vperm.slane %v2612_v35, %v8614_v52 }
 0x51f   : > { %v2635_v15 = vrot.slane %v2606_v54, 4  ;;  %v2648_v33 = vsel %vm1648_vm5, %v2647_v53, %v2598_v39  ;;  %v2638_v48 = vsel %vm1648_vm5, %v2606_v54, %v2637_v27 }
 0x520   : > { %v2674_v12 = vsel %vm1648_vm5, %v2658_v20, %v2673_v36  ;;  %v2654_v29 = vperm.slane %v2648_v33, %v8614_v52  ;;  %v2646_v31 = vperm.slane %v2638_v48, %v8614_v52  ;;  %v2671_v54 = vrot.slane %v2658_v20, 4 }
 0x521   : > { %v2698_v23 = vsel %vm1551_vm7, -1e+30, %v2674_v12  ;;  %v2636_v60 = vsel %vm1648_vm5, %v2635_v15, %v2594_v44  ;;  %v2661_v15 = vrot.slane %v2618_v51, 4 }
 0x522   : > { %v2904_v39 = vsel %vm2152_vm4, %v2698_v23, -inf  ;;  %v2670_v49 = vsel %vm1648_vm5, %v2654_v29, %v2669_v41  ;;  %v2667_v27 = vrot.slane %v2654_v29, 4  ;;  %v2666_v48 = vsel %vm1648_vm5, %v2646_v31, %v2665_v46 }
 0x523   : > { %2905 = vmax.xlane.f32.xlu0 %v2904_v39  ;;  %v2696_v36 = vsel %vm1549_vm8, -1e+30, %v2670_v49  ;;  %v2642_v35 = vperm.slane %v2636_v60, %v8614_v52  ;;  %v2672_v20 = vsel %vm1648_vm5, %v2671_v54, %v2634_v30  ;;  %v8832_v12 = vsel %vm1547_vm10, -1e+30, %v2666_v48 }
 0x524   : > { %v2898_v53 = vsel %vm2152_vm4, %v2696_v36, -inf  ;;  %v2668_v33 = vsel %vm1648_vm5, %v2667_v27, %v2630_v1  ;;  %v2697_v46 = vsel %vm1550_vm11, -1e+30, %v2672_v20  ;;  %v2892_v29 = vsel %vm2152_vm4, %v8832_v12, -inf }
 0x525   : > { %2899 = vmax.xlane.f32.xlu2 %v2898_v53  ;;  %v8826_v44 = vsel %vm1548_vm9, -1e+30, %v2668_v33  ;;  %v2662_v1 = vsel %vm1648_vm5, %v2642_v35, %v2661_v15  ;;  %v2663_v60 = vrot.slane %v2646_v31, 4  ;;  %v2901_v49 = vsel %vm2152_vm4, %v2697_v46, -inf }
 0x526   : > { %v2895_v41 = vsel %vm2152_vm4, %v8826_v44, -inf  ;;  %v2692_v39 = vsel %vm1545_vm12, -1e+30, %v2662_v1  ;;  %v2659_v27 = vrot.slane %v2642_v35, 4 }
 0x527   : > { %2896 = vmax.xlane.f32.xlu1 %v2895_v41  ;;  %v2886_v30 = vsel %vm2152_vm4, %v2692_v39, -inf  ;;  %v2664_v54 = vsel %vm1648_vm5, %v2663_v60, %v2622_v10  ;;  %v8852_v41 = vpop.xlane.xlu1 %2914 }
 0x528   : > { %v2660_v53 = vsel %vm1648_vm5, %v2659_v27, %v2618_v51  ;;  %v8844_v33 = vsel %vm1546_vm13, -1e+30, %v2664_v54 }
 0x529   : > { %v8846_v31 = vsel %vm1544_vm14, -1e+30, %v2660_v53  ;;  %v2889_v48 = vsel %vm2152_vm4, %v8844_v33, -inf }
 0x52a   : > { %v2883_v35 = vsel %vm2152_vm4, %v8846_v31, -inf }
 0x52b   : > { %2893 = vmax.xlane.f32.xlu0 %v2892_v29 }
 0x52d   : > { %2902 = vmax.xlane.f32.xlu2 %v2901_v49 }
 0x52f   : > { %2887 = vmax.xlane.f32.xlu1 %v2886_v30  ;;  %v2930_v15 = vpop.xlane.xlu1 %2929 }
 0x535   : > { %2890 = vmax.xlane.f32.xlu2 %v2889_v48 }
 0x537   : > { %2884 = vmax.xlane.f32.xlu1 %v2883_v35 }
 0x549   : > { %v2918_v20 = vpop.xlane.xlu2 %2917 }
 0x559   : > { %v2927_v10 = vpop.xlane.xlu0 %2926 }
 0x596   : > { %v2906_v47 = vpop.xlane.xlu0 %2905 }
 0x597   : > { %v2938_v1 = vmax.f32 %v2906_v47, %v2930_v15 }
 0x598   : > { %v2900_v51 = vpop.xlane.xlu2 %2899 }
 0x599   : > { %v2946_v29 = vsub.f32 %v2698_v23, %v2938_v1  ;;  %v2970_v60 = vsub.f32 %v8747_v40, %v2938_v1  ;;  %v2936_v49 = vmax.f32 %v2900_v51, %v8779_v2 }
 0x59a   : > { %v2897_v27 = vpop.xlane.xlu1 %2896 }
 0x59b   : > { %v2961_v30 = vmul.f32 1.442695, %v2946_v29  ;;  %v2985_v54 = vmul.f32 1.442695, %v2970_v60  ;;  %v2944_v53 = vsub.f32 %v2696_v36, %v2936_v49  ;;  %v2968_v48 = vsub.f32 %v8607_v13, %v2936_v49 }
 0x59c   : > { %v2935_v35 = vmax.f32 %v2897_v27, %v8775_v4 }
 0x59d   : > { %7451 = vpow2.f32 %v2961_v30  ;;  %v2981_v19 = vmul.f32 1.442695, %v2968_v48  ;;  %v2957_v15 = vmul.f32 1.442695, %v2944_v53 }
 0x59e   : > { %7453 = vpow2.f32 %v2985_v54  ;;  %v2967_v34 = vsub.f32 %v8595_v45, %v2935_v35  ;;  %v2894_v47 = vpop.xlane.xlu0 %2893 }
 0x59f   : > { %7455 = vpow2.f32 %v2981_v19  ;;  %v2934_v2 = vmax.f32 %v2894_v47, %v2918_v20  ;;  %v2943_v47 = vsub.f32 %v8826_v44, %v2935_v35 }
 0x5a0   : > { %v2979_v23 = vmul.f32 1.442695, %v2967_v34  ;;  %v2903_v40 = vpop.xlane.xlu2 %2902  ;;  %7457 = vpow2.f32 %v2957_v15 }
 0x5a1   : > { %v2937_v1 = vmax.f32 %v2903_v40, %v2927_v10  ;;  %v2966_v20 = vsub.f32 %v8743_v42, %v2934_v2  ;;  %v2942_v53 = vsub.f32 %v8832_v12, %v2934_v2 }
 0x5a2   : > { %v2888_v51 = vpop.xlane.xlu1 %2887  ;;  %7459 = vpow2.f32 %v2979_v23 }
 0x5a3   : > { %v8859_v29 = vpop.eup %7451  ;;  %v2945_v36 = vsub.f32 %v2697_v46, %v2937_v1  ;;  %v2969_v4 = vsub.f32 %v8745_v3, %v2937_v1  ;;  %v2932_v60 = vmax.f32 %v2888_v51, %v8777_v11  ;;  %v2977_v54 = vmul.f32 1.442695, %v2966_v20 }
 0x5a4   : > { %v8861_v13 = vpop.eup %7453  ;;  %v3008_v45 = vsel %vm2152_vm4, %v8859_v29, 0.0  ;;  %v2953_v12 = vmul.f32 1.442695, %v2942_v53  ;;  %v2955_v51 = vmul.f32 1.442695, %v2943_v47  ;;  %v3231_v53 = vshrl.u32 %v8763_v59, 16 }
 0x5a5   : > { %v2959_v19 = vmul.f32 1.442695, %v2945_v36  ;;  %v3032_v34 = vsel %vm2152_vm4, %v8861_v13, 0.0  ;;  %3009 = vadd.xlane.f32.xlu1 %v3008_v45  ;;  %v8869_v10 = vpop.eup %7455  ;;  %v2940_v46 = vsub.f32 %v2692_v39, %v2932_v60  ;;  %v2983_v49 = vmul.f32 1.442695, %v2969_v4 }
 0x5a6   : > { %3033 = vadd.xlane.f32.xlu2 %v3032_v34  ;;  %v3026_v3 = vsel %vm2152_vm4, %v8869_v10, 0.0  ;;  %v8874_v27 = vpop.eup %7457  ;;  %v2964_v4 = vsub.f32 %v8589_v24, %v2932_v60  ;;  %v8919_v60 = vpack.i.b16 %v8767_v43, %v8759_v50  ;;  %v3240_v47 = vshrl.u32 %v8769_v7, 16 }
 0x5a7   : > { %7461 = vpow2.f32 %v2959_v19  ;;  %v2949_v11 = vmul.f32 1.442695, %v2940_v46  ;;  %3027 = vadd.xlane.f32.xlu0 %v3026_v3  ;;  %v3002_v42 = vsel %vm2152_vm4, %v8874_v27, 0.0  ;;  %v3248_v3 = vshrl.u32 %v8767_v43, 16 }
 0x5a8   : > { %v8876_v30 = vpop.eup %7459  ;;  %7463 = vpow2.f32 %v2983_v49  ;;  %v2891_v45 = vpop.xlane.xlu2 %2890  ;;  %v2973_v20 = vmul.f32 1.442695, %v2964_v4  ;;  %v3247_v49 = vshrl.u32 %v8759_v50, 16  ;;  %v3263_v43 = vrot.slane %v8919_v60, 4 }
 0x5a9   : > { %7465 = vpow2.f32 %v2949_v11  ;;  %v3023_v15 = vsel %vm2152_vm4, %v8876_v30, 0.0  ;;  %v8909_v46 = vmax.f32 %v2891_v45, %v8852_v41  ;;  %v3237_v4 = vpack.i.b16 %v8769_v7, %v8761_v0 }
 0x5aa   : > { %v2885_v48 = vpop.xlane.xlu1 %2884  ;;  %7467 = vpow2.f32 %v2977_v54  ;;  %v8923_v54 = vpack.i.b16 %v3248_v3, %v3247_v49 }
 0x5ab   : > { %v8889_v40 = vmax.f32 %v2885_v48, %v8773_v55  ;;  %7469 = vpow2.f32 %v2953_v12  ;;  %v2941_v41 = vsub.f32 %v8844_v33, %v8909_v46  ;;  %v3232_v48 = vshrl.u32 %v8771_v28, 16 }
 0x5ac   : > { %7471 = vpow2.f32 %v2955_v51  ;;  %v3319_v33 = vrot.slane %v8923_v54, 4  ;;  %v3229_v12 = vpack.i.b16 %v8771_v28, %v8763_v59  ;;  %v3251_v3 = vrot.slane %v3237_v4, 4 }
 0x5ad   : > { %v8881_v39 = vpop.eup %7461  ;;  %3003 = vadd.xlane.f32.xlu1 %v3002_v42  ;;  %v2939_v36 = vsub.f32 %v8846_v31, %v8889_v40  ;;  %v3233_v51 = vpack.i.b16 %v3232_v48, %v3231_v53 }
 0x5ae   : > { %3024 = vadd.xlane.f32.xlu2 %v3023_v15  ;;  %v3005_v23 = vsel %vm2152_vm4, %v8881_v39, 0.0  ;;  %v8891_v1 = vpop.eup %7463  ;;  %v3239_v15 = vshrl.u32 %v8761_v0, 16 }
 0x5af   : > { %3006 = vadd.xlane.f32.xlu0 %v3005_v23  ;;  %v8893_v2 = vpop.eup %7465  ;;  %v3029_v35 = vsel %vm2152_vm4, %v8891_v1, 0.0  ;;  %v2947_v19 = vmul.f32 1.442695, %v2939_v36  ;;  %v2951_v23 = vmul.f32 1.442695, %v2941_v41  ;;  %v3223_v36 = vshrl.u32 %v8753_v58, 16 }
 0x5b0   : > { %v8897_v44 = vpop.eup %7467  ;;  %v2990_v55 = vsel %vm2152_vm4, %v8893_v2, 0.0  ;;  %v3241_v45 = vpack.i.b16 %v3240_v47, %v3239_v15  ;;  %v3320_v59 = vsel %vm1648_vm5, %v3319_v33, %v3233_v51 }
 0x5b1   : > { %v3020_v34 = vsel %vm2152_vm4, %v8897_v44, 0.0  ;;  %v8906_v31 = vpop.eup %7469  ;;  %7473 = vpow2.f32 %v2947_v19  ;;  %v3326_v7 = vperm.slane %v3320_v59, %v8604_v17 }
 0x5b2   : > { %v8913_v11 = vpop.eup %7471  ;;  %v2996_v24 = vsel %vm2152_vm4, %v8906_v31, 0.0  ;;  %7475 = vpow2.f32 %v2973_v20  ;;  %v3221_v20 = vpack.i.b16 %v8757_v26, %v8753_v58 }
 0x5b3   : > { %v2999_v42 = vsel %vm2152_vm4, %v8913_v11, 0.0  ;;  %7477 = vpow2.f32 %v2951_v23  ;;  %v3331_v15 = vrot.slane %v3326_v7, 4 }
 0x5b4   : > { %v3252_v53 = vsel %vm1648_vm5, %v3251_v3, %v3221_v20 }
 0x5b5   : > { %3030 = vadd.xlane.f32.xlu1 %v3029_v35  ;;  %v3258_v47 = vperm.slane %v3252_v53, %v8604_v17 }
 0x5b6   : > { %2991 = vadd.xlane.f32.xlu2 %v2990_v55  ;;  %v3224_v55 = vshrl.u32 %v8757_v26, 16 }
 0x5b7   : > { %3021 = vadd.xlane.f32.xlu0 %v3020_v34  ;;  %v8931_v50 = vpop.eup %7473  ;;  %v3264_v34 = vsel %vm1648_vm5, %v3263_v43, %v3229_v12 }
 0x5b8   : > { %v8938_v35 = vpop.eup %7475  ;;  %v2987_v19 = vsel %vm2152_vm4, %v8931_v50, 0.0  ;;  %v3225_v49 = vpack.i.b16 %v3224_v55, %v3223_v36  ;;  %v3270_v0 = vperm.slane %v3264_v34, %v8604_v17 }
 0x5b9   : > { %v3014_v28 = vsel %vm2152_vm4, %v8938_v35, 0.0  ;;  %v8953_v41 = vpop.eup %7477 }
 0x5ba   : > { %v2993_v26 = vsel %vm2152_vm4, %v8953_v41, 0.0  ;;  %v3309_v3 = vrot.slane %v3225_v49, 4 }
 0x5bc   : > { %v3310_v53 = vsel %vm1648_vm5, %v3241_v45, %v3309_v3 }
 0x5bd   : > { %2997 = vadd.xlane.f32.xlu1 %v2996_v24  ;;  %v3307_v24 = vrot.slane %v3241_v45, 4 }
 0x5bf   : > { %3000 = vadd.xlane.f32.xlu0 %v2999_v42  ;;  %v3308_v48 = vsel %vm1648_vm5, %v3307_v24, %v3225_v49  ;;  %v3275_v42 = vrot.slane %v3270_v0, 4 }
 0x5c0   : > { %v3314_v58 = vperm.slane %v3308_v48, %v8604_v17  ;;  %v3277_v48 = vrot.slane %v3258_v47, 4 }
 0x5c1   : > { %v3276_v43 = vsel %vm1648_vm5, %v3275_v42, %v3258_v47 }
 0x5c2   : > { %v3332_v23 = vsel %vm1648_vm5, %v3331_v15, %v3314_v58  ;;  %v8964_v33 = vperm.slane %v3276_v43, %v8614_v52  ;;  %v3333_v42 = vrot.slane %v3314_v58, 4  ;;  %v3265_v15 = vrot.slane %v3229_v12, 4 }
 0x5c3   : > { %v8967_v36 = vperm.slane %v3332_v23, %v8614_v52  ;;  %v8979_v23 = vperm.slane %v3310_v53, %v8604_v17 }
 0x5c4   : > { %v3299_v55 = vrot.slane %v8964_v33, 4 }
 0x5c5   : > { %2988 = vadd.xlane.f32.xlu1 %v2987_v19  ;;  %v3355_v19 = vrot.slane %v8967_v36, 4  ;;  %v3345_v12 = vrot.slane %v8979_v23, 4 }
 0x5c6   : > { %v3300_v34 = vsel %vm1648_vm5, 0, %v3299_v55  ;;  %v3278_v55 = vsel %vm1648_vm5, %v3270_v0, %v3277_v48 }
 0x5c7   : > { %3015 = vadd.xlane.f32.xlu0 %v3014_v28  ;;  %v3356_v59 = vsel %vm1648_vm5, 0, %v3355_v19  ;;  %v3253_v28 = vrot.slane %v3221_v20, 4  ;;  %v3334_v19 = vsel %vm1648_vm5, %v3326_v7, %v3333_v42  ;;  %v3266_v20 = vsel %vm1648_vm5, %v8919_v60, %v3265_v15 }
 0x5c8   : > { %v3342_v49 = vperm.slane %v3334_v19, %v8614_v52  ;;  %v8992_v47 = vperm.slane %v3266_v20, %v8604_v17 }
 0x5c9   : > { %v3254_v24 = vsel %vm1648_vm5, %v3237_v4, %v3253_v28 }
 0x5ca   : > { %v8976_v43 = vperm.slane %v3254_v24, %v8604_v17  ;;  %v3357_v58 = vrot.slane %v3342_v49, 4 }
 0x5cc   : > { %v3289_v45 = vrot.slane %v8976_v43, 4  ;;  %v3358_v3 = vsel %vm1648_vm5, 0, %v3357_v58 }
 0x5ce   : > { %v3290_v60 = vsel %vm1648_vm5, %v8992_v47, %v3289_v45 }
 0x5cf   : > { %2994 = vadd.xlane.f32.xlu0 %v2993_v26  ;;  %v3321_v26 = vrot.slane %v3233_v51, 4  ;;  %v3286_v51 = vperm.slane %v3278_v55, %v8614_v52 }
 0x5d1   : > { %v3322_v4 = vsel %vm1648_vm5, %v8923_v54, %v3321_v26  ;;  %v3301_v7 = vrot.slane %v3286_v51, 4 }
 0x5d2   : > { %v8995_v0 = vperm.slane %v3322_v4, %v8604_v17 }
 0x5d3   : > { %v3302_v28 = vsel %vm1648_vm5, 0, %v3301_v7 }
 0x5d4   : > { %v3346_v54 = vsel %vm1648_vm5, %v8995_v0, %v3345_v12  ;;  %v3343_v9 = vrot.slane %v8995_v0, 4 }
 0x5df   : > { %7406 = vxpose.binary.xlu2.c.b16.start.end [1/2] (short) (narrow) %v3356_v59, %v3300_v34, 16  ;;  %v9002_v34 = vperm.slane %v3290_v60, %v8614_v52  ;;  %v9005_v59 = vperm.slane %v3346_v54, %v8614_v52 }
 0x5e1   : > { %v3305_v24 = vrot.slane %v9002_v34, 4  ;;  %v3361_v53 = vrot.slane %v9005_v59, 4 }
 0x5e3   : > { %v3306_v48 = vsel %vm1648_vm5, 0, %v3305_v24  ;;  %v3362_v42 = vsel %vm1648_vm5, 0, %v3361_v53  ;;  %v2965_v53 = vsub.f32 %v8741_v6, %v8909_v46 }
 0x5f8   : > { %7403 = vxpose.binary.xlu0.c.b16.start.end [1/2] (short) (narrow) %v3358_v3, %v3302_v28, 16 }
 0x5ff   : > { %7418 = vxpose.binary.xlu1.c.b16.start.end [1/2] (short) (narrow) %v3362_v42, %v3306_v48, 16 }
 0x618   : > { %v3010_v15 = vpop.xlane.xlu1 %3009 }
 0x619   : > { %v3034_v26 = vpop.xlane.xlu2 %3033 }
 0x61a   : > { %v3042_v55 = vadd.f32 %v3034_v26, %v3010_v15  ;;  %v3028_v19 = vpop.xlane.xlu0 %3027  ;;  %v2975_v15 = vmul.f32 1.442695, %v2965_v53  ;;  %v2963_v26 = vsub.f32 %v8583_v18, %v8889_v40 }
 0x620   : > { %v3004_v4 = vpop.xlane.xlu1 %3003 }
 0x621   : > { %v3040_v12 = vadd.f32 %v3028_v19, %v3004_v4  ;;  %v3025_v60 = vpop.xlane.xlu2 %3024  ;;  %v2971_v19 = vmul.f32 1.442695, %v2963_v26 }
 0x622   : > { %v3007_v20 = vpop.xlane.xlu0 %3006 }
 0x623   : > { %7479 = vrcp.f32 %v3040_v12 }
 0x628   : > { %v3031_v46 = vpop.xlane.xlu1 %3030 }
 0x629   : > { %v9013_v58 = vpop.eup %7479  ;;  %v3041_v12 = vadd.f32 %v3031_v46, %v3007_v20 }
 0x62a   : > { %v3022_v45 = vpop.xlane.xlu0 %3021  ;;  %v3056_v28 = vmul.f32 %v9013_v58, %v8874_v27 }
 0x62c   : > { %v3064_v48 = vpack.c.bf16 %v3056_v28, %v3056_v28  ;;  %v2992_v28 = vpop.xlane.xlu2 %2991 }
 0x632   : > { %v3001_v54 = vpop.xlane.xlu0 %3000 }
 0x633   : > { %v3039_v7 = vadd.f32 %v3025_v60, %v3001_v54 }
 0x635   : > { %7481 = vrcp.f32 %v3039_v7 }
 0x636   : > { %7483 = vpow2.f32 %v2975_v15  ;;  %v2998_v15 = vpop.xlane.xlu1 %2997 }
 0x637   : > { %7485 = vpow2.f32 %v2971_v19  ;;  %v3038_v26 = vadd.f32 %v3022_v45, %v2998_v15 }
 0x638   : > { %7487 = vrcp.f32 %v3042_v55 }
 0x639   : > { %7489 = vrcp.f32 %v3041_v12 }
 0x63a   : > { %v3016_v7 = vpop.xlane.xlu0 %3015  ;;  %7491 = vrcp.f32 %v3038_v26 }
 0x63b   : > { %v9017_v3 = vpop.eup %7481 }
 0x63c   : > { %v3055_v24 = vmul.f32 %v9017_v3, %v8913_v11  ;;  %v9025_v4 = vpop.eup %7483 }
 0x63d   : > { %v3017_v27 = vsel %vm2152_vm4, %v9025_v4, 0.0  ;;  %v9029_v11 = vpop.eup %7485 }
 0x63e   : > { %v3063_v42 = vpack.c.bf16 %v3055_v24, %v3055_v24  ;;  %v3011_v6 = vsel %vm2152_vm4, %v9029_v11, 0.0  ;;  %v9033_v18 = vpop.eup %7487  ;;  %v2989_v46 = vpop.xlane.xlu1 %2988 }
 0x63f   : > { %v9035_v40 = vpop.eup %7489  ;;  %v3058_v60 = vmul.f32 %v9033_v18, %v8859_v29 }
 0x640   : > { %7412 = vxpose.binary.xlu0.c.b16.start.end [1/2] (short) (narrow) %v3064_v48, %v3063_v42, 16 }
 0x642   : > { %v2995_v24 = vpop.xlane.xlu0 %2994 }
 0x650   : > { %3018 = vadd.xlane.f32.xlu2 %v3017_v27  ;;  %v9046_v27 = vpop.eup %7491 }
 0x651   : > { %7415 = vxpose.binary.xlu0.c.b16.start.end [1/2] (short) (narrow) %v3342_v49, %v3286_v51, 16  ;;  %v3057_v51 = vmul.f32 %v9035_v40, %v8881_v39  ;;  %v3066_v49 = vpack.c.bf16 %v3058_v60, %v3058_v60  ;;  %v3036_v39 = vadd.f32 %v3016_v7, %v2992_v28 }
 0x653   : > { %v3065_v54 = vpack.c.bf16 %v3057_v51, %v3057_v51 }
 0x658   : > { %3012 = vadd.xlane.f32.xlu2 %v3011_v6  ;;  %v3054_v6 = vmul.f32 %v9046_v27, %v8906_v31 }
 0x65a   : > { %v3062_v45 = vpack.c.bf16 %v3054_v6, %v3054_v6 }
 0x680   : > { %v7407_v53 = vpop.trf.xlu2 }
 0x681   : > { %7409 = vxpose.binary.xlu2.c.b16.start.end [1/2] (short) (narrow) %v3066_v49, %v3065_v54, 16 }
 0x688   : > { %v9044_v42 = vpop.trf.xlu2 }
 0x6a4   : > { %v7404_v20 = vpop.trf.xlu0 }
 0x6a5   : > { %v3625_v55 = vrot.slane %v7404_v20, 4 }
 0x6a7   : > { %v9042_v48 = vsel %vm1648_vm5, %v3625_v55, %v7407_v53 }
 0x6ab   : > { %v9064_v55 = vpop.trf.xlu1 }
 0x6ac   : > { %v9066_v26 = vpop.trf.xlu0 }
 0x6c3   : > { %v3019_v29 = vpop.xlane.xlu2 %3018 }
 0x6c4   : > { %v3037_v19 = vadd.f32 %v3019_v29, %v2995_v24  ;;  %v9068_v29 = vpop.trf.xlu1 }
 0x6c6   : > { %7493 = vrcp.f32 %v3037_v19 }
 0x6c7   : > { %7495 = vrcp.f32 %v3036_v39 }
 0x6cb   : > { %v3013_v12 = vpop.xlane.xlu2 %3012 }
 0x6cc   : > { %v9050_v60 = vpop.eup %7493  ;;  %v3035_v51 = vadd.f32 %v3013_v12, %v2989_v46 }
 0x6cd   : > { %v3053_v49 = vmul.f32 %v9050_v60, %v8953_v41  ;;  %v9054_v24 = vpop.eup %7495 }
 0x6ce   : > { %7497 = vrcp.f32 %v3035_v51  ;;  %v3052_v7 = vmul.f32 %v9054_v24, %v8893_v2 }
 0x6cf   : > { %v3061_v54 = vpack.c.bf16 %v3053_v49, %v3053_v49 }
 0x6d0   : > { %v3060_v53 = vpack.c.bf16 %v3052_v7, %v3052_v7 }
 0x6d1   : > { %7421 = vxpose.binary.xlu2.c.b16.start.end [1/2] (short) (narrow) %v3062_v45, %v3061_v54, 16 }
 0x6d4   : > { %v9058_v28 = vpop.eup %7497 }
 0x6d5   : > { %v3051_v31 = vmul.f32 %v9058_v28, %v8931_v50 }
 0x6d7   : > { %v3059_v20 = vpack.c.bf16 %v3051_v31, %v3051_v31 }
 0x6d9   : > { %7427 = vxpose.binary.xlu1.c.b16.start.end [1/2] (short) (narrow) %v3060_v53, %v3059_v20, 16 }
 0x6e1   : > { %7424 = vxpose.binary.xlu2.c.b16.start.end [1/2] (short) (narrow) %v8967_v36, %v8964_v33, 16 }
 0x6ec   : > { %v7413_v19 = vpop.trf.xlu0 }
 0x6ed   : > { %v3883_v6 = vrot.slane %v7413_v19, 4 }
 0x6f4   : > { %v7414_v54 = vpop.trf.xlu0 }
 0x6f5   : > { %v3911_v31 = vrot.slane %v7414_v54, 4 }
 0x722   : > { %v7410_v41 = vpop.trf.xlu2 }
 0x723   : > { %v3889_v39 = vrot.slane %v7410_v41, 4 }
 0x72a   : > { %v7411_v15 = vpop.trf.xlu2 }
 0x72b   : > { %v3917_v46 = vrot.slane %v7411_v15, 4 }
 0x772   : > { %v7422_v2 = vpop.trf.xlu2 }
 0x773   : > { %v3890_v50 = vsel %vm1648_vm5, %v3889_v39, %v7422_v2 }
 0x774   : > { %v3894_v33 = vperm.slane %v3890_v50, %v8604_v17 }
 0x776   : > { %v3895_v53 = vrot.slane %v3894_v33, 4 }
 0x77a   : > { %v7423_v36 = vpop.trf.xlu2 }
 0x77b   : > { %v3918_v45 = vsel %vm1648_vm5, %v3917_v46, %v7423_v36 }
 0x77c   : > { %v3922_v20 = vperm.slane %v3918_v45, %v8604_v17 }
 0x785   : > { %v7428_v12 = vpop.trf.xlu1 }
 0x786   : > { %v3884_v51 = vsel %vm1648_vm5, %v3883_v6, %v7428_v12  ;;  %v3923_v6 = vrot.slane %v3922_v20, 4 }
 0x787   : > { %v3888_v49 = vperm.slane %v3884_v51, %v8604_v17 }
 0x789   : > { %v3897_v7 = vrot.slane %v3888_v49, 4  ;;  %v3896_v15 = vsel %vm1648_vm5, %v3895_v53, %v3888_v49 }
 0x78a   : > { %v3902_v46 = vperm.slane %v3896_v15, %v8614_v52 }
 0x78b   : > { %v3898_v41 = vsel %vm1648_vm5, %v3894_v33, %v3897_v7 }
 0x78c   : > { %v3906_v2 = vperm.slane %v3898_v41, %v8614_v52  ;;  %v3943_v54 = vshrl.u32 %v3902_v46, 16 }
 0x78d   : > { %v7429_v19 = vpop.trf.xlu1 }
 0x78e   : > { %v3912_v39 = vsel %vm1648_vm5, %v3911_v31, %v7429_v19  ;;  %v3909_v12 = vrot.slane %v3906_v2, 4  ;;  %v3959_v53 = vshrl.u32 %v3906_v2, 16 }
 0x78f   : > { %v3916_v50 = vperm.slane %v3912_v39, %v8604_v17 }
 0x790   : > { %v3910_v31 = vsel %vm1648_vm5, 0, %v3909_v12  ;;  %v3907_v12 = vrot.slane %v3902_v46, 4 }
 0x791   : > { %v3924_v51 = vsel %vm1648_vm5, %v3923_v6, %v3916_v50  ;;  %v3925_v36 = vrot.slane %v3916_v50, 4  ;;  %v3967_v50 = vshrl.u32 %v3910_v31, 16 }
 0x792   : > { %v3930_v45 = vperm.slane %v3924_v51, %v8614_v52 }
 0x793   : > { %v3926_v33 = vsel %vm1648_vm5, %v3922_v20, %v3925_v36 }
 0x794   : > { %v3934_v49 = vperm.slane %v3926_v33, %v8614_v52  ;;  %v3944_v7 = vshrl.u32 %v3930_v45, 16  ;;  %v3941_v19 = vpack.i.b16 %v3930_v45, %v3902_v46  ;;  %v3935_v20 = vrot.slane %v3930_v45, 4 }
 0x795   : > { %v3287_v33 = vrot.slane %v8992_v47, 4 }
 0x796   : > { %v3937_v41 = vrot.slane %v3934_v49, 4  ;;  %v3945_v39 = vpack.i.b16 %v3944_v7, %v3943_v54  ;;  %v3960_v5 = vshrl.u32 %v3934_v49, 16  ;;  %v3957_v15 = vpack.i.b16 %v3934_v49, %v3906_v2 }
 0x797   : > { %v3936_v54 = vsel %vm1648_vm5, 0, %v3935_v20  ;;  %v3908_v7 = vsel %vm1648_vm5, 0, %v3907_v12  ;;  %v3344_v2 = vsel %vm1648_vm5, %v3343_v9, %v8979_v23  ;;  %v7425_v9 = vpop.trf.xlu2 }
 0x798   : > { %7430 = vxpose.binary.xlu1.c.b16.start.end [1/2] (short) (narrow) %v3945_v39, %v3941_v19, 16  ;;  %v3961_v25 = vpack.i.b16 %v3960_v5, %v3959_v53  ;;  %v3938_v6 = vsel %vm1648_vm5, 0, %v3937_v41  ;;  %v3288_v5 = vsel %vm1648_vm5, %v3287_v33, %v8976_v43  ;;  %v3951_v45 = vshrl.u32 %v3908_v7, 16  ;;  %v7416_v43 = vpop.trf.xlu0 }
 0x799   : > { %v3968_v51 = vshrl.u32 %v3938_v6, 16  ;;  %v3965_v36 = vpack.i.b16 %v3938_v6, %v3910_v31  ;;  %v3294_v49 = vperm.slane %v3288_v5, %v8614_v52  ;;  %v3350_v47 = vperm.slane %v3344_v2, %v8614_v52 }
 0x79a   : > { %7433 = vxpose.binary.xlu2.c.b16.start.end [1/2] (short) (narrow) %v3961_v25, %v3957_v15, 16  ;;  %v3952_v25 = vshrl.u32 %v3936_v54, 16  ;;  %v3949_v53 = vpack.i.b16 %v3936_v54, %v3908_v7  ;;  %v3630_v2 = vperm.slane %v9042_v48, %v8604_v17 }
 0x79b   : > { %v3969_v61 = vpack.i.b16 %v3968_v51, %v3967_v50  ;;  %v3359_v46 = vrot.slane %v3350_v47, 4  ;;  %v3619_v50 = vrot.slane %v7416_v43, 4 }
 0x79c   : > { %v3953_v0 = vpack.i.b16 %v3952_v25, %v3951_v45  ;;  %v3681_v25 = vrot.slane %v9066_v26, 4 }
 0x79d   : > { %7439 = vxpose.binary.xlu0.c.b16.start.end [1/2] (short) (narrow) %v3969_v61, %v3965_v36, 16  ;;  %v3303_v61 = vrot.slane %v3294_v49, 4  ;;  %v3360_v41 = vsel %vm1648_vm5, 0, %v3359_v46  ;;  %v3620_v36 = vsel %vm1648_vm5, %v3619_v50, %v7425_v9 }
 0x79e   : > { %v3624_v5 = vperm.slane %v3620_v36, %v8604_v17 }
 0x79f   : > { %v3304_v31 = vsel %vm1648_vm5, 0, %v3303_v61  ;;  %v7426_v23 = vpop.trf.xlu2 }
 0x7a0   : > { %v7417_v19 = vpop.trf.xlu0 }
 0x7a8   : > { %7436 = vxpose.binary.xlu1.c.b16.start.end [1/2] (short) (narrow) %v3953_v0, %v3949_v53, 16  ;;  %v3675_v0 = vrot.slane %v7417_v19, 4 }
 0x7aa   : > { %7448 = vxpose.binary.xlu2.c.b16.start.end [1/2] (short) (narrow) %v3350_v47, %v3294_v49, 16  ;;  %v3645_v47 = vrot.slane %v3624_v5, 4 }
 0x7ad   : > { %7442 = vxpose.binary.xlu0.c.b16.start.end [1/2] (short) (narrow) %v3360_v41, %v3304_v31, 16  ;;  %v3643_v31 = vrot.slane %v3630_v2, 4  ;;  %v3682_v41 = vsel %vm1648_vm5, %v3681_v25, %v9044_v42  ;;  %v3676_v42 = vsel %vm1648_vm5, %v3675_v0, %v7426_v23 }
 0x7ae   : > { %v9120_v50 = vperm.slane %v3682_v41, %v8604_v17 }
 0x7af   : > { %v3644_v26 = vsel %vm1648_vm5, %v3643_v31, %v3624_v5 }
 0x7b8   : > { %7445 = vxpose.binary.xlu1.c.b16.start.end [1/2] (short) (narrow) %v9005_v59, %v9002_v34, 16 }
 0x83b   : > { %v7434_v15 = vpop.trf.xlu2 }
 0x83c   : > { %v4099_v20 = vrot.slane %v7434_v15, 4 }
 0x843   : > { %v7435_v12 = vpop.trf.xlu2 }
 0x844   : > { %v7431_v39 = vpop.trf.xlu1  ;;  %v4127_v59 = vrot.slane %v7435_v12, 4  ;;  %v9127_v12 = vperm.slane %v3644_v26, %v8614_v52 }
 0x845   : > { %v4100_v33 = vsel %vm1648_vm5, %v4099_v20, %v7431_v39  ;;  %v3646_v39 = vsel %vm1648_vm5, %v3630_v2, %v3645_v47  ;;  %v3699_v2 = vrot.slane %v9120_v50, 4 }
 0x846   : > { %v4104_v34 = vperm.slane %v4100_v33, %v8604_v17  ;;  %v3669_v0 = vrot.slane %v9127_v12, 4 }
 0x848   : > { %v4113_v61 = vrot.slane %v4104_v34, 4 }
 0x849   : > { %v7440_v6 = vpop.trf.xlu0 }
 0x84a   : > { %v4105_v54 = vrot.slane %v7440_v6, 4 }
 0x84c   : > { %v7432_v51 = vpop.trf.xlu1 }
 0x84d   : > { %v4128_v46 = vsel %vm1648_vm5, %v4127_v59, %v7432_v51  ;;  %v3637_v51 = vrot.slane %v9064_v55, 4 }
 0x84e   : > { %v4132_v19 = vperm.slane %v4128_v46, %v8604_v17 }
 0x850   : > { %v4141_v23 = vrot.slane %v4132_v19, 4 }
 0x851   : > { %v7441_v7 = vpop.trf.xlu0 }
 0x852   : > { %v4133_v43 = vrot.slane %v7441_v7, 4 }
 0x854   : > { %v7437_v45 = vpop.trf.xlu1 }
 0x855   : > { %v4106_v49 = vsel %vm1648_vm5, %v4105_v54, %v7437_v45  ;;  %v9130_v54 = vperm.slane %v3646_v39, %v8614_v52 }
 0x856   : > { %v4110_v53 = vperm.slane %v4106_v49, %v8604_v17 }
 0x858   : > { %v4111_v9 = vrot.slane %v4110_v53, 4  ;;  %v4114_v48 = vsel %vm1648_vm5, %v4110_v53, %v4113_v61  ;;  %v3693_v53 = vrot.slane %v9068_v29, 4 }
 0x859   : > { %v7443_v6 = vpop.trf.xlu0  ;;  %v4122_v33 = vperm.slane %v4114_v48, %v8614_v52 }
 0x85a   : > { %v4112_v15 = vsel %vm1648_vm5, %v4111_v9, %v4104_v34  ;;  %v3638_v7 = vsel %vm1648_vm5, %v3637_v51, %v7443_v6  ;;  %v9135_v34 = vperm.slane %v3676_v42, %v8604_v17  ;;  %v7449_v9 = vpop.trf.xlu2 }
 0x85b   : > { %v4118_v20 = vperm.slane %v4112_v15, %v8614_v52  ;;  %v3642_v25 = vperm.slane %v3638_v7, %v8604_v17  ;;  %v4125_v47 = vrot.slane %v4122_v33, 4  ;;  %v4170_v15 = vshrl.u32 %v4122_v33, 16 }
 0x85c   : > { %v7438_v36 = vpop.trf.xlu1  ;;  %v3700_v31 = vsel %vm1648_vm5, %v3699_v2, %v9135_v34  ;;  %v3701_v32 = vrot.slane %v9135_v34, 4 }
 0x85d   : > { %v4134_v5 = vsel %vm1648_vm5, %v4133_v43, %v7438_v36  ;;  %v4123_v59 = vrot.slane %v4118_v20, 4  ;;  %v3655_v29 = vrot.slane %v3642_v25, 4  ;;  %v4126_v51 = vsel %vm1648_vm5, 0, %v4125_v47 }
 0x85e   : > { %v4138_v55 = vperm.slane %v4134_v5, %v8604_v17  ;;  %v4158_v42 = vshrl.u32 %v4118_v20, 16 }
 0x85f   : > { %v4124_v43 = vsel %vm1648_vm5, 0, %v4123_v59 }
 0x860   : > { %v4139_v45 = vrot.slane %v4138_v55, 4  ;;  %v4142_v49 = vsel %vm1648_vm5, %v4138_v55, %v4141_v23  ;;  %v4164_v23 = vshrl.u32 %v4124_v43, 16 }
 0x861   : > { %v4150_v61 = vperm.slane %v4142_v49, %v8614_v52  ;;  %v7444_v2 = vpop.trf.xlu0 }
 0x862   : > { %v4140_v41 = vsel %vm1648_vm5, %v4139_v45, %v4132_v19 }
 0x863   : > { %v4146_v48 = vperm.slane %v4140_v41, %v8614_v52  ;;  %v4153_v26 = vrot.slane %v4150_v61, 4  ;;  %v4169_v39 = vpack.i.b16 %v4150_v61, %v4122_v33  ;;  %v4171_v36 = vshrl.u32 %v4150_v61, 16 }
 0x864   : > { %v7446_v6 = vpop.trf.xlu1 }
 0x865   : > { %v3631_v7 = vrot.slane %v7446_v6, 4  ;;  %v4151_v5 = vrot.slane %v4146_v48, 4  ;;  %v4157_v55 = vpack.i.b16 %v4146_v48, %v4118_v20  ;;  %v4154_v19 = vsel %vm1648_vm5, 0, %v4153_v26 }
 0x866   : > { %v4159_v45 = vshrl.u32 %v4146_v48, 16  ;;  %v4263_v59 = vsel %vm2156_vm6, %v4169_v39, 0  ;;  %v4172_v49 = vpack.i.b16 %v4171_v36, %v4170_v15  ;;  %v4175_v47 = vpack.i.b16 %v4154_v19, %v4126_v51 }
 0x867   : > { %v3632_v41 = vsel %vm1648_vm5, %v3631_v7, %v7449_v9  ;;  %v4152_v33 = vsel %vm1648_vm5, 0, %v4151_v5  ;;  %v4183_v46 = vsel %vm2156_vm6, %v4157_v55, 0  ;;  %v3694_v48 = vsel %vm1648_vm5, %v3693_v53, %v7444_v2  ;;  %v7450_v55 = vpop.trf.xlu2 }
 0x868   : > { %v3636_v61 = vperm.slane %v3632_v41, %v8604_v17  ;;  %v4163_v6 = vpack.i.b16 %v4152_v33, %v4124_v43  ;;  %4192 = vmatpush.bf16.msrb.mxu0 %v4183_v46  ;;  %v4165_v20 = vshrl.u32 %v4152_v33, 16  ;;  %v4160_v21 = vpack.i.b16 %v4159_v45, %v4158_v42 }
 0x869   : > { %v4176_v26 = vshrl.u32 %v4126_v51, 16  ;;  %v4177_v39 = vshrl.u32 %v4154_v19, 16  ;;  %v4303_v46 = vsel %vm2156_vm6, %v4175_v47, 0  ;;  %v3698_v34 = vperm.slane %v3694_v48, %v8604_v17 }
 0x86a   : > { %v3656_v9 = vsel %vm1648_vm5, %v3655_v29, %v3636_v61  ;;  %v3657_v15 = vrot.slane %v3636_v61, 4  ;;  %v4223_v36 = vsel %vm2156_vm6, %v4163_v6, 0  ;;  %v4166_v7 = vpack.i.b16 %v4165_v20, %v4164_v23 }
 0x86b   : > { %v3662_v5 = vperm.slane %v3656_v9, %v8614_v52  ;;  %4232 = vmatpush.bf16.msrb.mxu2 %v4223_v36  ;;  %v4203_v43 = vsel %vm2156_vm6, %v4160_v21, 0  ;;  %v4178_v42 = vpack.i.b16 %v4177_v39, %v4176_v26  ;;  %v4283_v23 = vsel %vm2156_vm6, %v4172_v49, 0 }
 0x86c   : > { %4272 = vmatpush.bf16.msra.mxu0 %v4263_v59  ;;  %v3658_v53 = vsel %vm1648_vm5, %v3642_v25, %v3657_v15  ;;  %v7447_v51 = vpop.trf.xlu1  ;;  %v4243_v29 = vsel %vm2156_vm6, %v4166_v7, 0  ;;  %4212 = vmatpush.bf16.msrb.mxu1 %v4203_v43  ;;  %v3702_v21 = vsel %vm1648_vm5, %v9120_v50, %v3701_v32  ;;  %v3706_v25 = vperm.slane %v3700_v31, %v8614_v52 }
 0x86d   : > { %v3666_v2 = vperm.slane %v3658_v53, %v8614_v52  ;;  %v3667_v19 = vrot.slane %v3662_v5, 4  ;;  %v3670_v45 = vsel %vm1648_vm5, %v3662_v5, %v3669_v0  ;;  %v3687_v59 = vrot.slane %v7447_v51, 4  ;;  %4252 = vmatpush.bf16.msrb.mxu3 %v4243_v29 }
 0x86e   : > { %v4323_v41 = vsel %vm2156_vm6, %v4178_v42, 0  ;;  %v10571_v49 = vrot.slane %v9130_v54, 4  ;;  %v3711_v6 = vrot.slane %v3698_v34, 4  ;;  %v3710_v32 = vperm.slane %v3702_v21, %v8614_v52 }
 0x86f   : > { %4312 = vmatpush.bf16.msra.mxu2 %v4303_v46  ;;  %v3668_v33 = vsel %vm1648_vm5, %v3667_v19, %v9127_v12  ;;  %v3671_v47 = vrot.slane %v3666_v2, 4  ;;  %v3688_v0 = vsel %vm1648_vm5, %v3687_v59, %v7450_v55  ;;  %v3725_v12 = vrot.slane %v3706_v25, 4 }
 0x870   : > { %4292 = vmatpush.bf16.msra.mxu1 %v4283_v23  ;;  %v3674_v61 = vsel %vm1648_vm5, %v3666_v2, %v10571_v49  ;;  %v3692_v20 = vperm.slane %v3688_v0, %v8604_v17  ;;  %v4727_v9 = vsel %vm2156_vm6, %v8560_v56, 0  ;;  %v3729_v15 = vrot.slane %v3710_v32, 4 }
 0x871   : > { %4332 = vmatpush.bf16.msra.mxu3 %v4323_v41  ;;  %v3672_v50 = vsel %vm1648_vm5, %v3671_v47, %v9130_v54  ;;  %v3740_v46 = vshrl.u32 %v3670_v45, 16  ;;  %v4765_v42 = vsel %vm2156_vm6, %v8601_v16, 0  ;;  %v3734_v53 = vshrl.u32 %v3668_v33, 16 }
 0x872   : > { %v3712_v31 = vsel %vm1648_vm5, %v3711_v6, %v3692_v20  ;;  %v3713_v48 = vrot.slane %v3692_v20, 4  ;;  %v3752_v19 = vshrl.u32 %v3674_v61, 16  ;;  %v4784_v16 = vsel %vm2156_vm6, %v8585_v57, 0 }
 0x873   : > { %v3718_v26 = vperm.slane %v3712_v31, %v8614_v52  ;;  %v3746_v21 = vshrl.u32 %v3672_v50, 16  ;;  %v4746_v49 = vsel %vm2156_vm6, %v8573_v63, 0  ;;  %v4841_v57 = vsel %vm2156_vm6, %v8579_v62, 0 }
 0x874   : > { %v3714_v39 = vsel %vm1648_vm5, %v3698_v34, %v3713_v48  ;;  %v4803_v0 = vsel %vm2156_vm6, %v8587_v14, 0  ;;  %v4860_v6 = vsel %vm2156_vm6, %v8597_v38, 0  ;;  %v4822_v63 = vsel %vm2156_vm6, %v8571_v22, 0 }
 0x875   : > { %v3722_v36 = vperm.slane %v3714_v39, %v8614_v52  ;;  %v3723_v7 = vrot.slane %v3718_v26, 4  ;;  %v3726_v5 = vsel %vm1648_vm5, %v3718_v26, %v3725_v12  ;;  %v4709_v62 = vmul.f32 %v9050_v60, %v9025_v4 }
 0x876   : > { %v3739_v43 = vpack.i.b16 %v3726_v5, %v3670_v45  ;;  %v3741_v54 = vshrl.u32 %v3726_v5, 16  ;;  %v4710_v20 = vmul.f32 %v9046_v27, %v8897_v44  ;;  %v4707_v14 = vmul.f32 %v9058_v28, %v9029_v11 }
 0x877   : > { %v3724_v51 = vsel %vm1648_vm5, %v3723_v7, %v3706_v25  ;;  %v3727_v55 = vrot.slane %v3722_v36, 4  ;;  %v3730_v34 = vsel %vm1648_vm5, %v3722_v36, %v3729_v15  ;;  %v4708_v38 = vmul.f32 %v9054_v24, %v8938_v35 }
 0x878   : > { %v3733_v29 = vpack.i.b16 %v3724_v51, %v3668_v33  ;;  %v3735_v56 = vshrl.u32 %v3724_v51, 16  ;;  %v3742_v23 = vpack.i.b16 %v3741_v54, %v3740_v46  ;;  %v3751_v2 = vpack.i.b16 %v3730_v34, %v3674_v61  ;;  %7000 = vmatmul.msk.bf16.vlgmr.msrb.gmra.mxu2 %vm2152_vm4, %v3739_v43 }
 0x879   : > { %v3728_v59 = vsel %vm1648_vm5, %v3727_v55, %v3710_v32  ;;  %v3753_v45 = vshrl.u32 %v3730_v34, 16  ;;  %4774 = vmatpush.bf16.msrb.mxu2 %v4765_v42  ;;  %v4717_v32 = vpack.c.bf16 %v4709_v62, %v4709_v62  ;;  %v4715_v31 = vpack.c.bf16 %v4707_v14, %v4707_v14  ;;  %v7103_v62 = vld [vmem:[%s10464_s5 + $0x178] sm:$0xff] }
 0x87a   : > { %v3747_v41 = vshrl.u32 %v3728_v59, 16  ;;  %6998 = vmatmul.msk.bf16.vlgmr.msrb.gmra.mxu0 %vm2152_vm4, %v3733_v29  ;;  %7001 = vmatmul.msk.bf16.vlgmr.msrb.gmra.mxu3 %vm2152_vm4, %v3742_v23  ;;  %v3736_v25 = vpack.i.b16 %v3735_v56, %v3734_v53  ;;  %v3745_v33 = vpack.i.b16 %v3728_v59, %v3672_v50  ;;  %v4718_v50 = vpack.c.bf16 %v4710_v20, %v4710_v20  ;;  %v7068_v20 = vld [vmem:[%s10464_s5 + $0xc0] sm:$0xff] }
 0x87b   : > { %4736 = vmatpush.bf16.msrb.mxu0 %v4727_v9  ;;  %4793 = vmatpush.bf16.msrb.mxu3 %v4784_v16  ;;  %v3754_v47 = vpack.i.b16 %v3753_v45, %v3752_v19  ;;  %v4716_v48 = vpack.c.bf16 %v4708_v38, %v4708_v38  ;;  %v4713_v22 = vmul.f32 %v9035_v40, %v8891_v1  ;;  %v4976_v16 = vld [vmem:[%s10464_s5 + $0x38] sm:$0xff]  ;;  %v7120_v38 = vld [vmem:[%s10464_s5 + $0x1b0] sm:$0xff] }
 0x87c   : > { %6999 = vmatmul.msk.bf16.vlgmr.msrb.gmra.mxu1 %vm2152_vm4, %v3736_v25  ;;  %v3748_v61 = vpack.i.b16 %v3747_v41, %v3746_v21  ;;  %v4714_v44 = vmul.f32 %v9033_v18, %v8861_v13  ;;  %v4711_v35 = vmul.f32 %v9017_v3, %v8876_v30  ;;  %v4712_v4 = vmul.f32 %v9013_v58, %v8869_v10  ;;  %v7032_v21 = vld [vmem:[%s10464_s5 + $0x40] sm:$0xff]  ;;  %v4975_v41 = vld [vmem:[%s10464_s5 + $0x30] sm:$0xff]  ;;  %v7039_v25 = vld [vmem:[%s10464_s5 + $0x78] sm:$0xff] }
 0x87d   : > { %4755 = vmatpush.bf16.msrb.mxu1 %v4746_v49  ;;  %v4721_v11 = vpack.c.bf16 %v4713_v22, %v4713_v22  ;;  %v7057_v49 = vld [vmem:[%s10464_s5 + $0xb8] sm:$0xff] }
 0x87e   : > { %v4722_v27 = vpack.c.bf16 %v4714_v44, %v4714_v44  ;;  %v4719_v60 = vpack.c.bf16 %v4711_v35, %v4711_v35  ;;  %v4720_v24 = vpack.c.bf16 %v4712_v4, %v4712_v4  ;;  %v7290_v44 = vld [vmem:[%s10462_s3 + $0x8] sm:$0xff]  ;;  %v7289_v35 = vld [vmem:[%s10462_s3] sm:$0xff]  ;;  %v7138_v4 = vld [vmem:[%s10464_s5 + $0x1f0] sm:$0xff] }
 0x888   : > { %7004 = vmatmul.msk.bf16.vlgmr.msra.gmra.mxu2 %vm2152_vm4, %v3751_v2 }
 0x889   : > { %4850 = vmatpush.bf16.msra.mxu2 %v4841_v57  ;;  %v7074_v57 = vld [vmem:[%s10464_s5 + $0xf0] sm:$0xff] }
 0x88a   : > { %7002 = vmatmul.msk.bf16.vlgmr.msra.gmra.mxu0 %vm2152_vm4, %v3745_v33  ;;  %7005 = vmatmul.msk.bf16.vlgmr.msra.gmra.mxu3 %vm2152_vm4, %v3754_v47  ;;  %v4969_v33 = vld [vmem:[%s10464_s5] sm:$0xff]  ;;  %v7056_v47 = vld [vmem:[%s10464_s5 + $0xb0] sm:$0xff] }
 0x88b   : > { %4812 = vmatpush.bf16.msra.mxu0 %v4803_v0  ;;  %4869 = vmatpush.bf16.msra.mxu3 %v4860_v6  ;;  %v7075_v0 = vld [vmem:[%s10464_s5 + $0xf8] sm:$0xff]  ;;  %v7050_v6 = vld [vmem:[%s10464_s5 + $0x80] sm:$0xff] }
 0x88c   : > { %7003 = vmatmul.msk.bf16.vlgmr.msra.gmra.mxu1 %vm2152_vm4, %v3748_v61  ;;  %v7038_v61 = vld [vmem:[%s10464_s5 + $0x70] sm:$0xff] }
 0x88d   : > { %4831 = vmatpush.bf16.msra.mxu1 %v4822_v63  ;;  %v7102_v63 = vld [vmem:[%s10464_s5 + $0x170] sm:$0xff] }
 0x898   : > { %7008 = vmatmul.msk.bf16.vlgmr.msrb.gmra.mxu2 %vm2152_vm4, %v4717_v32  ;;  %v7121_v32 = vld [vmem:[%s10464_s5 + $0x1b8] sm:$0xff] }
 0x89a   : > { %7006 = vmatmul.msk.bf16.vlgmr.msrb.gmra.mxu0 %vm2152_vm4, %v4715_v31  ;;  %7009 = vmatmul.msk.bf16.vlgmr.msrb.gmra.mxu3 %vm2152_vm4, %v4718_v50  ;;  %v7096_v50 = vld [vmem:[%s10464_s5 + $0x140] sm:$0xff] }
 0x89b   : > { %4947 = vmatpush.bf16.msrb.mxu0 %v7289_v35 }
 0x89c   : > { %7007 = vmatmul.msk.bf16.vlgmr.msrb.gmra.mxu1 %vm2152_vm4, %v4716_v48 }
 0x89d   : > { %5057 = vmatpush.bf16.msrb.mxu1 %v7290_v44 }
 0x8a8   : > { %7012 = vmatmul.msk.bf16.vlgmr.msra.gmra.mxu2 %vm2152_vm4, %v4721_v11  ;;  %v7139_v11 = vld [vmem:[%s10464_s5 + $0x1f8] sm:$0xff] }
 0x8aa   : > { %7010 = vmatmul.msk.bf16.vlgmr.msra.gmra.mxu0 %vm2152_vm4, %v4719_v60  ;;  %7013 = vmatmul.msk.bf16.vlgmr.msra.gmra.mxu3 %vm2152_vm4, %v4722_v27  ;;  %v7114_v60 = vld [vmem:[%s10464_s5 + $0x180] sm:$0xff] }
 0x8ac   : > { %7011 = vmatmul.msk.bf16.vlgmr.msra.gmra.mxu1 %vm2152_vm4, %v4720_v24  ;;  %v7291_v24 = vld [vmem:[%s10462_s3 + $0x10] sm:$0xff] }
 0x8ad   : > { %5191 = vmatpush.bf16.msrb.mxu2 %v7291_v24 }
 0x8f7   : > { %v4194_v1 = vpop.f32.mrf.mxu0 }
 0x8f8   : > { %4339 = vxpose.xlu0.b32.start [1/2] (short) (narrow) %v4194_v1, 8  ;;  %v7292_v1 = vld [vmem:[%s10462_s3 + $0x18] sm:$0xff] }
 0x8f9   : > { %v4214_v13 = vpop.f32.mrf.mxu1  ;;  %5309 = vmatpush.bf16.msrb.mxu3 %v7292_v1 }
 0x8fb   : > { %v4234_v18 = vpop.f32.mrf.mxu2 }
 0x8fc   : > { %4403 = vxpose.xlu1.b32.start [1/2] (short) (narrow) %v4234_v18, 8 }
 0x8fd   : > { %v4254_v30 = vpop.f32.mrf.mxu3 }
 0x8ff   : > { %v4196_v3 = vpop.f32.mrf.mxu0 }
 0x900   : > { %4340 = vxpose.xlu0.b32.end [2/2] (short) (narrow) %v4196_v3, 8 }
 0x901   : > { %v4216_v10 = vpop.f32.mrf.mxu1 }
 0x903   : > { %v4236_v58 = vpop.f32.mrf.mxu2 }
 0x904   : > { %4404 = vxpose.xlu1.b32.end [2/2] (short) (narrow) %v4236_v58, 8 }
 0x905   : > { %v4256_v40 = vpop.f32.mrf.mxu3 }
 0x907   : > { %v4274_v28 = vpop.f32.mrf.mxu0 }
 0x908   : > { %4371 = vxpose.xlu0.b32.start [1/2] (short) (narrow) %v4214_v13, 8 }
 0x909   : > { %v4294_v12 = vpop.f32.mrf.mxu1 }
 0x90b   : > { %v4314_v26 = vpop.f32.mrf.mxu2 }
 0x90c   : > { %4467 = vxpose.xlu1.b32.start [1/2] (short) (narrow) %v4274_v28, 8 }
 0x90d   : > { %v4334_v39 = vpop.f32.mrf.mxu3 }
 0x90e   : > { %4563 = vxpose.xlu2.b32.start [1/2] (short) (narrow) %v4334_v39, 8 }
 0x90f   : > { %v4276_v9 = vpop.f32.mrf.mxu0 }
 0x910   : > { %4372 = vxpose.xlu0.b32.end [2/2] (short) (narrow) %v4216_v10, 8 }
 0x911   : > { %v4296_v15 = vpop.f32.mrf.mxu1 }
 0x913   : > { %v4316_v36 = vpop.f32.mrf.mxu2 }
 0x914   : > { %4468 = vxpose.xlu1.b32.end [2/2] (short) (narrow) %v4276_v9, 8 }
 0x915   : > { %v4336_v7 = vpop.f32.mrf.mxu3 }
 0x916   : > { %4564 = vxpose.xlu2.b32.end [2/2] (short) (narrow) %v4336_v7, 8 }
 0x917   : > { %v9240_v5 = vpop.f32.mrf.mxu0 }
 0x918   : > { %4499 = vxpose.xlu0.b32.start [1/2] (short) (narrow) %v4294_v12, 8 }
 0x919   : > { %v9242_v46 = vpop.f32.mrf.mxu1 }
 0x91b   : > { %v9244_v43 = vpop.f32.mrf.mxu2 }
 0x91c   : > { %4531 = vxpose.xlu1.b32.start [1/2] (short) (narrow) %v4314_v26, 8 }
 0x91d   : > { %v9246_v54 = vpop.f32.mrf.mxu3 }
 0x91e   : > { %4435 = vxpose.xlu2.b32.start [1/2] (short) (narrow) %v4254_v30, 8 }
 0x91f   : > { %v4740_v42 = vpop.f32.mrf.mxu0 }
 0x920   : > { %4500 = vxpose.xlu0.b32.end [2/2] (short) (narrow) %v4296_v15, 8  ;;  %v7156_v15 = vld [vmem:[%s10464_s5 + $0x230] sm:$0xff]  ;;  %v7132_v42 = vld [vmem:[%s10464_s5 + $0x1c0] sm:$0xff] }
 0x921   : > { %v4759_v53 = vpop.f32.mrf.mxu1 }
 0x923   : > { %v4778_v51 = vpop.f32.mrf.mxu2 }
 0x924   : > { %4532 = vxpose.xlu1.b32.end [2/2] (short) (narrow) %v4316_v36, 8  ;;  %v7157_v36 = vld [vmem:[%s10464_s5 + $0x238] sm:$0xff] }
 0x925   : > { %v4797_v55 = vpop.f32.mrf.mxu3 }
 0x926   : > { %4436 = vxpose.xlu2.b32.end [2/2] (short) (narrow) %v4256_v40, 8 }
 0x927   : > { %v9248_v34 = vpop.f32.mrf.mxu0 }
 0x929   : > { %v9250_v29 = vpop.f32.mrf.mxu1 }
 0x92b   : > { %v9252_v56 = vpop.f32.mrf.mxu2 }
 0x92d   : > { %v9254_v23 = vpop.f32.mrf.mxu3 }
 0x92f   : > { %v4816_v2 = vpop.f32.mrf.mxu0 }
 0x931   : > { %v4835_v19 = vpop.f32.mrf.mxu1 }
 0x933   : > { %v4854_v59 = vpop.f32.mrf.mxu2 }
 0x935   : > { %v4873_v45 = vpop.f32.mrf.mxu3 }
 0x97e   : > { %5014 = vperm.xlu1 %7365, %v4976_v16  }
 0x986   : > { %5089 = vperm.xlu1 %7365, %v7032_v21  }
 0x98e   : > { %5009 = vperm.xlu0 %7364, %v4975_v41   ;;  %5124 = vperm.xlu1 %7365, %v7039_v25  }
 0x98f   : > { %4979 = vperm.xlu2 %7366, %v4969_v33  }
 0x996   : > { %5253 = vperm.xlu0 %7364, %v7056_v47   ;;  %5258 = vperm.xlu1 %7365, %v7057_v49  }
 0x997   : > { %5119 = vperm.xlu2 %7366, %v7038_v61  }
 0x99c   : > { %v4355_v14 = vpop.trf.xlu0 }
 0x99d   : > { %v4597_v27 = vrot.slane %v4355_v14, 4 }
 0x99e   : > { %5371 = vperm.xlu0 %7364, %v7074_v57   ;;  %5376 = vperm.xlu1 %7365, %v7075_v0  }
 0x99f   : > { %5223 = vperm.xlu2 %7366, %v7050_v6  }
 0x9a0   : > { %v4419_v48 = vpop.trf.xlu1 }
 0x9a1   : > { %v4595_v30 = vrot.slane %v4419_v48, 4  ;;  %v4598_v10 = vsel %vm1648_vm5, %v4419_v48, %v4597_v27  ;;  %v7150_v48 = vld [vmem:[%s10464_s5 + $0x200] sm:$0xff] }
 0x9a2   : > { %v4606_v26 = vperm.slane %v4598_v10, %v8604_v17 }
 0x9a3   : > { %v4596_v12 = vsel %vm1648_vm5, %v4595_v30, %v4355_v14  ;;  %v7033_v14 = vld [vmem:[%s10464_s5 + $0x48] sm:$0xff] }
 0x9a4   : > { %v4602_v2 = vperm.slane %v4596_v12, %v8604_v17  ;;  %v4657_v59 = vrot.slane %v4606_v26, 4 }
 0x9a6   : > { %5551 = vperm.xlu0 %7364, %v7102_v63   ;;  %5556 = vperm.xlu1 %7365, %v7103_v62   ;;  %v4645_v44 = vrot.slane %v4602_v2, 4 }
 0x9a7   : > { %5341 = vperm.xlu2 %7366, %v7068_v20   ;;  %v4579_v31 = vpop.trf.xlu2  ;;  %v4971_v20 = vld [vmem:[%s10464_s5 + $0x10] sm:$0xff] }
 0x9a8   : > { %v4631_v39 = vrot.slane %v4579_v31, 4 }
 0x9ac   : > { %v4387_v22 = vpop.trf.xlu0 }
 0x9ad   : > { %v4609_v13 = vrot.slane %v4387_v22, 4 }
 0x9ae   : > { %5653 = vperm.xlu0 %7364, %v7120_v38   ;;  %5658 = vperm.xlu1 %7365, %v7121_v32  }
 0x9af   : > { %5521 = vperm.xlu2 %7366, %v7096_v50  }
 0x9b0   : > { %v4483_v18 = vpop.trf.xlu1 }
 0x9b1   : > { %v4621_v45 = vrot.slane %v4483_v18, 4 }
 0x9b6   : > { %5755 = vperm.xlu0 %7364, %v7138_v4   ;;  %5760 = vperm.xlu1 %7365, %v7139_v11  }
 0x9b7   : > { %5623 = vperm.xlu2 %7366, %v7114_v60   ;;  %v4451_v3 = vpop.trf.xlu2 }
 0x9b8   : > { %v4607_v58 = vrot.slane %v4451_v3, 4  ;;  %v4610_v28 = vsel %vm1648_vm5, %v4451_v3, %v4609_v13 }
 0x9b9   : > { %v4618_v53 = vperm.slane %v4610_v28, %v8604_v17 }
 0x9ba   : > { %v4608_v40 = vsel %vm1648_vm5, %v4607_v58, %v4387_v22 }
 0x9bb   : > { %v4614_v9 = vperm.slane %v4608_v40, %v8604_v17  ;;  %v4658_v33 = vsel %vm1648_vm5, %v4618_v53, %v4657_v59  ;;  %v4655_v6 = vrot.slane %v4618_v53, 4  ;;  %v4883_v53 = vstv %s9362_s27 }
 0x9bc   : > { %v4515_v7 = vpop.trf.xlu0  ;;  %v4666_v38 = vperm.slane %v4658_v33, %v8614_v52 }
 0x9bd   : > { %v4643_v51 = vrot.slane %v4614_v9, 4  ;;  %v4632_v55 = vsel %vm1648_vm5, %v4631_v39, %v4515_v7  ;;  %v4633_v19 = vrot.slane %v4515_v7, 4  ;;  %v4656_v27 = vsel %vm1648_vm5, %v4655_v6, %v4606_v26  ;;  %v7051_v7 = vld [vmem:[%s10464_s5 + $0x88] sm:$0xff] }
 0x9be   : > { %5857 = vperm.xlu0 %7364, %v7156_v15   ;;  %5862 = vperm.xlu1 %7365, %v7157_v36   ;;  %v4638_v41 = vperm.slane %v4632_v55, %v8604_v17  ;;  %v4646_v1 = vsel %vm1648_vm5, %v4614_v9, %v4645_v44  ;;  %v4705_v13 = vrot.slane %v4666_v38, 4  ;;  %v4662_v28 = vperm.slane %v4656_v27, %v8614_v52 }
 0x9bf   : > { %5725 = vperm.xlu2 %7366, %v7132_v42   ;;  %v4644_v16 = vsel %vm1648_vm5, %v4643_v51, %v4602_v2  ;;  %v4634_v21 = vsel %vm1648_vm5, %v4579_v31, %v4633_v19  ;;  %v4654_v39 = vperm.slane %v4646_v1, %v8614_v52  ;;  %v7052_v42 = vld [vmem:[%s10464_s5 + $0x90] sm:$0xff] }
 0x9c0   : > { %v4547_v25 = vpop.trf.xlu1  ;;  %v4642_v47 = vperm.slane %v4634_v21, %v8604_v17  ;;  %v4650_v0 = vperm.slane %v4644_v16, %v8614_v52  ;;  %v4667_v32 = vrot.slane %v4638_v41, 4  ;;  %v4701_v59 = vrot.slane %v4662_v28, 4 }
 0x9c1   : > { %v4619_v49 = vrot.slane %v4547_v25, 4  ;;  %v4622_v61 = vsel %vm1648_vm5, %v4547_v25, %v4621_v45 }
 0x9c2   : > { %v4630_v57 = vperm.slane %v4622_v61, %v8604_v17  ;;  %v4679_v63 = vrot.slane %v4642_v47, 4  ;;  %v4693_v60 = vrot.slane %v4650_v0, 4  ;;  %v10574_v61 = vld [vmem:[#allocation19_spill] sm:$0xff] }
 0x9c3   : > { %v4620_v62 = vsel %vm1648_vm5, %v4619_v49, %v4483_v18 }
 0x9c4   : > { %v4626_v50 = vperm.slane %v4620_v62, %v8604_v17  ;;  %v4681_v31 = vrot.slane %v4630_v57, 4  ;;  %v4680_v22 = vsel %vm1648_vm5, %v4679_v63, %v4630_v57  ;;  %v10575_v57 = vmax.f32 %v10574_v61, 0.0  ;;  %v10576_v63 = vld [vmem:[#allocation20_spill] sm:$0xff] }
 0x9c5   : > { %v4686_v30 = vperm.slane %v4680_v22, %v8614_v52  ;;  %v10577_v62 = vmax.f32 %v10576_v63, 0.0  ;;  %v7070_v22 = vld [vmem:[%s10464_s5 + $0xd0] sm:$0xff] }
 0x9c6   : > { %v4668_v35 = vsel %vm1648_vm5, %v4667_v32, %v4626_v50  ;;  %v4669_v4 = vrot.slane %v4626_v50, 4  ;;  %v4682_v11 = vsel %vm1648_vm5, %v4642_v47, %v4681_v31  ;;  %4989 = vperm.xlu0 %7364, %v4971_v20   ;;  %5094 = vperm.xlu1 %7365, %v7033_v14  }
 0x9c7   : > { %v4674_v17 = vperm.slane %v4668_v35, %v8614_v52  ;;  %v4690_v24 = vperm.slane %v4682_v11, %v8614_v52  ;;  %5827 = vperm.xlu2 %7366, %v7150_v48   ;;  %v4699_v51 = vrot.slane %v4686_v30, 4  ;;  %v4702_v47 = vsel %vm1648_vm5, %v4686_v30, %v4701_v59  ;;  %v7034_v11 = vld [vmem:[%s10464_s5 + $0x50] sm:$0xff] }
 0x9c8   : > { %v4670_v18 = vsel %vm1648_vm5, %v4638_v41, %v4669_v4  ;;  %v4697_v41 = vrot.slane %v4654_v39, 4 }
 0x9c9   : > { %v4678_v3 = vperm.slane %v4670_v18, %v8614_v52  ;;  %v4691_v10 = vrot.slane %v4674_v17, 4  ;;  %v4694_v58 = vsel %vm1648_vm5, %v4674_v17, %v4693_v60  ;;  %v4703_v40 = vrot.slane %v4690_v24, 4  ;;  %v4970_v52 = vld [vmem:[%s10464_s5 + $0x8] sm:$0xff] }
 0x9ca   : > { %v4706_v12 = vsel %vm1648_vm5, %v4690_v24, %v4705_v13  ;;  %v4876_v26 = vadd.f32 %v9242_v46, %v4694_v58 }
 0x9cb   : > { %v4692_v9 = vsel %vm1648_vm5, %v4691_v10, %v4650_v0  ;;  %v4695_v15 = vrot.slane %v4678_v3, 4  ;;  %v4704_v36 = vsel %vm1648_vm5, %v4703_v40, %v4666_v38  ;;  %v4882_v2 = vadd.f32 %v9254_v23, %v4706_v12  ;;  %v10579_v40 = vld [vmem:[#allocation16_spill] sm:$0xff] }
 0x9cc   : > { %v4875_v55 = vadd.f32 %v9240_v5, %v4692_v9  ;;  %v4881_v46 = vadd.f32 %v9252_v56, %v4704_v36  ;;  %v4885_v19 = vmul.f32 %v4883_v53, %v4876_v26  ;;  %v10572_v5 = vmax.f32 %v8389_v8, 0.0  ;;  %v7115_v26 = vld [vmem:[%s10464_s5 + $0x188] sm:$0xff]  ;;  %v10581_v9 = vld [vmem:[#allocation9_spill] sm:$0xff] }
 0x9cd   : > { %v4696_v21 = vsel %vm1648_vm5, %v4695_v15, %v4654_v39  ;;  %v4891_v25 = vmul.f32 %v4883_v53, %v4882_v2  ;;  %v4700_v56 = vsel %vm1648_vm5, %v4699_v51, %v4662_v28  ;;  %v10573_v23 = vmax.f32 %v8381_v37, 0.0  ;;  %v7116_v39 = vld [vmem:[%s10464_s5 + $0x190] sm:$0xff] }
 0x9ce   : > { %v4884_v45 = vmul.f32 %v4883_v53, %v4875_v55  ;;  %v4890_v16 = vmul.f32 %v4883_v53, %v4881_v46  ;;  %5228 = vperm.xlu0 %7364, %v7051_v7   ;;  %5233 = vperm.xlu1 %7365, %v7052_v42   ;;  %v9401_v33 = vadd.f32 %v4885_v19, %v10572_v5  ;;  %v10580_v28 = vmax.f32 %v10579_v40, 0.0  ;;  %v7069_v7 = vld [vmem:[%s10464_s5 + $0xc8] sm:$0xff]  ;;  %v10583_v42 = vld [vmem:[#allocation17_spill] sm:$0xff]  ;;  %v10585_v55 = vld [vmem:[#allocation10_spill] sm:$0xff] }
 0x9cf   : > { %4984 = vperm.xlu2 %7366, %v4970_v52   ;;  %v4698_v6 = vsel %vm1648_vm5, %v4678_v3, %v4697_v41  ;;  %v9416_v8 = vadd.f32 %v4891_v25, %v10577_v62  ;;  %v4877_v14 = vadd.f32 %v9244_v43, %v4696_v21  ;;  %v4879_v31 = vadd.f32 %v9248_v34, %v4700_v56  ;;  %v7097_v43 = vld [vmem:[%s10464_s5 + $0x148] sm:$0xff]  ;;  %v7134_v56 = vld [vmem:[%s10464_s5 + $0x1d0] sm:$0xff] }
 0x9d0   : > { %v9407_v49 = vadd.f32 %v4884_v45, %v10573_v23  ;;  %v9411_v0 = vadd.f32 %v4890_v16, %v10575_v57  ;;  %v5144_v20 = vrot.slane %v9401_v33, 1  ;;  %v4901_v50 = vrot.slane %v9401_v33, 7 }
 0x9d1   : > { %v4907_v44 = vrot.slane %v9416_v8, 7  ;;  %v5150_v35 = vrot.slane %v9416_v8, 1  ;;  %v4878_v4 = vadd.f32 %v9246_v54, %v4698_v6  ;;  %v4880_v34 = vadd.f32 %v9250_v29, %v4702_v47  ;;  %v7151_v47 = vld [vmem:[%s10464_s5 + $0x208] sm:$0xff]  ;;  %v7098_v6 = vld [vmem:[%s10464_s5 + $0x150] sm:$0xff] }
 0x9d2   : > { %v4900_v38 = vrot.slane %v9407_v49, 7  ;;  %v4906_v37 = vrot.slane %v9411_v0, 7  ;;  %v5143_v32 = vrot.slane %v9407_v49, 1  ;;  %v9427_v48 = vpack.c.bf16 %v9407_v49, %v9416_v8 }
 0x9d3   : > { %v4886_v1 = vmul.f32 %v4883_v53, %v4877_v14  ;;  %v4888_v3 = vmul.f32 %v4883_v53, %v4879_v31  ;;  %v4887_v10 = vmul.f32 %v4883_v53, %v4878_v4  ;;  %v4889_v58 = vmul.f32 %v4883_v53, %v4880_v34  ;;  %v7133_v31 = vld [vmem:[%s10464_s5 + $0x1c8] sm:$0xff]  ;;  %v7293_v34 = vld [vmem:[%s10462_s3 + $0x20] sm:$0xff] }
 0x9d4   : > { %v9444_v60 = vsel %vm620_vm2, %v5143_v32, %v5144_v20  ;;  %v4914_v17 = vsel %vm326_vm0, %v4900_v38, %v4901_v50  ;;  %7028 = vmatmul.msk.bf16.vlgmr.msrb.gmra.mxu1 %vm1565_vm3, %v9427_v48  ;;  %v9454_v54 = vsel %vm326_vm0, %v4906_v37, %v4907_v44  ;;  %v4915_v29 = vsel %vm326_vm0, %v4907_v44, %v4900_v38  ;;  %v7294_v4 = vld [vmem:[%s10462_s3 + $0x28] sm:$0xff] }
 0x9d5   : > { %v9462_v24 = vsel %vm620_vm2, %v5150_v35, %v5143_v32  ;;  %v9465_v13 = vpack.c.bf16 %v4915_v29, %v9454_v54  ;;  %v5277_v30 = vpack.c.bf16 %v4914_v17, %v4915_v29  ;;  %v9478_v12 = vadd.f32 %v4886_v1, %v10580_v28  ;;  %v4972_v32 = vld [vmem:[%s10464_s5 + $0x18] sm:$0xff]  ;;  %v7036_v29 = vld [vmem:[%s10464_s5 + $0x60] sm:$0xff]  ;;  %5489 = vmatpush.bf16.msra.mxu1 %v7294_v4 }
 0x9d6   : > { %5351 = vperm.xlu0 %7364, %v7070_v22   ;;  %5526 = vperm.xlu1 %7365, %v7097_v43   ;;  %v9469_v18 = vpack.c.bf16 %v9444_v60, %v9462_v24  ;;  %v10582_v15 = vmax.f32 %v10581_v9, 0.0  ;;  %v10584_v53 = vmax.f32 %v10583_v42, 0.0  ;;  %v10586_v46 = vmax.f32 %v10585_v55, 0.0  ;;  %v7053_v1 = vld [vmem:[%s10464_s5 + $0x98] sm:$0xff] }
 0x9d7   : > { %5099 = vperm.xlu2 %7366, %v7034_v11   ;;  %7018 = vmatmul.msk.bf16.vlgmr.msrb.gmra.mxu0 %vm1565_vm3, %v9465_v13  ;;  %v5395_v2 = vpack.c.bf16 %v9401_v33, %v9407_v49  ;;  %v4902_v59 = vrot.slane %v9478_v12, 7  ;;  %v5145_v45 = vrot.slane %v9478_v12, 1  ;;  %v5398_v21 = vpack.c.bf16 %v9416_v8, %v9411_v0  ;;  %v7153_v49 = vld [vmem:[%s10464_s5 + $0x218] sm:$0xff] }
 0x9d8   : > { %7046 = vmatmul.msk.bf16.vlgmr.msrb.gmra.mxu2 %vm1565_vm3, %v9469_v18  ;;  %7064 = vmatmul.msk.bf16.vlgmr.msrb.gmra.mxu3 %vm1565_vm3, %v5277_v30  ;;  %v9488_v36 = vadd.f32 %v4888_v3, %v10582_v15  ;;  %v9495_v51 = vadd.f32 %v4887_v10, %v10584_v53  ;;  %v9499_v52 = vadd.f32 %v4889_v58, %v10586_v46  ;;  %v7152_v10 = vld [vmem:[%s10464_s5 + $0x210] sm:$0xff]  ;;  %v7071_v46 = vld [vmem:[%s10464_s5 + $0xd8] sm:$0xff] }
 0x9d9   : > { %v9515_v5 = vpack.c.bf16 %v9478_v12, %v9401_v33  ;;  %v4913_v23 = vsel %vm326_vm0, %v4901_v50, %v4902_v59  ;;  %v9531_v57 = vsel %vm620_vm2, %v5144_v20, %v5145_v45  ;;  %v4973_v50 = vld [vmem:[%s10464_s5 + $0x20] sm:$0xff]  ;;  %5427 = vmatpush.bf16.msra.mxu0 %v7293_v34  ;;  %v7073_v33 = vld [vmem:[%s10464_s5 + $0xe8] sm:$0xff] }
 0x9da   : > { %v5396_v19 = vpack.c.bf16 %v9495_v51, %v9478_v12  ;;  %v5397_v16 = vpack.c.bf16 %v9499_v52, %v9488_v36  ;;  %v5146_v41 = vrot.slane %v9495_v51, 1  ;;  %v4903_v25 = vrot.slane %v9495_v51, 7 }
 0x9db   : > { %v9540_v62 = vpack.c.bf16 %v4913_v23, %v4914_v17  ;;  %v5147_v44 = vrot.slane %v9488_v36, 1  ;;  %v4904_v11 = vrot.slane %v9488_v36, 7  ;;  %v9576_v17 = vpack.c.bf16 %v9488_v36, %v9495_v51 }
 0x9dc   : > { %v9527_v61 = vsel %vm620_vm2, %v5145_v45, %v5146_v41  ;;  %v4912_v63 = vsel %vm326_vm0, %v4902_v59, %v4903_v25  ;;  %v5148_v30 = vrot.slane %v9499_v52, 1  ;;  %v4905_v40 = vrot.slane %v9499_v52, 7  ;;  %v7072_v59 = vld [vmem:[%s10464_s5 + $0xe0] sm:$0xff]  ;;  %v7035_v45 = vld [vmem:[%s10464_s5 + $0x58] sm:$0xff] }
 0x9dd   : > { %v9544_v14 = vpack.c.bf16 %v9527_v61, %v9531_v57  ;;  %v5278_v20 = vpack.c.bf16 %v4912_v63, %v4913_v23  ;;  %v9587_v3 = vsel %vm620_vm2, %v5146_v41, %v5147_v44  ;;  %v4911_v58 = vsel %vm326_vm0, %v4903_v25, %v4904_v11 }
 0x9de   : > { %5628 = vperm.xlu0 %7364, %v7115_v26   ;;  %5633 = vperm.xlu1 %7365, %v7116_v39   ;;  %v9599_v28 = vsel %vm620_vm2, %v5147_v44, %v5148_v30  ;;  %v7295_v26 = vld [vmem:[%s10462_s3 + $0x30] sm:$0xff]  ;;  %v9604_v39 = vpack.c.bf16 %v4911_v58, %v4912_v63  ;;  %v4910_v15 = vsel %vm326_vm0, %v4904_v11, %v4905_v40  ;;  %v5149_v41 = vrot.slane %v9411_v0, 1  ;;  %v7117_v63 = vld [vmem:[%s10464_s5 + $0x198] sm:$0xff] }
 0x9df   : > { %5346 = vperm.xlu2 %7366, %v7069_v7   ;;  %v9608_v9 = vpack.c.bf16 %v9599_v28, %v9587_v3  ;;  %v7296_v7 = vld [vmem:[%s10462_s3 + $0x38] sm:$0xff]  ;;  %v5279_v42 = vpack.c.bf16 %v4910_v15, %v4911_v58  ;;  %5591 = vmatpush.bf16.msra.mxu2 %v7295_v26  ;;  %v9642_v23 = vpack.c.bf16 %v9411_v0, %v9499_v52  ;;  %v4974_v26 = vld [vmem:[%s10464_s5 + $0x28] sm:$0xff] }
 0x9e0   : > { %5693 = vmatpush.bf16.msra.mxu3 %v7296_v7  ;;  %v7135_v11 = vld [vmem:[%s10464_s5 + $0x1d8] sm:$0xff]  ;;  %v5457_v58 = vpack.c.bf16 %v9531_v57, %v9444_v60 }
 0x9e4   : > { %7029 = vmatmul.msk.bf16.gmra.mxu1 %vm1565_vm3, %v9515_v5 }
 0x9e6   : > { %5735 = vperm.xlu0 %7364, %v7134_v56   ;;  %5832 = vperm.xlu1 %7365, %v7151_v47  }
 0x9e7   : > { %5531 = vperm.xlu2 %7366, %v7098_v6   ;;  %7019 = vmatmul.msk.bf16.gmra.mxu0 %vm1565_vm3, %v9540_v62  ;;  %v7100_v6 = vld [vmem:[%s10464_s5 + $0x160] sm:$0xff] }
 0x9e8   : > { %7047 = vmatmul.msk.bf16.gmra.mxu2 %vm1565_vm3, %v9544_v14  ;;  %7065 = vmatmul.msk.bf16.gmra.mxu3 %vm1565_vm3, %v5278_v20  ;;  %v4909_v20 = vsel %vm326_vm0, %v4905_v40, %v4906_v37  ;;  %v7154_v40 = vld [vmem:[%s10464_s5 + $0x220] sm:$0xff] }
 0x9e9   : > { %v9551_v38 = vpop.permute.xlu2 %4979  ;;  %v9669_v37 = vpack.c.bf16 %v4909_v20, %v4910_v15  ;;  %v7118_v15 = vld [vmem:[%s10464_s5 + $0x1a0] sm:$0xff] }
 0x9ea   : > { %10587 = vst [vmem:[#allocation19_spill] sm:$0xff] %v9551_v38 }
 0x9ee   : > { %4994 = vperm.xlu0 %7364, %v4972_v32   ;;  %4999 = vperm.xlu1 %7365, %v4973_v50   ;;  %v9658_v32 = vsel %vm620_vm2, %v5149_v41, %v5150_v35  ;;  %v9662_v50 = vsel %vm620_vm2, %v5148_v30, %v5149_v41  ;;  %v5280_v35 = vpack.c.bf16 %v9454_v54, %v4909_v20  ;;  %v7136_v54 = vld [vmem:[%s10464_s5 + $0x1e0] sm:$0xff]  ;;  %v7037_v41 = vld [vmem:[%s10464_s5 + $0x68] sm:$0xff] }
 0x9ef   : > { %5730 = vperm.xlu2 %7366, %v7133_v31   ;;  %v7054_v31 = vld [vmem:[%s10464_s5 + $0xa0] sm:$0xff]  ;;  %v9673_v44 = vpack.c.bf16 %v9658_v32, %v9662_v50 }
 0x9f0   : > { %v9562_v22 = vpop.permute.xlu1 %5014 }
 0x9f1   : > { %10588 = vst [vmem:[#allocation20_spill] sm:$0xff] %v9562_v22  ;;  %v9564_v43 = vpop.permute.xlu2 %5119 }
 0x9f2   : > { %10589 = vst [vmem:[#allocation6_spill] sm:$0xff] %v9564_v43 }
 0x9f4   : > { %7030 = vmatmul.msk.bf16.gmra.mxu1 %vm1565_vm3, %v9576_v17 }
 0x9f6   : > { %5109 = vperm.xlu0 %7364, %v7036_v29   ;;  %5238 = vperm.xlu1 %7365, %v7053_v1   ;;  %v7099_v29 = vld [vmem:[%s10464_s5 + $0x158] sm:$0xff] }
 0x9f7   : > { %5837 = vperm.xlu2 %7366, %v7152_v10   ;;  %7020 = vmatmul.msk.bf16.gmra.mxu0 %vm1565_vm3, %v9604_v39 }
 0x9f8   : > { %7048 = vmatmul.msk.bf16.gmra.mxu2 %vm1565_vm3, %v9608_v9  ;;  %v9619_v53 = vpop.permute.xlu1 %5089  ;;  %7066 = vmatmul.msk.bf16.gmra.mxu3 %vm1565_vm3, %v5279_v42  ;;  %v7055_v42 = vld [vmem:[%s10464_s5 + $0xa8] sm:$0xff] }
 0x9f9   : > { %10590 = vst [vmem:[#allocation16_spill] sm:$0xff] %v9619_v53  ;;  %v9622_v55 = vpop.permute.xlu2 %5223 }
 0x9fa   : > { %10591 = vst [vmem:[#allocation9_spill] sm:$0xff] %v9622_v55 }
 0x9fe   : > { %5356 = vperm.xlu0 %7364, %v7071_v46   ;;  %5361 = vperm.xlu1 %7365, %v7072_v59   ;;  %v5458_v46 = vpack.c.bf16 %v9587_v3, %v9527_v61  ;;  %v7119_v59 = vld [vmem:[%s10464_s5 + $0x1a8] sm:$0xff] }
 0x9ff   : > { %5104 = vperm.xlu2 %7366, %v7035_v45   ;;  %v7137_v45 = vld [vmem:[%s10464_s5 + $0x1e8] sm:$0xff] }
 0xa00   : > { %v9634_v25 = vpop.permute.xlu0 %5009  ;;  %v9636_v56 = vpop.permute.xlu1 %5124 }
 0xa01   : > { %10592 = vst [vmem:[#allocation17_spill] sm:$0xff] %v9634_v25  ;;  %v9638_v47 = vpop.permute.xlu2 %5341 }
 0xa02   : > { %10593 = vst [vmem:[#allocation10_spill] sm:$0xff] %v9636_v56 }
 0xa03   : > { %10594 = vst [vmem:[#allocation21_spill] sm:$0xff] %v9638_v47 }
 0xa04   : > { %7031 = vmatmul.msk.bf16.gmra.mxu1 %vm1565_vm3, %v9642_v23 }
 0xa06   : > { %5541 = vperm.xlu0 %7364, %v7100_v6   ;;  %5638 = vperm.xlu1 %7365, %v7117_v63   ;;  %v7101_v63 = vld [vmem:[%s10464_s5 + $0x168] sm:$0xff] }
 0xa07   : > { %5243 = vperm.xlu2 %7366, %v7054_v31   ;;  %7021 = vmatmul.msk.bf16.gmra.mxu0 %vm1565_vm3, %v9669_v37 }
 0xa08   : > { %7049 = vmatmul.msk.bf16.gmra.mxu2 %vm1565_vm3, %v9673_v44  ;;  %v9680_v4 = vpop.permute.xlu0 %5253  ;;  %v9682_v34 = vpop.permute.xlu1 %5258  ;;  %7067 = vmatmul.msk.bf16.gmra.mxu3 %vm1565_vm3, %v5280_v35 }
 0xa09   : > { %10595 = vst [vmem:[#allocation22_spill] sm:$0xff] %v9680_v4  ;;  %v9694_v1 = vpop.permute.xlu2 %5521 }
 0xa0a   : > { %10596 = vst [vmem:[#allocation23_spill] sm:$0xff] %v9682_v34 }
 0xa0e   : > { %5740 = vperm.xlu0 %7364, %v7135_v11   ;;  %5745 = vperm.xlu1 %7365, %v7136_v54  }
 0xa0f   : > { %5536 = vperm.xlu2 %7366, %v7099_v29  }
 0xa10   : > { %v9696_v30 = vpop.permute.xlu0 %5371  ;;  %v9698_v10 = vpop.permute.xlu1 %5376 }
 0xa11   : > { %10597 = vst [vmem:[#allocation24_spill] sm:$0xff] %v9696_v30  ;;  %v9712_v7 = vpop.permute.xlu2 %5623 }
 0xa12   : > { %10598 = vst [vmem:[#allocation25_spill] sm:$0xff] %v9698_v10 }
 0xa14   : > { %7092 = vmatmul.msk.bf16.vlgmr.msra.gmra.mxu1 %vm1565_vm3, %v5457_v58 }
 0xa16   : > { %5847 = vperm.xlu0 %7364, %v7154_v40   ;;  %5004 = vperm.xlu1 %7365, %v4974_v26  }
 0xa17   : > { %5643 = vperm.xlu2 %7366, %v7118_v15   ;;  %7082 = vmatmul.msk.bf16.vlgmr.msra.gmra.mxu0 %vm1565_vm3, %v5395_v2 }
 0xa18   : > { %7110 = vmatmul.msk.bf16.vlgmr.msra.gmra.mxu2 %vm1565_vm3, %v9540_v62  ;;  %v9720_v60 = vpop.permute.xlu0 %5551  ;;  %v9722_v57 = vpop.permute.xlu1 %5556  ;;  %7128 = vmatmul.msk.bf16.vlgmr.msra.gmra.mxu3 %vm1565_vm3, %v9515_v5 }
 0xa19   : > { %10599 = vst [vmem:[#allocation26_spill] sm:$0xff] %v9720_v60  ;;  %v9739_v5 = vpop.permute.xlu2 %5725 }
 0xa1a   : > { %10600 = vst [vmem:[#allocation27_spill] sm:$0xff] %v9722_v57 }
 0xa1e   : > { %5248 = vperm.xlu0 %7364, %v7055_v42   ;;  %5366 = vperm.xlu1 %7365, %v7073_v33  }
 0xa1f   : > { %5842 = vperm.xlu2 %7366, %v7153_v49  }
 0xa20   : > { %v9735_v2 = vpop.permute.xlu0 %5653  ;;  %v9737_v62 = vpop.permute.xlu1 %5658 }
 0xa21   : > { %10601 = vst [vmem:[#allocation28_spill] sm:$0xff] %v9735_v2  ;;  %v9765_v6 = vpop.permute.xlu2 %5827 }
 0xa22   : > { %10602 = vst [vmem:[#allocation29_spill] sm:$0xff] %v9737_v62 }
 0xa24   : > { %7093 = vmatmul.msk.bf16.gmra.mxu1 %vm1565_vm3, %v5458_v46 }
 0xa26   : > { %5648 = vperm.xlu0 %7364, %v7119_v59   ;;  %5750 = vperm.xlu1 %7365, %v7137_v45  }
 0xa27   : > { %5114 = vperm.xlu2 %7366, %v7037_v41   ;;  %7083 = vmatmul.msk.bf16.gmra.mxu0 %vm1565_vm3, %v5396_v19  ;;  %v5459_v19 = vpack.c.bf16 %v9662_v50, %v9599_v28  ;;  %v7297_v28 = vld [vmem:[%s10462_s3 + $0x40] sm:$0xff] }
 0xa28   : > { %7111 = vmatmul.msk.bf16.gmra.mxu2 %vm1565_vm3, %v9604_v39  ;;  %v9759_v61 = vpop.permute.xlu0 %5755  ;;  %v9761_v3 = vpop.permute.xlu1 %5760  ;;  %7129 = vmatmul.msk.bf16.gmra.mxu3 %vm1565_vm3, %v9576_v17  ;;  %v7155_v39 = vld [vmem:[%s10464_s5 + $0x228] sm:$0xff] }
 0xa29   : > { %10603 = vst [vmem:[#allocation30_spill] sm:$0xff] %v9759_v61  ;;  %v9779_v20 = vpop.permute.xlu2 %4984  ;;  %5795 = vmatpush.bf16.msrb.mxu0 %v7297_v28 }
 0xa2a   : > { %10604 = vst [vmem:[#allocation31_spill] sm:$0xff] %v9761_v3 }
 0xa2b   : > { %10607 = vst [vmem:[#allocation34_spill] sm:$0xff] %v9779_v20 }
 0xa2f   : > { %5546 = vperm.xlu2 %7366, %v7101_v63  }
 0xa30   : > { %v9770_v12 = vpop.permute.xlu0 %5857  ;;  %v9772_v51 = vpop.permute.xlu1 %5862 }
 0xa31   : > { %10605 = vst [vmem:[#allocation32_spill] sm:$0xff] %v9770_v12  ;;  %v9797_v31 = vpop.permute.xlu2 %5099 }
 0xa32   : > { %10606 = vst [vmem:[#allocation33_spill] sm:$0xff] %v9772_v51 }
 0xa33   : > { %10610 = vst [vmem:[#allocation37_spill] sm:$0xff] %v9797_v31 }
 0xa34   : > { %7094 = vmatmul.msk.bf16.gmra.mxu1 %vm1565_vm3, %v5459_v19 }
 0xa37   : > { %5852 = vperm.xlu2 %7366, %v7155_v39   ;;  %7084 = vmatmul.msk.bf16.gmra.mxu0 %vm1565_vm3, %v5397_v16  ;;  %v5460_v16 = vpack.c.bf16 %v9462_v24, %v9658_v32 }
 0xa38   : > { %7112 = vmatmul.msk.bf16.gmra.mxu2 %vm1565_vm3, %v9669_v37  ;;  %v9788_v17 = vpop.permute.xlu1 %5094  ;;  %7130 = vmatmul.msk.bf16.gmra.mxu3 %vm1565_vm3, %v9642_v23  ;;  %v9795_v50 = vpop.permute.xlu0 %4989 }
 0xa39   : > { %10608 = vst [vmem:[#allocation35_spill] sm:$0xff] %v9788_v17  ;;  %v9812_v23 = vpop.permute.xlu2 %5346 }
 0xa3a   : > { %10609 = vst [vmem:[#allocation36_spill] sm:$0xff] %v9795_v50 }
 0xa3b   : > { %10613 = vst [vmem:[#allocation40_spill] sm:$0xff] %v9812_v23 }
 0xa40   : > { %v9799_v36 = vpop.permute.xlu1 %5233  ;;  %v9801_v52 = vpop.permute.xlu0 %5228 }
 0xa41   : > { %10611 = vst [vmem:[#allocation38_spill] sm:$0xff] %v9799_v36  ;;  %v9820_v32 = vpop.permute.xlu2 %5531 }
 0xa42   : > { %10612 = vst [vmem:[#allocation39_spill] sm:$0xff] %v9801_v52 }
 0xa44   : > { %7095 = vmatmul.msk.bf16.gmra.mxu1 %vm1565_vm3, %v5460_v16 }
 0xa47   : > { %7085 = vmatmul.msk.bf16.gmra.mxu0 %vm1565_vm3, %v5398_v21 }
 0xa48   : > { %7113 = vmatmul.msk.bf16.gmra.mxu2 %vm1565_vm3, %v9465_v13  ;;  %7131 = vmatmul.msk.bf16.gmra.mxu3 %vm1565_vm3, %v9427_v48  ;;  %v9816_v37 = vpop.permute.xlu1 %5526  ;;  %v9818_v35 = vpop.permute.xlu0 %5351 }
 0xa49   : > { %10614 = vst [vmem:[#allocation41_spill] sm:$0xff] %v9818_v35  ;;  %v9833_v26 = vpop.permute.xlu2 %5730 }
 0xa50   : > { %v9822_v11 = vpop.permute.xlu1 %5633  ;;  %v9826_v13 = vpop.permute.xlu0 %5628 }
 0xa51   : > { %v5059_v24 = vpop.f32.mrf.mxu1  ;;  %v9848_v28 = vpop.permute.xlu2 %5837 }
 0xa52   : > { %v5127_v8 = vmul.f32 %v9619_v53, %v5059_v24  ;;  %10615 = vst [vmem:[#allocation42_spill] sm:$0xff] %v9848_v28 }
 0xa54   : > { %v4949_v0 = vpop.f32.mrf.mxu0 }
 0xa55   : > { %v5017_v21 = vmul.f32 %v9551_v38, %v4949_v0 }
 0xa57   : > { %v5135_v54 = vadd.f32 %v5127_v8, %v5017_v21  ;;  %7146 = vmatmul.msk.bf16.vlgmr.msrb.gmra.mxu0 %vm1565_vm3, %v9544_v14 }
 0xa58   : > { %v9838_v49 = vpop.permute.xlu1 %5832  ;;  %v9840_v59 = vpop.permute.xlu0 %5735 }
 0xa59   : > { %v9830_v48 = vpop.f32.mrf.mxu1 }
 0xa5b   : > { %v5193_v29 = vpop.f32.mrf.mxu2  ;;  %v5311_v40 = vpop.f32.mrf.mxu3 }
 0xa5c   : > { %v5261_v58 = vmul.f32 %v9622_v55, %v5193_v29  ;;  %v9835_v15 = vpop.f32.mrf.mxu0  ;;  %v5379_v33 = vmul.f32 %v9638_v47, %v5311_v40 }
 0xa5e   : > { %v5269_v42 = vadd.f32 %v5261_v58, %v5135_v54 }
 0xa60   : > { %v5387_v46 = vadd.f32 %v5379_v33, %v5269_v42  ;;  %v9852_v24 = vpop.permute.xlu1 %4999  ;;  %v9856_v8 = vpop.permute.xlu0 %4994 }
 0xa61   : > { %v5064_v45 = vpop.f32.mrf.mxu1  ;;  %10616 = vst [vmem:[#allocation43_spill] sm:$0xff] %v9852_v24 }
 0xa62   : > { %v5129_v19 = vmul.f32 %v9797_v31, %v5064_v45  ;;  %v9862_v45 = vpop.permute.xlu2 %5104 }
 0xa63   : > { %v9842_v14 = vpop.f32.mrf.mxu2  ;;  %v9844_v41 = vpop.f32.mrf.mxu3 }
 0xa64   : > { %v4954_v63 = vpop.f32.mrf.mxu0  ;;  %v5262_v62 = vmul.f32 %v9801_v52, %v9842_v14 }
 0xa65   : > { %v5019_v39 = vmul.f32 %v9795_v50, %v4954_v63 }
 0xa67   : > { %v5137_v16 = vadd.f32 %v5129_v19, %v5019_v39  ;;  %7147 = vmatmul.msk.bf16.gmra.mxu0 %vm1565_vm3, %v9608_v9 }
 0xa68   : > { %v9864_v9 = vpop.permute.xlu1 %5238  ;;  %v9870_v50 = vpop.permute.xlu0 %5109 }
 0xa69   : > { %v9854_v0 = vpop.f32.mrf.mxu1  ;;  %10617 = vst [vmem:[#allocation44_spill] sm:$0xff] %v9870_v50 }
 0xa6b   : > { %v5198_v21 = vpop.f32.mrf.mxu2  ;;  %v5316_v29 = vpop.f32.mrf.mxu3 }
 0xa6c   : > { %v5263_v54 = vmul.f32 %v9799_v36, %v5198_v21  ;;  %v9859_v58 = vpop.f32.mrf.mxu0  ;;  %v5381_v42 = vmul.f32 %v9818_v35, %v5316_v29  ;;  %v9878_v29 = vpop.permute.xlu2 %5243 }
 0xa6d   : > { %10618 = vst [vmem:[#allocation45_spill] sm:$0xff] %v9878_v29 }
 0xa6e   : > { %v5271_v40 = vadd.f32 %v5263_v54, %v5137_v16 }
 0xa70   : > { %v5389_v33 = vadd.f32 %v5381_v42, %v5271_v40  ;;  %v9881_v47 = vpop.permute.xlu1 %5361 }
 0xa71   : > { %v5069_v63 = vpop.f32.mrf.mxu1  ;;  %10619 = vst [vmem:[#allocation46_spill] sm:$0xff] %v9881_v47 }
 0xa72   : > { %v5131_v21 = vmul.f32 %v9870_v50, %v5069_v63 }
 0xa73   : > { %v9866_v19 = vpop.f32.mrf.mxu2  ;;  %v9868_v39 = vpop.f32.mrf.mxu3 }
 0xa74   : > { %v4959_v31 = vpop.f32.mrf.mxu0 }
 0xa75   : > { %v5021_v36 = vmul.f32 %v9852_v24, %v4959_v31 }
 0xa77   : > { %v5139_v16 = vadd.f32 %v5131_v21, %v5021_v36  ;;  %7148 = vmatmul.msk.bf16.gmra.mxu0 %vm1565_vm3, %v9673_v44 }
 0xa78   : > { %v9928_v2 = vpop.permute.xlu1 %5638 }
 0xa79   : > { %v9876_v54 = vpop.f32.mrf.mxu1 }
 0xa7b   : > { %v5203_v40 = vpop.f32.mrf.mxu2  ;;  %v5321_v35 = vpop.f32.mrf.mxu3 }
 0xa7c   : > { %v5265_v42 = vmul.f32 %v9878_v29, %v5203_v40  ;;  %v9883_v55 = vpop.f32.mrf.mxu0  ;;  %v5383_v63 = vmul.f32 %v9881_v47, %v5321_v35 }
 0xa7e   : > { %v5273_v38 = vadd.f32 %v5265_v42, %v5139_v16 }
 0xa80   : > { %v5391_v31 = vadd.f32 %v5383_v63, %v5273_v38 }
 0xa81   : > { %v5074_v36 = vpop.f32.mrf.mxu1 }
 0xa82   : > { %v5133_v50 = vmul.f32 %v9564_v43, %v5074_v36 }
 0xa83   : > { %v9886_v21 = vpop.f32.mrf.mxu2  ;;  %v9888_v44 = vpop.f32.mrf.mxu3 }
 0xa84   : > { %v4964_v24 = vpop.f32.mrf.mxu0 }
 0xa85   : > { %v5023_v53 = vmul.f32 %v9634_v25, %v4964_v24 }
 0xa87   : > { %v5141_v40 = vadd.f32 %v5133_v50, %v5023_v53  ;;  %7149 = vmatmul.msk.bf16.gmra.mxu0 %vm1565_vm3, %v9469_v18 }
 0xa89   : > { %v9902_v50 = vpop.f32.mrf.mxu1 }
 0xa8b   : > { %v5208_v29 = vpop.f32.mrf.mxu2  ;;  %v5326_v42 = vpop.f32.mrf.mxu3 }
 0xa8c   : > { %v5267_v16 = vmul.f32 %v9680_v4, %v5208_v29  ;;  %v9895_v35 = vpop.f32.mrf.mxu0  ;;  %v5385_v63 = vmul.f32 %v9696_v30, %v5326_v42 }
 0xa8e   : > { %v5275_v38 = vadd.f32 %v5267_v16, %v5141_v40  ;;  %v9910_v40 = vpop.permute.xlu0 %5356 }
 0xa90   : > { %v5393_v47 = vadd.f32 %v5385_v63, %v5275_v38 }
 0xa91   : > { %v5491_v16 = vpop.f32.mrf.mxu1 }
 0xa93   : > { %v9904_v18 = vpop.f32.mrf.mxu2  ;;  %v9908_v4 = vpop.f32.mrf.mxu3 }
 0xa94   : > { %v5429_v51 = vpop.f32.mrf.mxu0  ;;  %10620 = vst [vmem:[#allocation47_spill] sm:$0xff] %v9908_v4 }
 0xa95   : > { %v5449_v3 = vadd.f32 %v5429_v51, %v5387_v46 }
 0xa96   : > { %v9916_v63 = vpop.permute.xlu0 %5541 }
 0xa97   : > { %10621 = vst [vmem:[#allocation48_spill] sm:$0xff] %v9916_v63 }
 0xa9b   : > { %v5593_v42 = vpop.f32.mrf.mxu2  ;;  %v5695_v46 = vpop.f32.mrf.mxu3 }
 0xa9c   : > { %v5431_v12 = vpop.f32.mrf.mxu0  ;;  %v5661_v14 = vmul.f32 %v9712_v7, %v5593_v42  ;;  %v5763_v34 = vmul.f32 %v9739_v5, %v5695_v46 }
 0xaa3   : > { %v5595_v25 = vpop.f32.mrf.mxu2  ;;  %v5697_v61 = vpop.f32.mrf.mxu3 }
 0xaa4   : > { %v5434_v36 = vpop.f32.mrf.mxu0  ;;  %v5764_v46 = vmul.f32 %v9833_v26, %v5697_v61  ;;  %v5382_v61 = vmul.f32 %v9910_v40, %v9868_v39 }
 0xaa5   : > { %v9898_v43 = vadd.f32 %v5434_v36, %v5389_v33  ;;  %v9914_v33 = vpop.permute.xlu2 %5536  ;;  %v5493_v36 = vpop.f32.mrf.mxu1 }
 0xaac   : > { %v9900_v53 = vpop.f32.mrf.mxu0 }
 0xaad   : > { %v9930_v60 = vpop.permute.xlu2 %5643 }
 0xaae   : > { %10624 = vst [vmem:[#allocation51_spill] sm:$0xff] %v9930_v60 }
 0xab4   : > { %v5439_v24 = vpop.f32.mrf.mxu0 }
 0xab5   : > { %v9906_v29 = vadd.f32 %v5439_v24, %v5391_v31  ;;  %v5018_v31 = vmul.f32 %v9779_v20, %v9835_v15  ;;  %v5128_v24 = vmul.f32 %v9788_v17, %v9830_v48  ;;  %v5496_v15 = vpop.f32.mrf.mxu1  ;;  %v5598_v20 = vpop.f32.mrf.mxu2  ;;  %v5559_v48 = vmul.f32 %v9694_v1, %v5491_v16 }
 0xab7   : > { %v5136_v57 = vadd.f32 %v5128_v24, %v5018_v31  ;;  %v5567_v24 = vadd.f32 %v5559_v48, %v5449_v3  ;;  %v5264_v3 = vmul.f32 %v9864_v9, %v9866_v19 }
 0xab9   : > { %v5270_v4 = vadd.f32 %v5262_v62, %v5136_v57  ;;  %v5560_v57 = vmul.f32 %v9816_v37, %v5493_v36  ;;  %v5669_v62 = vadd.f32 %v5661_v14, %v5567_v24  ;;  %v5561_v24 = vmul.f32 %v9820_v32, %v5496_v15 }
 0xabb   : > { %v5771_v36 = vadd.f32 %v5763_v34, %v5669_v62  ;;  %v5569_v62 = vadd.f32 %v5561_v24, %v9898_v43 }
 0xabc   : > { %v9912_v51 = vpop.f32.mrf.mxu0 }
 0xabd   : > { %v5600_v14 = vpop.f32.mrf.mxu2 }
 0xac4   : > { %v5444_v38 = vpop.f32.mrf.mxu0 }
 0xac5   : > { %v9918_v30 = vadd.f32 %v5444_v38, %v5393_v47  ;;  %v5380_v47 = vmul.f32 %v9812_v23, %v9844_v41  ;;  %v9934_v38 = vpop.permute.xlu0 %5740  ;;  %v5020_v41 = vmul.f32 %v9856_v8, %v9859_v58  ;;  %v5700_v23 = vpop.f32.mrf.mxu3 }
 0xac6   : > { %10625 = vst [vmem:[#allocation52_spill] sm:$0xff] %v9934_v38  ;;  %v5765_v39 = vmul.f32 %v9840_v59, %v5700_v23  ;;  %v5603_v24 = vpop.f32.mrf.mxu2 }
 0xac7   : > { %10622 = vst [vmem:[#allocation49_spill] sm:$0xff] %v9918_v30  ;;  %v5388_v31 = vadd.f32 %v5380_v47, %v5270_v4  ;;  %v9942_v30 = vpop.permute.xlu1 %5745  ;;  %v5130_v4 = vmul.f32 %v9862_v45, %v9854_v0  ;;  %v5498_v47 = vpop.f32.mrf.mxu1 }
 0xac8   : > { %10626 = vst [vmem:[#allocation53_spill] sm:$0xff] %v9942_v30 }
 0xac9   : > { %v5450_v52 = vadd.f32 %v5431_v12, %v5388_v31  ;;  %v9950_v12 = vpop.permute.xlu2 %5842  ;;  %v5138_v48 = vadd.f32 %v5130_v4, %v5020_v41 }
 0xaca   : > { %10627 = vst [vmem:[#allocation54_spill] sm:$0xff] %v9950_v12 }
 0xacb   : > { %v5568_v16 = vadd.f32 %v5560_v57, %v5450_v52  ;;  %v5272_v19 = vadd.f32 %v5264_v3, %v5138_v48 }
 0xacc   : > { %v9926_v10 = vpop.f32.mrf.mxu0 }
 0xacd   : > { %10623 = vst [vmem:[#allocation50_spill] sm:$0xff] %v9926_v10  ;;  %v5662_v10 = vmul.f32 %v9826_v13, %v5595_v25  ;;  %v9952_v25 = vpop.permute.xlu0 %5847  ;;  %v5702_v4 = vpop.f32.mrf.mxu3 }
 0xace   : > { %10628 = vst [vmem:[#allocation55_spill] sm:$0xff] %v9952_v25 }
 0xacf   : > { %v5670_v58 = vadd.f32 %v5662_v10, %v5568_v16  ;;  %v5663_v10 = vmul.f32 %v9822_v11, %v5598_v20 }
 0xad1   : > { %v5772_v34 = vadd.f32 %v5764_v46, %v5670_v58  ;;  %v5671_v3 = vadd.f32 %v5663_v10, %v5569_v62  ;;  %v9973_v58 = vpop.permute.xlu2 %5114  ;;  %v5501_v46 = vpop.f32.mrf.mxu1 }
 0xad2   : > { %v5132_v62 = vmul.f32 %v9973_v58, %v9876_v54  ;;  %v5563_v54 = vmul.f32 %v9916_v63, %v5501_v46  ;;  %v10648_v63 = vld [vmem:[#allocation32_spill] sm:$0xff] }
 0xad4   : > { %v5797_v17 = vpop.f32.mrf.mxu0  ;;  %v5571_v46 = vadd.f32 %v5563_v54, %v9906_v29 }
 0xad5   : > { %v5865_v42 = vmul.f32 %v9765_v6, %v5797_v17  ;;  %v9958_v17 = vld [vmem:[%s10465_s6] sm:$0xff]  ;;  %v9976_v48 = vpop.permute.xlu0 %5248 }
 0xad6   : > { %10629 = vst [vmem:[#allocation56_spill] sm:$0xff] %v9958_v17  ;;  %v9961_v0 = vperm.slane %v9958_v17, 1 }
 0xad7   : > { %v5873_v52 = vadd.f32 %v5865_v42, %v5771_v36  ;;  %v5390_v42 = vadd.f32 %v5382_v61, %v5272_v19  ;;  %v9970_v36 = vpop.permute.xlu1 %5004  ;;  %10631 = vst [vmem:[#allocation58_spill] sm:$0xff] %v9976_v48  ;;  %v5562_v19 = vmul.f32 %v9914_v33, %v5498_v47  ;;  %v5266_v47 = vmul.f32 %v9976_v48, %v9886_v21 }
 0xad8   : > { %10630 = vst [vmem:[#allocation57_spill] sm:$0xff] %v9970_v36  ;;  %v5022_v10 = vmul.f32 %v9970_v36, %v9883_v55  ;;  %v5766_v55 = vmul.f32 %v9934_v38, %v5702_v4 }
 0xad9   : > { %v5882_v41 = vadd.f32 %v9961_v0, %v5873_v52  ;;  %v5452_v20 = vadd.f32 %v9900_v53, %v5390_v42 }
 0xadb   : > { %v9979_v43 = vmax.f32 %v5882_v41, 0.0  ;;  %v5570_v61 = vadd.f32 %v5562_v19, %v5452_v20 }
 0xadc   : > { %v5799_v31 = vpop.f32.mrf.mxu0 }
 0xadd   : > { %v5866_v57 = vmul.f32 %v9838_v49, %v5799_v31  ;;  %v5664_v31 = vmul.f32 %v9928_v2, %v5600_v14  ;;  %v10523_v4 = vrot.slane %v9979_v43, 1 }
 0xadf   : > { %v5874_v16 = vadd.f32 %v5866_v57, %v5772_v34  ;;  %v5773_v57 = vadd.f32 %v5765_v39, %v5671_v3  ;;  %v5672_v14 = vadd.f32 %v5664_v31, %v5570_v61  ;;  %v5705_v3 = vpop.f32.mrf.mxu3  ;;  %v9997_v53 = vpop.permute.xlu1 %5366  ;;  %v5665_v31 = vmul.f32 %v9930_v60, %v5603_v24  ;;  %v10647_v60 = vld [vmem:[#allocation29_spill] sm:$0xff] }
 0xae0   : > { %10632 = vst [vmem:[#allocation59_spill] sm:$0xff] %v9997_v53 }
 0xae1   : > { %v5883_v15 = vadd.f32 %v9961_v0, %v5874_v16  ;;  %v5140_v16 = vadd.f32 %v5132_v62, %v5022_v10  ;;  %v5774_v21 = vadd.f32 %v5766_v55, %v5672_v14 }
 0xae3   : > { %v9981_v52 = vmax.f32 %v5883_v15, 0.0  ;;  %v5274_v39 = vadd.f32 %v5266_v47, %v5140_v16  ;;  %v5384_v47 = vmul.f32 %v9997_v53, %v9888_v44 }
 0xae4   : > { %v5802_v34 = vpop.f32.mrf.mxu0 }
 0xae5   : > { %v5867_v23 = vmul.f32 %v9848_v28, %v5802_v34  ;;  %v5899_v15 = vrot.slane %v9981_v52, 7  ;;  %v6046_v20 = vrot.slane %v9981_v52, 1  ;;  %v10524_v34 = vrot.slane %v9979_v43, 7  ;;  %v10679_v28 = vld [vmem:[#allocation39_spill] sm:$0xff] }
 0xae7   : > { %v5875_v41 = vadd.f32 %v5867_v23, %v5773_v57  ;;  %v5503_v57 = vpop.f32.mrf.mxu1  ;;  %v10016_v24 = vsel %vm326_vm0, %v10524_v34, %v5899_v15  ;;  %v10022_v14 = vsel %vm620_vm2, %v10523_v4, %v6046_v20  ;;  %v10044_v4 = vpop.permute.xlu0 %5648 }
 0xae8   : > { %10634 = vst [vmem:[#allocation61_spill] sm:$0xff] %v10044_v4 }
 0xae9   : > { %v5884_v42 = vadd.f32 %v9961_v0, %v5875_v41  ;;  %v5605_v41 = vpop.f32.mrf.mxu2 }
 0xaeb   : > { %v10000_v19 = vmax.f32 %v5884_v42, 0.0  ;;  %v5392_v42 = vadd.f32 %v5384_v47, %v5274_v39  ;;  %v5666_v47 = vmul.f32 %v10044_v4, %v5605_v41  ;;  %v7298_v41 = vld [vmem:[%s10463_s4] sm:$0xff] }
 0xaec   : > { %v5804_v10 = vpop.f32.mrf.mxu0  ;;  %5945 = vmatpush.bf16.msrb.mxu1 %v7298_v41 }
 0xaed   : > { %v5868_v23 = vmul.f32 %v9950_v12, %v5804_v10  ;;  %v10525_v61 = vrot.slane %v10000_v19, 7  ;;  %v6047_v62 = vrot.slane %v10000_v19, 1  ;;  %v5673_v10 = vadd.f32 %v5665_v31, %v5571_v46 }
 0xaef   : > { %v5876_v16 = vadd.f32 %v5868_v23, %v5774_v21  ;;  %v10028_v44 = vsel %vm326_vm0, %v5899_v15, %v10525_v61  ;;  %v10032_v29 = vsel %vm620_vm2, %v6046_v20, %v6047_v62  ;;  %v10041_v23 = vpop.permute.xlu2 %5546  ;;  %v5454_v15 = vadd.f32 %v9912_v51, %v5392_v42  ;;  %v5707_v61 = vpop.f32.mrf.mxu3 }
 0xaf0   : > { %v10036_v55 = vpack.c.bf16 %v10028_v44, %v10016_v24  ;;  %10633 = vst [vmem:[#allocation60_spill] sm:$0xff] %v10041_v23  ;;  %v5767_v20 = vmul.f32 %v9942_v30, %v5705_v3  ;;  %v5564_v39 = vmul.f32 %v10041_v23, %v5503_v57  ;;  %v5024_v51 = vmul.f32 %v9562_v22, %v9895_v35  ;;  %v5506_v42 = vpop.f32.mrf.mxu1  ;;  %v7299_v57 = vld [vmem:[%s10463_s4 + $0x8] sm:$0xff] }
 0xaf1   : > { %v5885_v21 = vadd.f32 %v9961_v0, %v5876_v16  ;;  %v10635_v35 = vld [vmem:[#allocation23_spill] sm:$0xff]  ;;  %6007 = vmatpush.bf16.msrb.mxu2 %v7299_v57  ;;  %v10639_v57 = vld [vmem:[#allocation28_spill] sm:$0xff] }
 0xaf2   : > { %v5775_v54 = vadd.f32 %v5767_v20, %v5673_v10  ;;  %v5572_v16 = vadd.f32 %v5564_v39, %v5454_v15  ;;  %v5134_v10 = vmul.f32 %v9636_v56, %v9902_v50  ;;  %v7301_v20 = vld [vmem:[%s10463_s4 + $0x18] sm:$0xff]  ;;  %v10072_v39 = vpop.permute.xlu1 %5750 }
 0xaf3   : > { %v10047_v34 = vmax.f32 %v5885_v21, 0.0  ;;  %v5268_v21 = vmul.f32 %v10635_v35, %v9904_v18  ;;  %10636 = vst [vmem:[#allocation62_spill] sm:$0xff] %v10072_v39  ;;  %v5768_v22 = vmul.f32 %v10072_v39, %v5707_v61  ;;  %6163 = vmatpush.bf16.msra.mxu0 %v7301_v20  ;;  %v10641_v20 = vld [vmem:[#allocation25_spill] sm:$0xff] }
 0xaf4   : > { %v5807_v17 = vpop.f32.mrf.mxu0  ;;  %v5674_v15 = vadd.f32 %v5666_v47, %v5572_v16  ;;  %v5142_v46 = vadd.f32 %v5134_v10, %v5024_v51  ;;  %v10640_v10 = vld [vmem:[#allocation47_spill] sm:$0xff]  ;;  %v10642_v39 = vld [vmem:[#allocation49_spill] sm:$0xff] }
 0xaf5   : > { %v5869_v31 = vmul.f32 %v9952_v25, %v5807_v17  ;;  %v7300_v17 = vld [vmem:[%s10463_s4 + $0x10] sm:$0xff]  ;;  %v6048_v50 = vrot.slane %v10047_v34, 1  ;;  %v5901_v47 = vrot.slane %v10047_v34, 7  ;;  %v10638_v25 = vld [vmem:[#allocation26_spill] sm:$0xff] }
 0xaf6   : > { %6093 = vmatpush.bf16.msrb.mxu3 %v7300_v17  ;;  %v5276_v35 = vadd.f32 %v5268_v21, %v5142_v46  ;;  %v5565_v4 = vmul.f32 %v10638_v25, %v5506_v42  ;;  %v5776_v56 = vadd.f32 %v5768_v22, %v5674_v15  ;;  %v10643_v42 = vrot.slane %v10000_v19, 7 }
 0xaf7   : > { %v5877_v3 = vadd.f32 %v5869_v31, %v5775_v54  ;;  %v5608_v54 = vpop.f32.mrf.mxu2  ;;  %v10080_v16 = vpop.permute.xlu2 %5852  ;;  %v10092_v46 = vsel %vm620_vm2, %v6047_v62, %v6048_v50 }
 0xaf8   : > { %10637 = vst [vmem:[#allocation63_spill] sm:$0xff] %v10080_v16  ;;  %v5667_v41 = vmul.f32 %v10639_v57, %v5608_v54  ;;  %v5573_v30 = vadd.f32 %v5565_v4, %v10642_v39  ;;  %v5710_v23 = vpop.f32.mrf.mxu3  ;;  %v10098_v21 = vsel %vm326_vm0, %v10643_v42, %v5901_v47  ;;  %v5508_v62 = vpop.f32.mrf.mxu1  ;;  %v10644_v42 = vld [vmem:[#allocation30_spill] sm:$0xff]  ;;  %v6062_v27 = vpack.c.bf16 %v10092_v46, %v10032_v29 }
 0xaf9   : > { %v5886_v31 = vadd.f32 %v9961_v0, %v5877_v3 }
 0xafa   : > { %v5675_v39 = vadd.f32 %v5667_v41, %v5573_v30 }
 0xafb   : > { %v10077_v18 = vmax.f32 %v5886_v31, 0.0  ;;  %v5386_v31 = vmul.f32 %v10641_v20, %v10640_v10  ;;  %v10645_v20 = vld [vmem:[#allocation50_spill] sm:$0xff] }
 0xafc   : > { %v5809_v3 = vpop.f32.mrf.mxu0 }
 0xafd   : > { %v5870_v51 = vmul.f32 %v10080_v16, %v5809_v3  ;;  %v5902_v61 = vrot.slane %v10077_v18, 7  ;;  %v6049_v17 = vrot.slane %v10077_v18, 1  ;;  %v5394_v3 = vadd.f32 %v5386_v31, %v5276_v35 }
 0xaff   : > { %v5878_v22 = vadd.f32 %v5870_v51, %v5776_v56  ;;  %v10102_v15 = vsel %vm326_vm0, %v5901_v47, %v5902_v61  ;;  %v10106_v54 = vsel %vm620_vm2, %v6048_v50, %v6049_v17  ;;  %v5610_v10 = vpop.f32.mrf.mxu2  ;;  %v5769_v47 = vmul.f32 %v10644_v42, %v5710_v23  ;;  %v10646_v50 = vld [vmem:[#allocation27_spill] sm:$0xff] }
 0xb00   : > { %v10110_v4 = vpack.c.bf16 %v10102_v15, %v10098_v21  ;;  %v5456_v16 = vadd.f32 %v10645_v20, %v5394_v3  ;;  %v5566_v25 = vmul.f32 %v10646_v50, %v5508_v62  ;;  %v5668_v38 = vmul.f32 %v10647_v60, %v5610_v10  ;;  %v5712_v31 = vpop.f32.mrf.mxu3  ;;  %v10649_v3 = vld [vmem:[#allocation31_spill] sm:$0xff]  ;;  %v10672_v60 = vld [vmem:[#allocation16_spill] sm:$0xff] }
 0xb01   : > { %v5887_v51 = vadd.f32 %v9961_v0, %v5878_v22  ;;  %v5777_v12 = vadd.f32 %v5769_v47, %v5675_v39  ;;  %v10673_v50 = vld [vmem:[#allocation19_spill] sm:$0xff] }
 0xb02   : > { %v5574_v35 = vadd.f32 %v5566_v25, %v5456_v16 }
 0xb03   : > { %v10117_v57 = vmax.f32 %v5887_v51, 0.0  ;;  %v5770_v51 = vmul.f32 %v10649_v3, %v5712_v31 }
 0xb04   : > { %v5812_v53 = vpop.f32.mrf.mxu0  ;;  %v5676_v22 = vadd.f32 %v5668_v38, %v5574_v35 }
 0xb05   : > { %v5871_v56 = vmul.f32 %v10648_v63, %v5812_v53  ;;  %v6050_v20 = vrot.slane %v10117_v57, 1  ;;  %v5903_v39 = vrot.slane %v10117_v57, 7  ;;  %v10650_v63 = vld [vmem:[#allocation33_spill] sm:$0xff] }
 0xb06   : > { %v5778_v47 = vadd.f32 %v5770_v51, %v5676_v22 }
 0xb07   : > { %v5879_v41 = vadd.f32 %v5871_v56, %v5777_v12  ;;  %v10135_v38 = vsel %vm620_vm2, %v6049_v17, %v6050_v20  ;;  %v5908_v16 = vsel %vm326_vm0, %v5902_v61, %v5903_v39 }
 0xb09   : > { %v5888_v23 = vadd.f32 %v9961_v0, %v5879_v41 }
 0xb0b   : > { %v10127_v62 = vmax.f32 %v5888_v23, 0.0 }
 0xb0c   : > { %v5814_v10 = vpop.f32.mrf.mxu0 }
 0xb0d   : > { %v5904_v53 = vrot.slane %v10127_v62, 7  ;;  %v5872_v30 = vmul.f32 %v10650_v63, %v5814_v10  ;;  %v6051_v12 = vrot.slane %v10127_v62, 1 }
 0xb0f   : > { %v5880_v25 = vadd.f32 %v5872_v30, %v5778_v47  ;;  %v5907_v56 = vsel %vm326_vm0, %v5903_v39, %v5904_v53  ;;  %v6054_v35 = vsel %vm620_vm2, %v6050_v20, %v6051_v12  ;;  %v10651_v39 = vrot.slane %v9979_v43, 7 }
 0xb10   : > { %v5917_v41 = vpack.c.bf16 %v5907_v56, %v5908_v16  ;;  %v6265_v31 = vpack.c.bf16 %v6054_v35, %v10135_v38  ;;  %v10652_v47 = vrot.slane %v9979_v43, 1 }
 0xb11   : > { %v5889_v22 = vadd.f32 %v9961_v0, %v5880_v25 }
 0xb13   : > { %v5897_v23 = vmax.f32 %v5889_v22, 0.0 }
 0xb15   : > { %v5905_v51 = vrot.slane %v5897_v23, 7  ;;  %v5975_v17 = vpack.c.bf16 %v9979_v43, %v5897_v23  ;;  %v6052_v10 = vrot.slane %v5897_v23, 1  ;;  %v6204_v30 = vpack.c.bf16 %v5897_v23, %v10127_v62 }
 0xb17   : > { %v5906_v61 = vsel %vm326_vm0, %v5904_v53, %v5905_v51  ;;  %v5913_v20 = vsel %vm326_vm0, %v5905_v51, %v10651_v39  ;;  %v6060_v0 = vsel %vm620_vm2, %v6052_v10, %v10652_v47  ;;  %7172 = vmatmul.msk.bf16.vlgmr.msrb.gmra.mxu2 %vm1565_vm3, %v5975_v17  ;;  %v6053_v25 = vsel %vm620_vm2, %v6051_v12, %v6052_v10  ;;  %v7302_v10 = vld [vmem:[%s10463_s4 + $0x20] sm:$0xff]  ;;  %v7305_v39 = vld [vmem:[%s10463_s4 + $0x38] sm:$0xff] }
 0xb18   : > { %v5914_v22 = vpack.c.bf16 %v5913_v20, %v5906_v61  ;;  %v10161_v23 = vpack.c.bf16 %v10022_v14, %v6060_v0  ;;  %v6131_v53 = vpack.c.bf16 %v10016_v24, %v5913_v20  ;;  %v6266_v63 = vpack.c.bf16 %v6060_v0, %v6053_v25  ;;  %v7303_v24 = vld [vmem:[%s10463_s4 + $0x28] sm:$0xff]  ;;  %6233 = vmatpush.bf16.msra.mxu1 %v7302_v10 }
 0xb19   : > { %v5976_v51 = vpack.c.bf16 %v10000_v19, %v9981_v52  ;;  %v6132_v12 = vpack.c.bf16 %v10098_v21, %v10028_v44  ;;  %6295 = vmatpush.bf16.msra.mxu2 %v7303_v24  ;;  %v5977_v44 = vpack.c.bf16 %v10077_v18, %v10047_v34  ;;  %v7304_v21 = vld [vmem:[%s10463_s4 + $0x30] sm:$0xff]  ;;  %v6063_v20 = vpack.c.bf16 %v10135_v38, %v10106_v54 }
 0xb1a   : > { %7162 = vmatmul.msk.bf16.vlgmr.msrb.gmra.mxu1 %vm1565_vm3, %v5914_v22  ;;  %7182 = vmatmul.msk.bf16.vlgmr.msrb.gmra.mxu3 %vm1565_vm3, %v10161_v23  ;;  %v6133_v47 = vpack.c.bf16 %v5908_v16, %v10102_v15  ;;  %v5978_v0 = vpack.c.bf16 %v10127_v62, %v10117_v57  ;;  %v10653_v15 = vpack.c.bf16 %v10032_v29, %v10022_v14 }
 0xb1b   : > { %7192 = vmatmul.msk.bf16.vlgmr.msra.gmra.mxu0 %vm1565_vm3, %v6131_v53  ;;  %6349 = vmatpush.bf16.msra.mxu3 %v7304_v21  ;;  %v6064_v53 = vpack.c.bf16 %v6053_v25, %v6054_v35  ;;  %v10654_v38 = vpack.c.bf16 %v9981_v52, %v9979_v43  ;;  %v10655_v62 = vpack.c.bf16 %v10106_v54, %v10092_v46  ;;  %v7306_v43 = vld [vmem:[%s10463_s4 + $0x40] sm:$0xff] }
 0xb1c   : > { %6403 = vmatpush.bf16.msrb.mxu0 %v7305_v39  ;;  %v10656_v14 = vpack.c.bf16 %v10047_v34, %v10000_v19  ;;  %v10657_v52 = vpack.c.bf16 %v10117_v57, %v10077_v18  ;;  %6457 = vmatpush.bf16.msrb.mxu1 %v7306_v43 }
 0xb27   : > { %7173 = vmatmul.msk.bf16.gmra.mxu2 %vm1565_vm3, %v5976_v51 }
 0xb2a   : > { %7163 = vmatmul.msk.bf16.gmra.mxu1 %vm1565_vm3, %v10036_v55  ;;  %7183 = vmatmul.msk.bf16.gmra.mxu3 %vm1565_vm3, %v6062_v27 }
 0xb2b   : > { %7193 = vmatmul.msk.bf16.gmra.mxu0 %vm1565_vm3, %v6132_v12  ;;  %v6134_v12 = vpack.c.bf16 %v5906_v61, %v5907_v56 }
 0xb37   : > { %7174 = vmatmul.msk.bf16.gmra.mxu2 %vm1565_vm3, %v5977_v44 }
 0xb3a   : > { %7164 = vmatmul.msk.bf16.gmra.mxu1 %vm1565_vm3, %v10110_v4  ;;  %7184 = vmatmul.msk.bf16.gmra.mxu3 %vm1565_vm3, %v6063_v20 }
 0xb3b   : > { %7194 = vmatmul.msk.bf16.gmra.mxu0 %vm1565_vm3, %v6133_v47 }
 0xb47   : > { %7175 = vmatmul.msk.bf16.gmra.mxu2 %vm1565_vm3, %v5978_v0 }
 0xb4a   : > { %7165 = vmatmul.msk.bf16.gmra.mxu1 %vm1565_vm3, %v5917_v41  ;;  %7185 = vmatmul.msk.bf16.gmra.mxu3 %vm1565_vm3, %v6064_v53 }
 0xb4b   : > { %7195 = vmatmul.msk.bf16.gmra.mxu0 %vm1565_vm3, %v6134_v12 }
 0xb57   : > { %7212 = vmatmul.msk.bf16.vlgmr.msra.gmra.mxu2 %vm1565_vm3, %v10653_v15 }
 0xb5a   : > { %7202 = vmatmul.msk.bf16.vlgmr.msra.gmra.mxu1 %vm1565_vm3, %v10654_v38  ;;  %7222 = vmatmul.msk.bf16.vlgmr.msra.gmra.mxu3 %vm1565_vm3, %v10036_v55 }
 0xb5b   : > { %7232 = vmatmul.msk.bf16.vlgmr.msrb.gmra.mxu0 %vm1565_vm3, %v5976_v51 }
 0xb67   : > { %7213 = vmatmul.msk.bf16.gmra.mxu2 %vm1565_vm3, %v10655_v62 }
 0xb6a   : > { %7203 = vmatmul.msk.bf16.gmra.mxu1 %vm1565_vm3, %v10656_v14  ;;  %7223 = vmatmul.msk.bf16.gmra.mxu3 %vm1565_vm3, %v10110_v4 }
 0xb6b   : > { %7233 = vmatmul.msk.bf16.gmra.mxu0 %vm1565_vm3, %v5977_v44 }
 0xb77   : > { %7214 = vmatmul.msk.bf16.gmra.mxu2 %vm1565_vm3, %v6265_v31 }
 0xb7a   : > { %7204 = vmatmul.msk.bf16.gmra.mxu1 %vm1565_vm3, %v10657_v52  ;;  %7224 = vmatmul.msk.bf16.gmra.mxu3 %vm1565_vm3, %v5917_v41 }
 0xb7b   : > { %7234 = vmatmul.msk.bf16.gmra.mxu0 %vm1565_vm3, %v5978_v0 }
 0xb87   : > { %7215 = vmatmul.msk.bf16.gmra.mxu2 %vm1565_vm3, %v6266_v63 }
 0xb8a   : > { %7205 = vmatmul.msk.bf16.gmra.mxu1 %vm1565_vm3, %v6204_v30  ;;  %7225 = vmatmul.msk.bf16.gmra.mxu3 %vm1565_vm3, %v5914_v22 }
 0xb8b   : > { %7235 = vmatmul.msk.bf16.gmra.mxu0 %vm1565_vm3, %v5975_v17 }
 0xb97   : > { %v5947_v19 = vpop.f32.mrf.mxu1 }
 0xb98   : > { %v6165_v46 = vpop.f32.mrf.mxu0 }
 0xb9a   : > { %7242 = vmatmul.msk.bf16.vlgmr.msrb.gmra.mxu1 %vm1565_vm3, %v6062_v27  ;;  %v6009_v55 = vpop.f32.mrf.mxu2 }
 0xb9b   : > { %v6029_v42 = vmul.f32 %v6009_v55, %v10672_v60 }
 0xb9d   : > { %v6095_v18 = vpop.f32.mrf.mxu3 }
 0xb9f   : > { %v5949_v34 = vpop.f32.mrf.mxu1 }
 0xba0   : > { %v6167_v16 = vpop.f32.mrf.mxu0 }
 0xba2   : > { %v6011_v63 = vpop.f32.mrf.mxu2 }
 0xba5   : > { %v6097_v4 = vpop.f32.mrf.mxu3 }
 0xba6   : > { %v6116_v60 = vmul.f32 %v6097_v4, %v10679_v28  ;;  %v10683_v4 = vld [vmem:[#allocation38_spill] sm:$0xff] }
 0xba7   : > { %v10244_v29 = vpop.f32.mrf.mxu1 }
 0xba8   : > { %v10256_v17 = vpop.f32.mrf.mxu0 }
 0xbaa   : > { %7243 = vmatmul.msk.bf16.gmra.mxu1 %vm1565_vm3, %v6063_v20  ;;  %v6014_v56 = vpop.f32.mrf.mxu2 }
 0xbad   : > { %v6100_v41 = vpop.f32.mrf.mxu3 }
 0xbaf   : > { %v10247_v57 = vpop.f32.mrf.mxu1 }
 0xbb0   : > { %v10264_v22 = vpop.f32.mrf.mxu0 }
 0xbb2   : > { %v6016_v30 = vpop.f32.mrf.mxu2 }
 0xbb5   : > { %v10260_v61 = vpop.f32.mrf.mxu3 }
 0xbb7   : > { %v10249_v54 = vpop.f32.mrf.mxu1 }
 0xbb8   : > { %v10270_v10 = vpop.f32.mrf.mxu0 }
 0xbb9   : > { %10661 = vst [vmem:[#allocation64_spill] sm:$0xff] %v10270_v10 }
 0xbba   : > { %7244 = vmatmul.msk.bf16.gmra.mxu1 %vm1565_vm3, %v6064_v53  ;;  %v10266_v51 = vpop.f32.mrf.mxu2 }
 0xbbd   : > { %v10268_v27 = vpop.f32.mrf.mxu3 }
 0xbbf   : > { %v10252_v35 = vpop.f32.mrf.mxu1 }
 0xbc0   : > { %10658 = vst [vmem:[#allocation47_spill] sm:$0xff] %v10252_v35  ;;  %v10276_v20 = vpop.f32.mrf.mxu0  ;;  %v10678_v35 = vld [vmem:[#allocation34_spill] sm:$0xff] }
 0xbc1   : > { %10663 = vst [vmem:[#allocation66_spill] sm:$0xff] %v10276_v20  ;;  %v10674_v20 = vld [vmem:[#allocation9_spill] sm:$0xff]  ;;  %v5968_v36 = vmul.f32 %v5949_v34, %v10678_v35 }
 0xbc2   : > { %v10272_v44 = vpop.f32.mrf.mxu2 }
 0xbc5   : > { %v10274_v39 = vpop.f32.mrf.mxu3 }
 0xbc6   : > { %10662 = vst [vmem:[#allocation65_spill] sm:$0xff] %v10274_v39  ;;  %v10676_v39 = vld [vmem:[#allocation35_spill] sm:$0xff] }
 0xbc7   : > { %v10254_v31 = vpop.f32.mrf.mxu1 }
 0xbc8   : > { %10659 = vst [vmem:[#allocation49_spill] sm:$0xff] %v10254_v31  ;;  %v10286_v12 = vpop.f32.mrf.mxu0  ;;  %v6115_v31 = vmul.f32 %v6095_v18, %v10674_v20  ;;  %v10680_v18 = vld [vmem:[#allocation37_spill] sm:$0xff] }
 0xbc9   : > { %10666 = vst [vmem:[#allocation69_spill] sm:$0xff] %v10286_v12 }
 0xbca   : > { %7245 = vmatmul.msk.bf16.gmra.mxu1 %vm1565_vm3, %v10161_v23  ;;  %v10278_v23 = vpop.f32.mrf.mxu2 }
 0xbcb   : > { %10664 = vst [vmem:[#allocation67_spill] sm:$0xff] %v10278_v23 }
 0xbcd   : > { %v10282_v0 = vpop.f32.mrf.mxu3 }
 0xbce   : > { %10665 = vst [vmem:[#allocation68_spill] sm:$0xff] %v10282_v0 }
 0xbcf   : > { %v10262_v25 = vpop.f32.mrf.mxu1 }
 0xbd0   : > { %10660 = vst [vmem:[#allocation50_spill] sm:$0xff] %v10262_v25  ;;  %v10294_v14 = vpop.f32.mrf.mxu0  ;;  %v5967_v25 = vmul.f32 %v5947_v19, %v10673_v50 }
 0xbd1   : > { %10670 = vst [vmem:[#allocation73_spill] sm:$0xff] %v10294_v14  ;;  %v10677_v14 = vld [vmem:[#allocation21_spill] sm:$0xff] }
 0xbd2   : > { %v10288_v15 = vpop.f32.mrf.mxu2  ;;  %v6037_v0 = vadd.f32 %v6029_v42, %v5967_v25  ;;  %v6185_v10 = vmul.f32 %v6165_v46, %v10677_v14  ;;  %v6031_v25 = vmul.f32 %v6014_v56, %v10680_v18  ;;  %v10681_v46 = vld [vmem:[#allocation36_spill] sm:$0xff]  ;;  %v6032_v14 = vmul.f32 %v6016_v30, %v9862_v45 }
 0xbd3   : > { %10667 = vst [vmem:[#allocation70_spill] sm:$0xff] %v10288_v15  ;;  %v5969_v34 = vmul.f32 %v10244_v29, %v10681_v46  ;;  %v6118_v45 = vmul.f32 %v10260_v61, %v9864_v9 }
 0xbd5   : > { %v10290_v38 = vpop.f32.mrf.mxu3  ;;  %v6039_v28 = vadd.f32 %v6031_v25, %v5969_v34 }
 0xbd6   : > { %10668 = vst [vmem:[#allocation71_spill] sm:$0xff] %v10290_v38  ;;  %v6123_v38 = vadd.f32 %v6115_v31, %v6037_v0 }
 0xbd7   : > { %v6235_v24 = vpop.f32.mrf.mxu1 }
 0xbd8   : > { %v6405_v12 = vpop.f32.mrf.mxu0  ;;  %v6193_v55 = vadd.f32 %v6185_v10, %v6123_v38  ;;  %v6117_v10 = vmul.f32 %v6100_v41, %v10683_v4  ;;  %v5970_v41 = vmul.f32 %v10247_v57, %v9856_v8 }
 0xbd9   : > { %v6425_v38 = vmul.f32 %v6405_v12, %v9739_v5  ;;  %v10685_v12 = vld [vmem:[#allocation44_spill] sm:$0xff] }
 0xbda   : > { %v6297_v43 = vpop.f32.mrf.mxu2  ;;  %v6255_v50 = vadd.f32 %v6235_v24, %v6193_v55 }
 0xbdb   : > { %v6317_v42 = vmul.f32 %v6297_v43, %v9694_v1 }
 0xbdd   : > { %v6351_v52 = vpop.f32.mrf.mxu3 }
 0xbdf   : > { %v6237_v21 = vpop.f32.mrf.mxu1 }
 0xbe0   : > { %v6407_v19 = vpop.f32.mrf.mxu0 }
 0xbe2   : > { %v6299_v23 = vpop.f32.mrf.mxu2 }
 0xbe3   : > { %v6318_v56 = vmul.f32 %v6299_v23, %v9816_v37 }
 0xbe5   : > { %v6353_v48 = vpop.f32.mrf.mxu3 }
 0xbe6   : > { %v6372_v29 = vmul.f32 %v6353_v48, %v9826_v13  ;;  %v6426_v48 = vmul.f32 %v6407_v19, %v9833_v26 }
 0xbe7   : > { %v10280_v47 = vpop.f32.mrf.mxu1 }
 0xbea   : > { %v6302_v20 = vpop.f32.mrf.mxu2 }
 0xbeb   : > { %v6319_v13 = vmul.f32 %v6302_v20, %v9820_v32  ;;  %v10686_v32 = vld [vmem:[#allocation43_spill] sm:$0xff] }
 0xbec   : > { %v5971_v20 = vmul.f32 %v10249_v54, %v10686_v32 }
 0xbed   : > { %v6356_v1 = vpop.f32.mrf.mxu3 }
 0xbee   : > { %v6373_v9 = vmul.f32 %v6356_v1, %v9822_v11 }
 0xbef   : > { %v10284_v53 = vpop.f32.mrf.mxu1 }
 0xbf2   : > { %v6304_v55 = vpop.f32.mrf.mxu2 }
 0xbf3   : > { %v6320_v11 = vmul.f32 %v6304_v55, %v9914_v33  ;;  %v10690_v33 = vld [vmem:[#allocation47_spill] sm:$0xff] }
 0xbf7   : > { %v10292_v62 = vpop.f32.mrf.mxu1 }
 0xbf8   : > { %10669 = vst [vmem:[#allocation72_spill] sm:$0xff] %v10292_v62  ;;  %v6030_v62 = vmul.f32 %v6011_v63, %v10676_v39  ;;  %v6325_v63 = vadd.f32 %v6317_v42, %v6255_v50  ;;  %v6371_v39 = vmul.f32 %v6351_v52, %v9712_v7  ;;  %v6410_v52 = vpop.f32.mrf.mxu0  ;;  %v10684_v42 = vld [vmem:[#allocation41_spill] sm:$0xff] }
 0xbf9   : > { %v6187_v37 = vmul.f32 %v10256_v17, %v10684_v42  ;;  %v6033_v17 = vmul.f32 %v10266_v51, %v10685_v12  ;;  %v10703_v12 = vld [vmem:[#allocation49_spill] sm:$0xff] }
 0xbfa   : > { %v6379_v24 = vadd.f32 %v6371_v39, %v6325_v63  ;;  %v10687_v63 = vld [vmem:[#allocation45_spill] sm:$0xff]  ;;  %v6307_v51 = vpop.f32.mrf.mxu2 }
 0xbfb   : > { %v6119_v39 = vmul.f32 %v10268_v27, %v10687_v63  ;;  %v10708_v63 = vld [vmem:[#allocation60_spill] sm:$0xff] }
 0xbff   : > { %v10296_v3 = vpop.f32.mrf.mxu1 }
 0xc00   : > { %10671 = vst [vmem:[#allocation74_spill] sm:$0xff] %v10296_v3  ;;  %v6038_v3 = vadd.f32 %v6030_v62, %v5968_v36  ;;  %v10682_v36 = vld [vmem:[#allocation40_spill] sm:$0xff]  ;;  %v6412_v26 = vpop.f32.mrf.mxu0 }
 0xc01   : > { %v6186_v35 = vmul.f32 %v6167_v16, %v10682_v36  ;;  %v6433_v16 = vadd.f32 %v6425_v38, %v6379_v24  ;;  %v10689_v24 = vld [vmem:[#allocation57_spill] sm:$0xff]  ;;  %v10692_v38 = vld [vmem:[#allocation64_spill] sm:$0xff] }
 0xc02   : > { %v6124_v31 = vadd.f32 %v6116_v60, %v6038_v3  ;;  %v6125_v3 = vadd.f32 %v6117_v10, %v6039_v28  ;;  %v10688_v10 = vld [vmem:[#allocation42_spill] sm:$0xff] }
 0xc04   : > { %v6194_v0 = vadd.f32 %v6186_v35, %v6124_v31  ;;  %v6195_v23 = vadd.f32 %v6187_v37, %v6125_v3  ;;  %v6188_v31 = vmul.f32 %v10264_v22, %v9910_v40  ;;  %v6034_v40 = vmul.f32 %v10272_v44, %v9973_v58  ;;  %v10693_v3 = vld [vmem:[#allocation58_spill] sm:$0xff] }
 0xc05   : > { %v10698_v37 = vld [vmem:[#allocation6_spill] sm:$0xff] }
 0xc06   : > { %v6256_v62 = vadd.f32 %v6237_v21, %v6194_v0  ;;  %v6040_v21 = vadd.f32 %v6032_v14, %v5970_v41  ;;  %v6257_v8 = vadd.f32 %v10280_v47, %v6195_v23  ;;  %v6041_v47 = vadd.f32 %v6033_v17, %v5971_v20  ;;  %v10694_v14 = vld [vmem:[#allocation65_spill] sm:$0xff]  ;;  %v10697_v41 = vld [vmem:[#allocation72_spill] sm:$0xff]  ;;  %v10700_v23 = vld [vmem:[#allocation51_spill] sm:$0xff] }
 0xc07   : > { %v10301_v15 = vpop.f32.mrf.mxu1  ;;  %v5972_v0 = vmul.f32 %v10690_v33, %v10689_v24  ;;  %v10706_v20 = vld [vmem:[#allocation22_spill] sm:$0xff]  ;;  %v10714_v24 = vld [vmem:[#allocation55_spill] sm:$0xff] }
 0xc08   : > { %10675 = vst [vmem:[#allocation16_spill] sm:$0xff] %v10301_v15  ;;  %v6326_v43 = vadd.f32 %v6318_v56, %v6256_v62  ;;  %v6126_v57 = vadd.f32 %v6118_v45, %v6040_v21  ;;  %v6327_v18 = vadd.f32 %v6319_v13, %v6257_v8  ;;  %v6127_v36 = vadd.f32 %v6119_v39, %v6041_v47  ;;  %v10691_v56 = vld [vmem:[#allocation46_spill] sm:$0xff] }
 0xc0a   : > { %v6380_v30 = vadd.f32 %v6372_v29, %v6326_v43  ;;  %v6381_v46 = vadd.f32 %v6373_v9, %v6327_v18  ;;  %v6196_v34 = vadd.f32 %v6188_v31, %v6126_v57  ;;  %v6415_v43 = vpop.f32.mrf.mxu0  ;;  %v10695_v29 = vld [vmem:[#allocation48_spill] sm:$0xff]  ;;  %v10702_v57 = vld [vmem:[#allocation17_spill] sm:$0xff]  ;;  %v10704_v18 = vld [vmem:[#allocation59_spill] sm:$0xff] }
 0xc0b   : > { %v5973_v17 = vmul.f32 %v10703_v12, %v10702_v57  ;;  %v10705_v9 = vld [vmem:[#allocation66_spill] sm:$0xff]  ;;  %v10707_v31 = vld [vmem:[#allocation68_spill] sm:$0xff]  ;;  %v10726_v57 = vld [vmem:[#allocation25_spill] sm:$0xff] }
 0xc0c   : > { %v6434_v61 = vadd.f32 %v6426_v48, %v6380_v30  ;;  %v6258_v54 = vadd.f32 %v10284_v53, %v6196_v34  ;;  %v6042_v53 = vadd.f32 %v6034_v40, %v5972_v0  ;;  %v10701_v48 = vld [vmem:[#allocation54_spill] sm:$0xff]  ;;  %v10715_v0 = vld [vmem:[#allocation24_spill] sm:$0xff]  ;;  %v10727_v12 = vld [vmem:[#allocation73_spill] sm:$0xff] }
 0xc0d   : > { %v10710_v34 = vld [vmem:[#allocation74_spill] sm:$0xff] }
 0xc0e   : > { %v6328_v28 = vadd.f32 %v6320_v11, %v6258_v54  ;;  %v10712_v40 = vld [vmem:[#allocation70_spill] sm:$0xff] }
 0xc0f   : > { %v10309_v15 = vpop.f32.mrf.mxu1 }
 0xc17   : > { %v6459_v7 = vpop.f32.mrf.mxu1 }
 0xc18   : > { %v6479_v60 = vmul.f32 %v6459_v7, %v9765_v6  ;;  %v6358_v6 = vpop.f32.mrf.mxu3  ;;  %v6120_v7 = vmul.f32 %v10694_v14, %v10693_v3 }
 0xc19   : > { %v6374_v27 = vmul.f32 %v6358_v6, %v9928_v2  ;;  %v6309_v2 = vpop.f32.mrf.mxu2 }
 0xc1a   : > { %v6487_v5 = vadd.f32 %v6479_v60, %v6433_v16  ;;  %v10696_v16 = vld [vmem:[#allocation52_spill] sm:$0xff]  ;;  %v6128_v42 = vadd.f32 %v6120_v7, %v6042_v53  ;;  %v6322_v39 = vmul.f32 %v6309_v2, %v10708_v63  ;;  %v10719_v7 = vld [vmem:[#allocation26_spill] sm:$0xff] }
 0xc1b   : > { %v6382_v58 = vadd.f32 %v6374_v27, %v6328_v28  ;;  %v6428_v60 = vmul.f32 %v6412_v26, %v10696_v16  ;;  %v6121_v26 = vmul.f32 %v10707_v31, %v10706_v20 }
 0xc1c   : > { %6503 = vrot.lane.b32.xlu0 %v6487_v5, %s7569_s18  ;;  %v10699_v5 = vld [vmem:[#allocation67_spill] sm:$0xff] }
 0xc1d   : > { %v6035_v21 = vmul.f32 %v10699_v5, %v10698_v37  ;;  %v6436_v6 = vadd.f32 %v6428_v60, %v6382_v58  ;;  %v10722_v60 = vld [vmem:[#allocation16_spill] sm:$0xff] }
 0xc1e   : > { %v10724_v5 = vld [vmem:[#allocation28_spill] sm:$0xff] }
 0xc1f   : > { %v6461_v50 = vpop.f32.mrf.mxu1  ;;  %v6043_v32 = vadd.f32 %v6035_v21, %v5973_v17  ;;  %v6192_v17 = vmul.f32 %v10727_v12, %v10726_v57 }
 0xc20   : > { %v6480_v25 = vmul.f32 %v6461_v50, %v9838_v49  ;;  %v6427_v49 = vmul.f32 %v6410_v52, %v9840_v59  ;;  %v6361_v22 = vpop.f32.mrf.mxu3  ;;  %v6189_v59 = vmul.f32 %v10692_v38, %v10691_v56  ;;  %v6321_v52 = vmul.f32 %v6307_v51, %v10695_v29  ;;  %v10709_v51 = vld [vmem:[#allocation53_spill] sm:$0xff]  ;;  %v10720_v29 = vld [vmem:[#allocation23_spill] sm:$0xff] }
 0xc21   : > { %v6375_v13 = vmul.f32 %v6361_v22, %v10700_v23  ;;  %v6129_v54 = vadd.f32 %v6121_v26, %v6043_v32  ;;  %v10716_v56 = vld [vmem:[#allocation69_spill] sm:$0xff]  ;;  %v10729_v32 = vld [vmem:[#allocation30_spill] sm:$0xff] }
 0xc22   : > { %v6488_v19 = vadd.f32 %v6480_v25, %v6434_v61  ;;  %v6435_v4 = vadd.f32 %v6427_v49, %v6381_v46  ;;  %v6197_v44 = vadd.f32 %v6189_v59, %v6127_v36  ;;  %v6190_v61 = vmul.f32 %v10705_v9, %v10704_v18  ;;  %v6417_v49 = vpop.f32.mrf.mxu0  ;;  %v10711_v36 = vld [vmem:[#allocation10_spill] sm:$0xff]  ;;  %v10717_v59 = vld [vmem:[#allocation20_spill] sm:$0xff] }
 0xc23   : > { %v6429_v46 = vmul.f32 %v6415_v43, %v10709_v51  ;;  %v6036_v22 = vmul.f32 %v10712_v40, %v10711_v36  ;;  %v6191_v38 = vmul.f32 %v10716_v56, %v10715_v0  ;;  %v10735_v56 = vld [vmem:[#allocation14_spill] sm:$0xff] }
 0xc24   : > { %6505 = vrot.lane.b32.xlu1 %v6488_v19, %s7569_s18  ;;  %v6259_v55 = vadd.f32 %v10697_v41, %v6197_v44  ;;  %v6198_v47 = vadd.f32 %v6190_v61, %v6128_v42  ;;  %v10728_v61 = vld [vmem:[#allocation27_spill] sm:$0xff] }
 0xc25   : > { %v6199_v14 = vadd.f32 %v6191_v38, %v6129_v54 }
 0xc26   : > { %v6329_v30 = vadd.f32 %v6321_v52, %v6259_v55  ;;  %v6260_v11 = vadd.f32 %v10710_v34, %v6198_v47  ;;  %v10721_v52 = vld [vmem:[#allocation71_spill] sm:$0xff]  ;;  %v10723_v55 = vld [vmem:[#allocation62_spill] sm:$0xff] }
 0xc27   : > { %v6464_v35 = vpop.f32.mrf.mxu1  ;;  %v6122_v2 = vmul.f32 %v10721_v52, %v10720_v29  ;;  %v6261_v41 = vadd.f32 %v10722_v60, %v6199_v14  ;;  %v6430_v42 = vmul.f32 %v6417_v49, %v10723_v55  ;;  %v10738_v29 = vld [vmem:[#allocation15_spill] sm:$0xff] }
 0xc28   : > { %v6481_v1 = vmul.f32 %v6464_v35, %v10688_v10  ;;  %v6363_v50 = vpop.f32.mrf.mxu3  ;;  %v6383_v19 = vadd.f32 %v6375_v13, %v6329_v30  ;;  %v6312_v35 = vpop.f32.mrf.mxu2  ;;  %v6330_v27 = vadd.f32 %v6322_v39, %v6260_v11  ;;  %v10725_v13 = vld [vmem:[#allocation63_spill] sm:$0xff]  ;;  %v10730_v39 = vld [vmem:[#allocation29_spill] sm:$0xff]  ;;  %v10732_v11 = vld [vmem:[#allocation56_spill] sm:$0xff] }
 0xc29   : > { %v6323_v58 = vmul.f32 %v6312_v35, %v10719_v7  ;;  %v6535_v49 = vperm.slane %v10732_v11, 2 }
 0xc2a   : > { %v6489_v62 = vadd.f32 %v6481_v1, %v6435_v4  ;;  %v10713_v4 = vld [vmem:[#allocation61_spill] sm:$0xff]  ;;  %v6437_v1 = vadd.f32 %v6429_v46, %v6383_v19  ;;  %v10731_v46 = vld [vmem:[#allocation32_spill] sm:$0xff] }
 0xc2b   : > { %v6376_v10 = vmul.f32 %v6363_v50, %v10713_v4  ;;  %v6331_v37 = vadd.f32 %v6323_v58, %v6261_v41  ;;  %v10740_v41 = vld [vmem:[#allocation18_spill] sm:$0xff] }
 0xc2c   : > { %6507 = vrot.lane.b32.xlu2 %v6489_v62, %s7569_s18  ;;  %v10718_v62 = vld [vmem:[#allocation50_spill] sm:$0xff] }
 0xc2d   : > { %v5974_v53 = vmul.f32 %v10718_v62, %v10717_v59  ;;  %v6384_v16 = vadd.f32 %v6376_v10, %v6330_v27  ;;  %v10734_v27 = vld [vmem:[#allocation33_spill] sm:$0xff]  ;;  %v10736_v59 = vld [vmem:[#allocation12_spill] sm:$0xff] }
 0xc2f   : > { %v6466_v45 = vpop.f32.mrf.mxu1  ;;  %v6044_v43 = vadd.f32 %v6036_v22, %v5974_v53  ;;  %v6438_v23 = vadd.f32 %v6430_v42, %v6384_v16  ;;  %v10733_v22 = vld [vmem:[#allocation31_spill] sm:$0xff]  ;;  %v10737_v53 = vld [vmem:[#allocation13_spill] sm:$0xff] }
 0xc30   : > { %v6482_v8 = vmul.f32 %v6466_v45, %v10701_v48  ;;  %v6366_v44 = vpop.f32.mrf.mxu3  ;;  %v6420_v48 = vpop.f32.mrf.mxu0 }
 0xc31   : > { %v6377_v21 = vmul.f32 %v6366_v44, %v10724_v5  ;;  %v6130_v30 = vadd.f32 %v6122_v2, %v6044_v43  ;;  %v6431_v20 = vmul.f32 %v6420_v48, %v10729_v32  ;;  %v10739_v2 = vld [vmem:[#allocation8_spill] sm:$0xff] }
 0xc32   : > { %v6490_v25 = vadd.f32 %v6482_v8, %v6436_v6  ;;  %v6314_v8 = vpop.f32.mrf.mxu2 }
 0xc33   : > { %v6385_v18 = vadd.f32 %v6377_v21, %v6331_v37  ;;  %v6200_v9 = vadd.f32 %v6192_v17, %v6130_v30 }
 0xc34   : > { %6509 = vrot.lane.b32.xlu0 %v6490_v25, %s7569_s18  ;;  %v6324_v25 = vmul.f32 %v6314_v8, %v10728_v61 }
 0xc35   : > { %v6262_v26 = vadd.f32 %v10309_v15, %v6200_v9  ;;  %v6439_v19 = vadd.f32 %v6431_v20, %v6385_v18 }
 0xc37   : > { %v6469_v28 = vpop.f32.mrf.mxu1  ;;  %v6332_v63 = vadd.f32 %v6324_v25, %v6262_v26 }
 0xc38   : > { %v6483_v33 = vmul.f32 %v6469_v28, %v10714_v24  ;;  %v6368_v31 = vpop.f32.mrf.mxu3  ;;  %v6422_v36 = vpop.f32.mrf.mxu0 }
 0xc39   : > { %v6378_v51 = vmul.f32 %v6368_v31, %v10730_v39  ;;  %v6432_v35 = vmul.f32 %v6422_v36, %v10733_v22 }
 0xc3a   : > { %v6491_v3 = vadd.f32 %v6483_v33, %v6437_v1 }
 0xc3b   : > { %v6386_v40 = vadd.f32 %v6378_v51, %v6332_v63 }
 0xc3c   : > { %6511 = vrot.lane.b32.xlu1 %v6491_v3, %s7569_s18 }
 0xc3d   : > { %v6440_v15 = vadd.f32 %v6432_v35, %v6386_v40 }
 0xc3f   : > { %v6471_v45 = vpop.f32.mrf.mxu1 }
 0xc40   : > { %v6484_v6 = vmul.f32 %v6471_v45, %v10725_v13  ;;  %v10741_v45 = vld [vmem:[#allocation11_spill] sm:$0xff] }
 0xc42   : > { %v6492_v50 = vadd.f32 %v6484_v6, %v6438_v23  ;;  %v10742_v6 = vld [vmem:[#allocation7_spill] sm:$0xff] }
 0xc44   : > { %6513 = vrot.lane.b32.xlu2 %v6492_v50, %s7569_s18 }
 0xc47   : > { %v6474_v47 = vpop.f32.mrf.mxu1 }
 0xc48   : > { %v6485_v34 = vmul.f32 %v6474_v47, %v10731_v46 }
 0xc4a   : > { %v6493_v54 = vadd.f32 %v6485_v34, %v6439_v19 }
 0xc4c   : > { %6537 = vrot.lane.b32.xlu2 %v6535_v49, %s7569_s18  ;;  %6515 = vrot.lane.b32.xlu0 %v6493_v54, %s7569_s18 }
 0xc4f   : > { %v6476_v28 = vpop.f32.mrf.mxu1 }
 0xc50   : > { %v6486_v4 = vmul.f32 %v6476_v28, %v10734_v27 }
 0xc52   : > { %v6494_v10 = vadd.f32 %v6486_v4, %v6440_v15 }
 0xc54   : > { %6517 = vrot.lane.b32.xlu1 %v6494_v10, %s7569_s18  ;;  %s7520_s18 = scalar_lea.hbm %s10467_s8, 128 }
 0xc86   : > { %v6508_v1 = vpop.permute.xlu2 %6507 }
 0xc87   : > { %v6529_v38 = vadd.f32 %v6508_v1, %v10735_v56 }
 0xc8e   : > { %v6504_v33 = vpop.permute.xlu0 %6503 }
 0xc8f   : > { %v6527_v62 = vadd.f32 %v6504_v33, %v10736_v59 }
 0xc96   : > { %v6506_v0 = vpop.permute.xlu1 %6505 }
 0xc97   : > { %v6528_v3 = vadd.f32 %v6506_v0, %v10737_v53 }
 0xc9e   : > { %v6514_v24 = vpop.permute.xlu2 %6513 }
 0xc9f   : > { %v6532_v16 = vadd.f32 %v6514_v24, %v10739_v2 }
 0xca6   : > { %v6538_v14 = vpop.permute.xlu2 %6537  ;;  %v6510_v43 = vpop.permute.xlu0 %6509 }
 0xca7   : > { %v6542_v7 = vadd.f32 %v6538_v14, %v6529_v38  ;;  %v6540_v58 = vadd.f32 %v6538_v14, %v6527_v62  ;;  %v6541_v44 = vadd.f32 %v6538_v14, %v6528_v3  ;;  %v6530_v52 = vadd.f32 %v6510_v43, %v10738_v29 }
 0xca8   : > { %v6545_v42 = vadd.f32 %v6538_v14, %v6532_v16 }
 0xca9   : > { %6560 = vrot.lane.b32.xlu2 %v6542_v7, %s7566_s20  ;;  %6556 = vrot.lane.b32.xlu0 %v6540_v58, %s7566_s20  ;;  %v6543_v37 = vadd.f32 %v6538_v14, %v6530_v52 }
 0xcaa   : > { %6558 = vrot.lane.b32.xlu1 %v6541_v44, %s7566_s20 }
 0xcae   : > { %v6512_v60 = vpop.permute.xlu1 %6511 }
 0xcaf   : > { %v6531_v55 = vadd.f32 %v6512_v60, %v10740_v41 }
 0xcb1   : > { %v6544_v5 = vadd.f32 %v6538_v14, %v6531_v55  ;;  %6566 = vrot.lane.b32.xlu2 %v6545_v42, %s7566_s20  ;;  %6562 = vrot.lane.b32.xlu0 %v6543_v37, %s7566_s20 }
 0xcb3   : > { %6564 = vrot.lane.b32.xlu1 %v6544_v5, %s7566_s20 }
 0xcbe   : > { %v6516_v21 = vpop.permute.xlu0 %6515 }
 0xcbf   : > { %v6533_v30 = vadd.f32 %v6516_v21, %v10741_v45 }
 0xcc1   : > { %v6546_v23 = vadd.f32 %v6538_v14, %v6533_v30 }
 0xcc3   : > { %6568 = vrot.lane.b32.xlu0 %v6546_v23, %s7566_s20 }
 0xcc6   : > { %v6518_v13 = vpop.permute.xlu1 %6517 }
 0xcc7   : > { %v6534_v48 = vadd.f32 %v6518_v13, %v10742_v6 }
 0xcc9   : > { %v6547_v8 = vadd.f32 %v6538_v14, %v6534_v48 }
 0xccb   : > { %6570 = vrot.lane.b32.xlu1 %v6547_v8, %s7566_s20  ;;  %s7307_s20 = sshll.u32 %s7641_s7, 6 }
 0xccc   : > { %s6601_s25 = scalar_lea.hbm %s10467_s8, %s7307_s20 }
 0xccd   : > { %s6604_s27 = sshll.u32 %s6601_s25, 4  ;;  %s6605_s27 = int_to_ptr.hbm [resolvable:$true] %s6604_s27 }
 0xcce   : > { %s7514_s11 = sshra.s32 %s6605_s27, 4  ;;  %s7515_s11 = int_to_ptr.hbm [resolvable:$true] %s7514_s11 }
 0xccf   : > { %s7516_s13 = scalar_lea.hbm %s7515_s11, 64  ;;  %p7521_p0 = scmp.lt.s32.totalorder %s7515_s11, %s10467_s8 }
 0xcd0   : > { %p7517_p11 = scmp.ne.s32.totalorder %s7515_s11, %s7516_s13  ;;  %p7522_p1 = scmp.lt.s32.totalorder %s7520_s18, %s7516_s13 }
 0xcd2   : > { %p7518_p12 = pnand %p7517_p11, %p7658_p5  ;;  %p7523_p2 = por %p7522_p1, %p7521_p0 }
 0xcd4   : > { %p7519_p13 = pneg %p7518_p12 }
 0xcd6   : > { %p7524_p3 = pnand %p7523_p2, %p7519_p13 }
 0xd03   : > { %v6561_v57 = vpop.permute.xlu2 %6560 }
 0xd04   : > { %6583 = vst.msk [vmem:[%s299_s21 + $0x10] sm:$0xff] %vm6580_vm15, %v6561_v57 }
 0xd0b   : > { %v6567_v12 = vpop.permute.xlu2 %6566 }
 0xd0c   : > { %6586 = vst.msk [vmem:[%s299_s21 + $0x28] sm:$0xff] %vm6580_vm15, %v6567_v12 }
 0xd1b   : > { %v6557_v17 = vpop.permute.xlu0 %6556 }
 0xd1c   : > { %6581 = vst.msk [vmem:[%s299_s21] sm:$0xff] %vm6580_vm15, %v6557_v17  ;;  %v6559_v50 = vpop.permute.xlu1 %6558 }
 0xd1d   : > { %6582 = vst.msk [vmem:[%s299_s21 + $0x8] sm:$0xff] %vm6580_vm15, %v6559_v50 }
 0xd23   : > { %v6563_v18 = vpop.permute.xlu0 %6562 }
 0xd24   : > { %6584 = vst.msk [vmem:[%s299_s21 + $0x18] sm:$0xff] %vm6580_vm15, %v6563_v18 }
 0xd25   : > { %v6565_v9 = vpop.permute.xlu1 %6564 }
 0xd26   : > { %6585 = vst.msk [vmem:[%s299_s21 + $0x20] sm:$0xff] %vm6580_vm15, %v6565_v9 }
 0xd35   : > { %v6569_v61 = vpop.permute.xlu0 %6568 }
 0xd36   : > { %6587 = vst.msk [vmem:[%s299_s21 + $0x30] sm:$0xff] %vm6580_vm15, %v6569_v61 }
 0xd3d   : > { %v6571_v25 = vpop.permute.xlu1 %6570 }
 0xd3e   : > { %6588 = vst.msk [vmem:[%s299_s21 + $0x38] sm:$0xff] %vm6580_vm15, %v6571_v25 }
 0xd3f   : > { %7527 = shalt.err (!%p7524_p3)
}
 0xd40   : > { %s7570_s19 = smov 128   ;;  %s7571_s21 = smov 8  }
 0xd41   : > { %7316 = dma.vmem_to_hbm [thread:$0]  (%p7658_p5), %s6603_s26, 1024, %s6605_s27, %s6590_s28, %s7570_s19, %s7570_s19, %s7571_s21  }
 0xd42 PF: > { %p7322_p4 = scmp.ge.s32.totalorder %s7562_s10, 2  ;;  %s6619_s22 = sand.u32 1, %s7550_s29  }
 0xd43   : > { %s6620_s23 = scalar_lea.sflag [#allocation4], %s6619_s22 }
 0xd44   : > { %p7319_p7 = pnand %p7322_p4, %p7662_p6 }
 0xd46   : > { %p7320_p8 = pneg %p7319_p7 }
 0xd48   : > { %7545 = dma.done.wait (%p7320_p8), %s6620_s23, 1024  }
 0xd49   : > { %7547 = vsyncadd (%p7320_p8), %s6620_s23, 4294966272  ;;  %p19_p9 = scmp.ge.s32.totalorder %s7645_s12, 4   ;;  %s10743_s29 = smov %s7554_s30 }
 0xd4a   : > { %s10744_s30 = smov %s7558_s9  ;;  %s10745_s9 = smov %s7656_s15 }
 0xd4b   : > { %s10746_s10 = smov %s7645_s12  ;;  %21 = sbr.rel (!%p19_p9) target bundleno = 5 (0x5), region = 118 }
 0xd50   :  { %6626 = vsyncpa [#allocation4], 1 }
 0xd51   :  { %6628 = vsyncpa [#allocation4 + $0x1], 1 }

</bundles_post_ra>
